<compile_context>
chip_gen: v6e
topology: v6e:2x2x1
jax: 0.10.0
libtpu: 0.0.40
codegen_flags: <defaults>
</compile_context>

<pallas_src>
import jax
import jax.numpy as jnp
from jax.experimental import pallas as pl
from jax.experimental.pallas import tpu as pltpu


def _round_up(x, m):
    return ((x + m - 1) // m) * m


def _pick_b_tile(B):
    """Prefer >=2 batch-grid iterations (v7x megacore) with an 8-aligned tile."""
    cands = [b for b in (32, 16, 8) if B % b == 0]
    multi = [b for b in cands if B // b >= 2]
    if multi:
        return max(multi)
    if cands:
        return max(cands)
    return B  # tiny batch: block dim == full array dim (always a legal block)


def _make_kernel(*, C, F, b_tile, s_tile, chunk, n_chunks, S, inv_s, use_vpu,
                 needs_mask):
    """Fused backbone (1x1 conv + ReLU + GAP) + 3-head classifier kernel."""

    def kernel(x_ref, w1_ref, b1_ref, wh_ref, bh_ref, out_ref, acc_ref):
        s_idx = pl.program_id(1)

        @pl.when(s_idx == 0)
        def _init():
            acc_ref[...] = jnp.zeros_like(acc_ref)

        w1t = w1_ref[...]                              # (F, C)
        b1c = b1_ref[...]                              # (F, 1)

        # --- per-chunk x loaders (whole-tile value slices when there is only
        # one chunk, ref slices with a dynamic lane offset otherwise) ---------
        if n_chunks == 1:
            x_tile = x_ref[...]                        # (Bt, C, chunk)

            def load_bc(c, off):                       # (Bt, chunk), channel c
                return x_tile[:, c, :]

            def load_cb(b, off):                       # (C, chunk), batch row b
                return x_tile[b]
        else:
            def load_bc(c, off):
                return x_ref[:, c, pl.ds(off, chunk)]

            def load_cb(b, off):
                return x_ref[b, :, pl.ds(off, chunk)]

        if use_vpu:
            # ---- VPU path (small C): unrolled channel FMA on (F, Bt, chunk).
            # Hoist every loop-invariant broadcast once per grid step so the
            # chunk loop is pure VALU mul/add (the x slab broadcasts along the
            # leading F dim for free).
            w_full = [
                jnp.broadcast_to(w1t[:, c:c + 1][:, :, None],
                                 (F, b_tile, chunk))
                for c in range(C)
            ]
            b_full = jnp.broadcast_to(b1c[:, :, None], (F, b_tile, chunk))

            def chunk_body(ci, carry):
                off = (ci * chunk if isinstance(ci, int)
                       else pl.multiple_of(ci * chunk, chunk))
                x0 = load_bc(0, off)                          # (Bt, chunk)
                h = x0[None, :, :] * w_full[0]                # (F, Bt, chunk)
                for c in range(1, C):
                    h = h + load_bc(c, off)[None, :, :] * w_full[c]
                h = jnp.maximum(h + b_full, 0.0)
                if needs_mask:
                    lane = jax.lax.broadcasted_iota(jnp.int32, (1, 1, chunk), 2)
                    valid = (s_idx * s_tile + off + lane) < S
                    h = jnp.where(valid, h, 0.0)
                acc_ref[...] += h                             # unmasked VALU add
                return carry

            if n_chunks == 1:
                chunk_body(0, 0)
            elif n_chunks <= 8:
                jax.lax.fori_loop(0, n_chunks, chunk_body, 0, unroll=True)
            else:
                jax.lax.fori_loop(0, n_chunks, chunk_body, 0)
        else:
            # ---- MXU fallback (wide C): per-row (F,C)@(C,chunk) dots,
            # lane-dense (F, chunk) tiles, same accumulator layout.
            def chunk_body(ci, carry):
                off = (ci * chunk if isinstance(ci, int)
                       else pl.multiple_of(ci * chunk, chunk))
                if needs_mask:
                    lane = jax.lax.broadcasted_iota(jnp.int32, (1, chunk), 1)
                    valid = (s_idx * s_tile + off + lane) < S
                for b in range(b_tile):
                    xb = load_cb(b, off)                      # (C, chunk)
                    hb = jnp.dot(w1t, xb,
                                 preferred_element_type=jnp.float32)  # (F, chunk)
                    hb = jnp.maximum(hb + b1c, 0.0)
                    if needs_mask:
                        hb = jnp.where(valid, hb, 0.0)
                    acc_ref[:, b, :] += hb
                return carry

            if n_chunks == 1:
                chunk_body(0, 0)
            else:
                jax.lax.fori_loop(0, n_chunks, chunk_body, 0)

        @pl.when(s_idx == pl.num_programs(1) - 1)
        def _finalize():
            # single cross-lane reduce + global-average-pool scale, then the
            # fused root|vowel|consonant heads (lane-dense 256-wide store).
            feat_t = jnp.sum(acc_ref[...], axis=-1) * inv_s          # (F, Bt)
            logits = jax.lax.dot_general(
                feat_t, wh_ref[...],
                dimension_numbers=(((0,), (0,)), ((), ())),
                preferred_element_type=jnp.float32) + bh_ref[...]    # (Bt, Npad)
            out_ref[...] = logits.astype(out_ref.dtype)

    return kernel


def bengali_forward(x_nchw, params, *, s_tile=None, b_tile=None):
    """x_nchw: (B, C, H, W) float32 (PyTorch conv layout). Returns (root, vowel, cons)."""
    w1, b1, wr, br, wv, bv, wc, bc = params
    B, C, H, W = x_nchw.shape
    S = H * W
    F = w1.shape[1]

    # Free view: keep spatial last (lane-dense). No HBM transpose pass.
    x = x_nchw.reshape(B, C, S)

    # Fuse the three heads into one matmul, zero-padded to a 128-lane multiple.
    n_root, n_vowel, n_cons = wr.shape[1], wv.shape[1], wc.shape[1]
    n_total = n_root + n_vowel + n_cons
    n_pad = _round_up(n_total, 128)
    wh = jnp.concatenate([wr, wv, wc], axis=1)
    bh = jnp.concatenate([br, bv, bc], axis=1)
    if n_pad > n_total:
        wh = jnp.pad(wh, ((0, 0), (0, n_pad - n_total)))
        bh = jnp.pad(bh, ((0, 0), (0, n_pad - n_total)))

    # Backbone weight orientation shared by both compute paths: (F, C) + (F, 1).
    w1t = w1.T
    b1c = b1.reshape(F, 1)

    # --- tile selection -------------------------------------------------------
    if b_tile is None:
        b_tile = _pick_b_tile(B)
    assert B % b_tile == 0, "batch tile must divide batch"
    assert (b_tile % 8 == 0) or (b_tile == B), "batch tile must be 8-aligned or full"

    CHUNK = 128
    if S < CHUNK:
        s_tile, chunk, needs_mask = S, S, False
    else:
        chunk = CHUNK
        s_hi = (S // CHUNK) * CHUNK                 # largest 128-multiple <= S
        if s_tile is None:
            # >=2 S-steps for DMA/compute overlap, capped at 4096 lanes/step.
            s_tile = min(4096, _round_up(max(S // 2, CHUNK), CHUNK))
        else:
            s_tile = _round_up(s_tile, CHUNK)
        s_tile = min(s_tile, s_hi)
        needs_mask = (S % s_tile) != 0              # ragged tail -> in-kernel mask
    n_s = pl.cdiv(S, s_tile)
    n_chunks = s_tile // chunk

    use_vpu = (C <= 16) and (F <= 256)
    kernel = _make_kernel(C=C, F=F, b_tile=b_tile, s_tile=s_tile, chunk=chunk,
                          n_chunks=n_chunks, S=S, inv_s=1.0 / float(S),
                          use_vpu=use_vpu, needs_mask=needs_mask)

    grid = (B // b_tile, n_s)
    out = pl.pallas_call(
        kernel,
        out_shape=jax.ShapeDtypeStruct((B, n_pad), jnp.float32),
        grid_spec=pltpu.PrefetchScalarGridSpec(
            num_scalar_prefetch=0,
            grid=grid,
            in_specs=[
                # streamed activations: the only per-step HBM traffic
                pl.BlockSpec((b_tile, C, s_tile), lambda b, s: (b, 0, s)),
                # weights / biases: constant index maps -> VMEM-resident
                pl.BlockSpec((F, C), lambda b, s: (0, 0)),
                pl.BlockSpec((F, 1), lambda b, s: (0, 0)),
                pl.BlockSpec((F, n_pad), lambda b, s: (0, 0)),
                pl.BlockSpec((1, n_pad), lambda b, s: (0, 0)),
            ],
            out_specs=pl.BlockSpec((b_tile, n_pad), lambda b, s: (b, 0)),
            scratch_shapes=[pltpu.VMEM((F, b_tile, chunk), jnp.float32)],
        ),
        compiler_params=pltpu.CompilerParams(
            dimension_semantics=("parallel", "arbitrary")),
    )(x, w1t, b1c, wh, bh)

    return (out[:, :n_root],
            out[:, n_root:n_root + n_vowel],
            out[:, n_root + n_vowel:n_total])


def init_params(key, in_channels, fc_out, root_classes, vowel_classes, consonant_classes):
    ks = jax.random.split(key, 8)
    scale = 0.02
    # backbone 1x1-conv weight stored as (C_in, F)  (already "transposed")
    w1 = scale * jax.random.normal(ks[0], (in_channels, fc_out), jnp.float32)
    b1 = scale * jax.random.normal(ks[1], (1, fc_out), jnp.float32)
    # nn.Linear(fc_out, N): weight (N, fc_out) in torch -> pass as (fc_out, N)
    wr = scale * jax.random.normal(ks[2], (fc_out, root_classes), jnp.float32)
    br = scale * jax.random.normal(ks[3], (1, root_classes), jnp.float32)
    wv = scale * jax.random.normal(ks[4], (fc_out, vowel_classes), jnp.float32)
    bv = scale * jax.random.normal(ks[5], (1, vowel_classes), jnp.float32)
    wc = scale * jax.random.normal(ks[6], (fc_out, consonant_classes), jnp.float32)
    bc = scale * jax.random.normal(ks[7], (1, consonant_classes), jnp.float32)
    return (w1, b1, wr, br, wv, bv, wc, bc)


def reference_forward(x_nchw, params):
    """Plain-JAX reference mirroring the PyTorch semantics."""
    w1, b1, wr, br, wv, bv, wc, bc = params
    B, C, H, W = x_nchw.shape
    x = jnp.transpose(x_nchw, (0, 2, 3, 1)).reshape(B, H * W, C)
    h = jnp.maximum(jnp.einsum('bsc,cf->bsf', x, w1) + b1, 0.0)
    feat = jnp.mean(h, axis=1)
    return (feat @ wr + br, feat @ wv + bv, feat @ wc + bc)


if __name__ == "__main__":
    # Small shapes: batch=2, channels=4, spatial=16x16, fc_out(hidden)=32
    B, C, H, W = 2, 4, 16, 16
    FC_OUT = 32
    ROOT, VOWEL, CONS = 168, 11, 7

    key = jax.random.PRNGKey(0)
    kx, kp = jax.random.split(key)
    x = jax.random.normal(kx, (B, C, H, W), jnp.float32)
    params = init_params(kp, C, FC_OUT, ROOT, VOWEL, CONS)

    # s_tile=128 -> two S steps over S=256, exercising the streamed accumulator
    # init/finalize path and the chunked VPU FMA.
    root_pred, vowel_pred, cons_pred = jax.block_until_ready(
        bengali_forward(x, params, s_tile=128))

    # sanity check against plain-JAX reference
    r_ref, v_ref, c_ref = reference_forward(x, params)
    assert root_pred.shape == (B, ROOT)
    assert vowel_pred.shape == (B, VOWEL)
    assert cons_pred.shape == (B, CONS)
    assert jnp.allclose(root_pred, r_ref, atol=1e-5, rtol=1e-5)
    assert jnp.allclose(vowel_pred, v_ref, atol=1e-5, rtol=1e-5)
    assert jnp.allclose(cons_pred, c_ref, atol=1e-5, rtol=1e-5)

    print("KERNEL_OK")
</pallas_src>

<mosaic_0001>
module attributes {stable_mosaic.version = 11 : i64} {
  func.func @kernel(%arg0: i32, %arg1: i32, %arg2: memref<2x4x128xf32, #tpu.memory_space<vmem>>, %arg3: memref<32x4xf32, #tpu.memory_space<vmem>>, %arg4: memref<32x1xf32, #tpu.memory_space<vmem>>, %arg5: memref<32x256xf32, #tpu.memory_space<vmem>>, %arg6: memref<1x256xf32, #tpu.memory_space<vmem>>, %arg7: memref<2x256xf32, #tpu.memory_space<vmem>>, %arg8: memref<32x2x128xf32, #tpu.memory_space<vmem>>) attributes {dimension_semantics = [#tpu.dimension_semantics<parallel>, #tpu.dimension_semantics<arbitrary>], iteration_bounds = array<i64: 1, 2>, scalar_prefetch = 0 : i64, scratch_operands = 1 : i64, tpu.core_type = #tpu.core_type<tc>, window_params = [{transform_indices = @transform_0, window_bounds = array<i64: 2, 4, 128>}, {pipeline_mode = #tpu.pipeline_mode<synchronous>, transform_indices = @transform_1, window_bounds = array<i64: 32, 4>}, {pipeline_mode = #tpu.pipeline_mode<synchronous>, transform_indices = @transform_2, window_bounds = array<i64: 32, 1>}, {pipeline_mode = #tpu.pipeline_mode<synchronous>, transform_indices = @transform_3, window_bounds = array<i64: 32, 256>}, {pipeline_mode = #tpu.pipeline_mode<synchronous>, transform_indices = @transform_4, window_bounds = array<i64: 1, 256>}, {transform_indices = @transform_5, window_bounds = array<i64: 2, 256>}]} {
    %c0_i32 = arith.constant 0 : i32
    %0 = arith.cmpi eq, %arg1, %c0_i32 : i32
    %1 = arith.extui %0 : i1 to i32
    %c0_i32_0 = arith.constant 0 : i32
    %2 = arith.cmpi ne, %1, %c0_i32_0 : i32
    scf.if %2 {
      %cst_14 = arith.constant 0.000000e+00 : f32
      %57 = vector.broadcast %cst_14 : f32 to vector<32x2x128xf32>
      %c0_15 = arith.constant 0 : index
      %c0_16 = arith.constant 0 : index
      %c0_17 = arith.constant 0 : index
      %58 = vector.load %arg8[%c0_15, %c0_16, %c0_17] : memref<32x2x128xf32, #tpu.memory_space<vmem>>, vector<32x2x128xf32>
      tpu.vector_store %arg8[%c0_15, %c0_16, %c0_17], %57 {strides = array<i32>} : memref<32x2x128xf32, #tpu.memory_space<vmem>>, vector<32x2x128xf32>,
    } else {
    }
    %c0 = arith.constant 0 : index
    %c0_1 = arith.constant 0 : index
    %3 = vector.load %arg3[%c0, %c0_1] : memref<32x4xf32, #tpu.memory_space<vmem>>, vector<32x4xf32>
    %c0_2 = arith.constant 0 : index
    %c0_3 = arith.constant 0 : index
    %4 = vector.load %arg4[%c0_2, %c0_3] : memref<32x1xf32, #tpu.memory_space<vmem>>, vector<32x1xf32>
    %c0_4 = arith.constant 0 : index
    %c0_5 = arith.constant 0 : index
    %c0_6 = arith.constant 0 : index
    %5 = vector.load %arg2[%c0_4, %c0_5, %c0_6] : memref<2x4x128xf32, #tpu.memory_space<vmem>>, vector<2x4x128xf32>
    %6 = vector.extract_strided_slice %3 {offsets = [0, 0], sizes = [32, 1], strides = [1, 1]} : vector<32x4xf32> to vector<32x1xf32>
    %7 = vector.shape_cast %6 : vector<32x1xf32> to vector<32x1x1xf32>
    %8 = vector.shape_cast %7 : vector<32x1x1xf32> to vector<32x1x1xf32>
    %9 = vector.broadcast %8 : vector<32x1x1xf32> to vector<32x2x128xf32>
    %10 = vector.extract_strided_slice %3 {offsets = [0, 1], sizes = [32, 1], strides = [1, 1]} : vector<32x4xf32> to vector<32x1xf32>
    %11 = vector.shape_cast %10 : vector<32x1xf32> to vector<32x1x1xf32>
    %12 = vector.shape_cast %11 : vector<32x1x1xf32> to vector<32x1x1xf32>
    %13 = vector.broadcast %12 : vector<32x1x1xf32> to vector<32x2x128xf32>
    %14 = vector.extract_strided_slice %3 {offsets = [0, 2], sizes = [32, 1], strides = [1, 1]} : vector<32x4xf32> to vector<32x1xf32>
    %15 = vector.shape_cast %14 : vector<32x1xf32> to vector<32x1x1xf32>
    %16 = vector.shape_cast %15 : vector<32x1x1xf32> to vector<32x1x1xf32>
    %17 = vector.broadcast %16 : vector<32x1x1xf32> to vector<32x2x128xf32>
    %18 = vector.extract_strided_slice %3 {offsets = [0, 3], sizes = [32, 1], strides = [1, 1]} : vector<32x4xf32> to vector<32x1xf32>
    %19 = vector.shape_cast %18 : vector<32x1xf32> to vector<32x1x1xf32>
    %20 = vector.shape_cast %19 : vector<32x1x1xf32> to vector<32x1x1xf32>
    %21 = vector.broadcast %20 : vector<32x1x1xf32> to vector<32x2x128xf32>
    %22 = vector.shape_cast %4 : vector<32x1xf32> to vector<32x1x1xf32>
    %23 = vector.shape_cast %22 : vector<32x1x1xf32> to vector<32x1x1xf32>
    %24 = vector.broadcast %23 : vector<32x1x1xf32> to vector<32x2x128xf32>
    %25 = vector.extract_strided_slice %5 {offsets = [0, 0, 0], sizes = [2, 1, 128], strides = [1, 1, 1]} : vector<2x4x128xf32> to vector<2x1x128xf32>
    %26 = vector.shape_cast %25 : vector<2x1x128xf32> to vector<2x128xf32>
    %27 = vector.shape_cast %26 : vector<2x128xf32> to vector<1x2x128xf32>
    %28 = vector.broadcast %27 : vector<1x2x128xf32> to vector<32x2x128xf32>
    %29 = arith.mulf %28, %9 : vector<32x2x128xf32>
    %30 = vector.extract_strided_slice %5 {offsets = [0, 1, 0], sizes = [2, 1, 128], strides = [1, 1, 1]} : vector<2x4x128xf32> to vector<2x1x128xf32>
    %31 = vector.shape_cast %30 : vector<2x1x128xf32> to vector<2x128xf32>
    %32 = vector.shape_cast %31 : vector<2x128xf32> to vector<1x2x128xf32>
    %33 = vector.broadcast %32 : vector<1x2x128xf32> to vector<32x2x128xf32>
    %34 = arith.mulf %33, %13 : vector<32x2x128xf32>
    %35 = arith.addf %29, %34 : vector<32x2x128xf32>
    %36 = vector.extract_strided_slice %5 {offsets = [0, 2, 0], sizes = [2, 1, 128], strides = [1, 1, 1]} : vector<2x4x128xf32> to vector<2x1x128xf32>
    %37 = vector.shape_cast %36 : vector<2x1x128xf32> to vector<2x128xf32>
    %38 = vector.shape_cast %37 : vector<2x128xf32> to vector<1x2x128xf32>
    %39 = vector.broadcast %38 : vector<1x2x128xf32> to vector<32x2x128xf32>
    %40 = arith.mulf %39, %17 : vector<32x2x128xf32>
    %41 = arith.addf %35, %40 : vector<32x2x128xf32>
    %42 = vector.extract_strided_slice %5 {offsets = [0, 3, 0], sizes = [2, 1, 128], strides = [1, 1, 1]} : vector<2x4x128xf32> to vector<2x1x128xf32>
    %43 = vector.shape_cast %42 : vector<2x1x128xf32> to vector<2x128xf32>
    %44 = vector.shape_cast %43 : vector<2x128xf32> to vector<1x2x128xf32>
    %45 = vector.broadcast %44 : vector<1x2x128xf32> to vector<32x2x128xf32>
    %46 = arith.mulf %45, %21 : vector<32x2x128xf32>
    %47 = arith.addf %41, %46 : vector<32x2x128xf32>
    %48 = arith.addf %47, %24 : vector<32x2x128xf32>
    %cst = arith.constant 0.000000e+00 : f32
    %49 = vector.broadcast %cst : f32 to vector<32x2x128xf32>
    %50 = arith.maximumf %48, %49 : vector<32x2x128xf32>
    %c0_7 = arith.constant 0 : index
    %c0_8 = arith.constant 0 : index
    %c0_9 = arith.constant 0 : index
    %51 = vector.load %arg8[%c0_7, %c0_8, %c0_9] : memref<32x2x128xf32, #tpu.memory_space<vmem>>, vector<32x2x128xf32>
    %52 = arith.addf %51, %50 : vector<32x2x128xf32>
    %c0_10 = arith.constant 0 : index
    %c0_11 = arith.constant 0 : index
    %c0_12 = arith.constant 0 : index
    %53 = vector.load %arg8[%c0_10, %c0_11, %c0_12] : memref<32x2x128xf32, #tpu.memory_space<vmem>>, vector<32x2x128xf32>
    tpu.vector_store %arg8[%c0_10, %c0_11, %c0_12], %52 {strides = array<i32>} : memref<32x2x128xf32, #tpu.memory_space<vmem>>, vector<32x2x128xf32>,
    %c1_i32 = arith.constant 1 : i32
    %54 = arith.cmpi eq, %arg1, %c1_i32 : i32
    %55 = arith.extui %54 : i1 to i32
    %c0_i32_13 = arith.constant 0 : i32
    %56 = arith.cmpi ne, %55, %c0_i32_13 : i32
    scf.if %56 {
      %c0_14 = arith.constant 0 : index
      %c0_15 = arith.constant 0 : index
      %c0_16 = arith.constant 0 : index
      %57 = vector.load %arg8[%c0_14, %c0_15, %c0_16] : memref<32x2x128xf32, #tpu.memory_space<vmem>>, vector<32x2x128xf32>
      %cst_17 = arith.constant dense<0.000000e+00> : vector<32x2xf32>
      %58 = vector.multi_reduction <add>, %57, %cst_17 [2] : vector<32x2x128xf32> to vector<32x2xf32>
      %cst_18 = arith.constant 3.906250e-03 : f32
      %59 = vector.broadcast %cst_18 : f32 to vector<32x2xf32>
      %60 = arith.mulf %58, %59 : vector<32x2xf32>
      %c0_19 = arith.constant 0 : index
      %c0_20 = arith.constant 0 : index
      %61 = vector.load %arg5[%c0_19, %c0_20] : memref<32x256xf32, #tpu.memory_space<vmem>>, vector<32x256xf32>
      %cst_21 = arith.constant dense<0.000000e+00> : vector<2x256xf32>
      %62 = tpu.matmul %60, %61, %cst_21 {dimension_numbers = #tpu.dot_dimension_numbers<[0], [0], [1], [1], [0, 1, 1, 1], [], []>} : vector<32x2xf32>, vector<32x256xf32>, vector<2x256xf32> -> vector<2x256xf32>
      %c0_22 = arith.constant 0 : index
      %c0_23 = arith.constant 0 : index
      %63 = vector.load %arg6[%c0_22, %c0_23] : memref<1x256xf32, #tpu.memory_space<vmem>>, vector<1x256xf32>
      %64 = vector.broadcast %63 : vector<1x256xf32> to vector<2x256xf32>
      %65 = arith.addf %62, %64 : vector<2x256xf32>
      %c0_24 = arith.constant 0 : index
      %c0_25 = arith.constant 0 : index
      %66 = vector.load %arg7[%c0_24, %c0_25] : memref<2x256xf32, #tpu.memory_space<vmem>>, vector<2x256xf32>
      tpu.vector_store %arg7[%c0_24, %c0_25], %65 {strides = array<i32>} : memref<2x256xf32, #tpu.memory_space<vmem>>, vector<2x256xf32>,
    } else {
    }
    return
  }
  func.func @transform_0(%arg0: i32, %arg1: i32) -> (i32, i32, i32) {
    %c0_i32 = arith.constant 0 : i32
    %c0_i32_0 = arith.constant 0 : i32
    return %arg0, %c0_i32, %arg1 : i32, i32, i32
  }
  func.func @transform_1(%arg0: i32, %arg1: i32) -> (i32, i32) {
    %c0_i32 = arith.constant 0 : i32
    %c0_i32_0 = arith.constant 0 : i32
    %c0_i32_1 = arith.constant 0 : i32
    return %c0_i32, %c0_i32_0 : i32, i32
  }
  func.func @transform_2(%arg0: i32, %arg1: i32) -> (i32, i32) {
    %c0_i32 = arith.constant 0 : i32
    %c0_i32_0 = arith.constant 0 : i32
    %c0_i32_1 = arith.constant 0 : i32
    return %c0_i32, %c0_i32_0 : i32, i32
  }
  func.func @transform_3(%arg0: i32, %arg1: i32) -> (i32, i32) {
    %c0_i32 = arith.constant 0 : i32
    %c0_i32_0 = arith.constant 0 : i32
    %c0_i32_1 = arith.constant 0 : i32
    return %c0_i32, %c0_i32_0 : i32, i32
  }
  func.func @transform_4(%arg0: i32, %arg1: i32) -> (i32, i32) {
    %c0_i32 = arith.constant 0 : i32
    %c0_i32_0 = arith.constant 0 : i32
    %c0_i32_1 = arith.constant 0 : i32
    return %c0_i32, %c0_i32_0 : i32, i32
  }
  func.func @transform_5(%arg0: i32, %arg1: i32) -> (i32, i32) {
    %c0_i32 = arith.constant 0 : i32
    %c0_i32_0 = arith.constant 0 : i32
    return %arg0, %c0_i32 : i32, i32
  }
}

</mosaic_0001>

<bundles_post_ra>
// kernel: tpu_custom_call.1
= control target key start
LH: loop header
LB: loop body
LE: loop exit
PB: predicated region body
PF: predicated region fallthrough
CT: control target
= control target key end

     0   :  { %10 = vsyncpa [#allocation4], 0  ;;  %s5978_s0 = inlined_call_operand.hbm [shape: f32[2,4,256], index: 0, kind: input, shape index: {}]   ;;  %s5979_s1 = inlined_call_operand.vmem [shape: f32[32,4], index: 1, kind: input, shape index: {}]   ;;  %s5980_s2 = inlined_call_operand.vmem [shape: f32[32,1], index: 2, kind: input, shape index: {}]   ;;  %s5981_s3 = inlined_call_operand.vmem [shape: f32[32,256], index: 3, kind: input, shape index: {}]   ;;  %s5982_s4 = inlined_call_operand.vmem [shape: f32[1,256], index: 4, kind: input, shape index: {}]   ;;  %s5983_s5 = inlined_call_operand.hbm [shape: f32[2,256], index: 5, kind: output, shape index: {}]  }
   0x1   :  { %12 = vsyncpa [#allocation4 + $0x1], 0 }
   0x2   :  { %13 = vsyncpa [#allocation5], 0  ;;  %s3839_s18 = smov 0   ;;  %s3841_s19 = smov 0  }
   0x3   :  { %s3843_s20 = smov 0   ;;  %s3845_s21 = smov 0  }
   0x4   :  { %s3847_s22 = smov 0   ;;  %s3849_s23 = smov 0  }
   0x5 LB: > { %s3581_s24 = sadd.s32 4294967295, %s3795_s23   ;;  %s28_s25 = sadd.s32 1, %s3791_s22  ;;  %s3795_s23 = sphi %s3849_s23, %s19_s23   ;;  %s3791_s22 = sphi %s3847_s22, %s6416_s22   ;;  %s3787_s21 = sphi %s3845_s21, %s6415_s21   ;;  %s3783_s20 = sphi %s3843_s20, %s6414_s20   ;;  %s3779_s19 = sphi %s3841_s19, %s6413_s19   ;;  %s3775_s18 = sphi %s3839_s18, %s6412_s18  }
   0x6   : > { %p29_p0 = scmp.ge.s32.totalorder %s28_s25, 2  ;;  %s40_s26 = sadd.s32 1, %s3783_s20 }
   0x7   : > { %p47_p1 = scmp.ne.s32.totalorder %s3783_s20, %s3779_s19  ;;  %p48_p2 = scmp.eq.s32.totalorder %s3795_s23, 0 }
   0x8   : > { %s6418_s25 = smov (%p29_p0, %s28_s25), 0  ;;  %p53_p4 = scmp.ne.s32.totalorder %s3779_s19, %s3775_s18 }
   0x9   : > { %p3875_p3 = por %p48_p2, %p47_p1  ;;  %s36_s28 = ssub.s32 %s3791_s22, %s6418_s25 }
   0xa   : > { %p54_p5 = scmp.eq.s32.totalorder %s3581_s24, 0  ;;  %p38_p6 = scmp.eq.s32.totalorder %s36_s28, 0 }
   0xb   : > { %p3606_p8 = scmp.lt.s32.totalorder %s3795_s23, 2  ;;  %s199_s6 = sand.u32 1, %s3783_s20  }
   0xc   : > { %p3884_p7 = por %p54_p5, %p53_p4  ;;  %s3585_s7 = sshll.u32 %s3791_s22, 6 }
   0xd   : > { %s3890_s30 = scalar_select %p38_p6, %s3783_s20, %s40_s26  }
   0xe   : > { %s3584_s8 = sshll.u32 %s199_s6, 3  ;;  %s211_s11 = scalar_lea.hbm %s5978_s0, %s3585_s7 }
   0xf   : > { %s203_s12 = scalar_lea.vmem [#allocation3], %s3584_s8  ;;  %p3899_p9 = pnand %p3606_p8, %p3875_p3 }
  0x10   : > { %s212_s13 = sshll.u32 %s203_s12, 4  ;;  %p3586_p10 = scmp.ge.s32.totalorder %s3795_s23, 1  ;;  %s213_s13 = int_to_ptr.vmem [resolvable:$true] %s212_s13 }
  0x11   : > { %s200_s15 = scalar_lea.sflag [#allocation4], %s199_s6  ;;  %p3691_p11 = pneg %p3899_p9 }
  0x12   : > { %s3702_s16 = scalar_lea.vmem %s213_s13, 128  ;;  %s3797_s17 = smov [#allocation3]  }
  0x13   : > { %p3703_p12 = scmp.ne.s32.totalorder %s213_s13, %s3702_s16  ;;  %s3707_s18 = sshll.u32 %s3797_s17, 4  ;;  %s3708_s18 = int_to_ptr.vmem [resolvable:$false] %s3707_s18 }
  0x14   : > { %s3709_s26 = scalar_lea.vmem %s3708_s18, 256  ;;  %p3710_p1 = scmp.lt.s32.totalorder %s213_s13, %s3708_s18 }
  0x15   : > { %p3705_p13 = pnand %p3703_p12, %p3691_p11  ;;  %p3711_p2 = scmp.lt.s32.totalorder %s3709_s26, %s3702_s16 }
  0x17   : > { %p3706_p0 = pneg %p3705_p13  ;;  %p3712_p3 = por %p3711_p2, %p3710_p1 }
  0x19   : > { %p3713_p4 = pnand %p3712_p3, %p3706_p0 }
  0x1b   : > { %3716 = shalt.err (!%p3713_p4)
}
  0x1c   : > { %s3798_s27 = smov 128   ;;  %s3799_s28 = smov 64  }
  0x1d   : > { %s3800_s6 = smov 4   ;;  %p220_p5 = scmp.lt.s32.totalorder %s3795_s23, 3 }
  0x1e   : > { %3605 = dma.hbm_to_vmem [thread:$0]  (!%p3899_p9), %s211_s11, 128, %s213_s13, %s200_s15, %s3798_s27, %s3799_s28, %s3800_s6  }
  0x1f   : > { %p221_p6 = pnand %p3586_p10, %p220_p5 }
  0x21   : > { %224 = sbr.rel (%p221_p6) target bundleno = 1084 (0x43c), region = 40 }
  0x26   : > { %s226_s7 = sand.u32 1, %s3779_s19  }
  0x27   : > { %s3587_s8 = sshll.u32 %s226_s7, 3  ;;  %s227_s9 = scalar_lea.sflag [#allocation4], %s226_s7 }
  0x28   : > { %s3912_s10 = scalar_lea.vmem [#allocation3], %s3587_s8 }
  0x29   : > { %3766 = dma.done.wait (%p3884_p7), %s227_s9, 128  }
  0x2a   : > { %3768 = vsyncadd (%p3884_p7), %s227_s9, 4294967168  ;;  %p3588_p8 = scmp.ne.s32.totalorder %s3787_s21, 0 }
  0x2c   : > { %256 = sbr.rel (%p3588_p8) target bundleno = 66 (0x42), region = 48 }
  0x31   : > { %v3801_v0 = vmov 0.0  }
  0x32   : > { %257 = vst [vmem:[#allocation2] sm:$0x3] %v3801_v0  ;;  %258 = vst [vmem:[#allocation2 + $0x2] sm:$0x3] %v3801_v0 }
  0x33   : > { %259 = vst [vmem:[#allocation2 + $0x4] sm:$0x3] %v3801_v0  ;;  %260 = vst [vmem:[#allocation2 + $0x6] sm:$0x3] %v3801_v0 }
  0x34   : > { %261 = vst [vmem:[#allocation2 + $0x8] sm:$0x3] %v3801_v0  ;;  %262 = vst [vmem:[#allocation2 + $0xa] sm:$0x3] %v3801_v0 }
  0x35   : > { %263 = vst [vmem:[#allocation2 + $0xc] sm:$0x3] %v3801_v0  ;;  %264 = vst [vmem:[#allocation2 + $0xe] sm:$0x3] %v3801_v0 }
  0x36   : > { %265 = vst [vmem:[#allocation2 + $0x10] sm:$0x3] %v3801_v0  ;;  %266 = vst [vmem:[#allocation2 + $0x12] sm:$0x3] %v3801_v0 }
  0x37   : > { %267 = vst [vmem:[#allocation2 + $0x14] sm:$0x3] %v3801_v0  ;;  %268 = vst [vmem:[#allocation2 + $0x16] sm:$0x3] %v3801_v0 }
  0x38   : > { %269 = vst [vmem:[#allocation2 + $0x18] sm:$0x3] %v3801_v0  ;;  %270 = vst [vmem:[#allocation2 + $0x1a] sm:$0x3] %v3801_v0 }
  0x39   : > { %271 = vst [vmem:[#allocation2 + $0x1c] sm:$0x3] %v3801_v0  ;;  %272 = vst [vmem:[#allocation2 + $0x1e] sm:$0x3] %v3801_v0 }
  0x3a   : > { %273 = vst [vmem:[#allocation2 + $0x20] sm:$0x3] %v3801_v0  ;;  %274 = vst [vmem:[#allocation2 + $0x22] sm:$0x3] %v3801_v0 }
  0x3b   : > { %275 = vst [vmem:[#allocation2 + $0x24] sm:$0x3] %v3801_v0  ;;  %276 = vst [vmem:[#allocation2 + $0x26] sm:$0x3] %v3801_v0 }
  0x3c   : > { %277 = vst [vmem:[#allocation2 + $0x28] sm:$0x3] %v3801_v0  ;;  %278 = vst [vmem:[#allocation2 + $0x2a] sm:$0x3] %v3801_v0 }
  0x3d   : > { %279 = vst [vmem:[#allocation2 + $0x2c] sm:$0x3] %v3801_v0  ;;  %280 = vst [vmem:[#allocation2 + $0x2e] sm:$0x3] %v3801_v0 }
  0x3e   : > { %281 = vst [vmem:[#allocation2 + $0x30] sm:$0x3] %v3801_v0  ;;  %282 = vst [vmem:[#allocation2 + $0x32] sm:$0x3] %v3801_v0 }
  0x3f   : > { %283 = vst [vmem:[#allocation2 + $0x34] sm:$0x3] %v3801_v0  ;;  %284 = vst [vmem:[#allocation2 + $0x36] sm:$0x3] %v3801_v0 }
  0x40   : > { %285 = vst [vmem:[#allocation2 + $0x38] sm:$0x3] %v3801_v0  ;;  %286 = vst [vmem:[#allocation2 + $0x3a] sm:$0x3] %v3801_v0 }
  0x41   : > { %287 = vst [vmem:[#allocation2 + $0x3c] sm:$0x3] %v3801_v0  ;;  %288 = vst [vmem:[#allocation2 + $0x3e] sm:$0x3] %v3801_v0 }
  0x42 PF: > { %v289_v1 = vld [vmem:[%s5979_s1] sm:$0xff]  ;;  %v5984_v2 = vlaneseq  ;;  %v3802_v3 = vmov 1   ;;  %v3803_v4 = vmov 1966171168   ;;  %v5985_v6 = vmov 0   ;;  %v290_v10 = vld [vmem:[%s5979_s1 + $0x8] sm:$0xff] }
  0x43   : > { %3669 = vset.pattern.permute.xlu0 %v3802_v3  ;;  %v305_v5 = vunpack.c.l.s4 %v3803_v4  ;;  %3668 = vset.pattern.permute.xlu1 %v5985_v6  ;;  %v303_v9 = vcombine.high %v289_v1, %v289_v1  ;;  %v352_v30 = vcombine.high %v290_v10, %v290_v10  ;;  %v291_v36 = vld [vmem:[%s5979_s1 + $0x10] sm:$0xff]  ;;  %v292_v50 = vld [vmem:[%s5979_s1 + $0x18] sm:$0xff]  ;;  %vm2844_vm0 = vcmask 1041409   ;;  %p3589_p7 = scmp.ne.s32.totalorder %s3787_s21, 1 }
  0x44   : > { %v3925_v7 = vshrl.u32 %v5984_v2, 7  ;;  %v401_v43 = vcombine.high %v291_v36, %v291_v36  ;;  %v450_v57 = vcombine.high %v292_v50, %v292_v50 }
  0x45   : > { %v306_v8 = vunpack.c.0.s8 %v305_v5 }
  0x46   : > { %6067 = vst [vmem:[#allocation9_spill] sm:$0xff] %v3925_v7  ;;  %v3935_v13 = vsub.s32 0, %v3925_v7 }
  0x47   : > { %v3931_v11 = vsub.s32 %v306_v8, %v3925_v7 }
  0x48   : > { %6068 = vst [vmem:[#allocation10_spill] sm:$0xff] %v3935_v13 }
  0x49   : > { %v310_v12 = vrot.slane %v289_v1, %v3931_v11  ;;  %v3938_v14 = vrot.slane %v303_v9, %v3931_v11  ;;  %v3941_v15 = vrot.slane %v290_v10, %v3931_v11  ;;  %v3979_v33 = vrot.slane %v352_v30, %v3931_v11 }
  0x4a   : > { %v3995_v39 = vrot.slane %v291_v36, %v3931_v11  ;;  %v4011_v46 = vrot.slane %v401_v43, %v3931_v11  ;;  %v4030_v53 = vrot.slane %v292_v50, %v3931_v11  ;;  %v4046_v60 = vrot.slane %v450_v57, %v3931_v11 }
  0x4b   : > { %v326_v16 = vrot.slane %v310_v12, %v3931_v11  ;;  %v319_v17 = vcombine.high %v3938_v14, %v3938_v14  ;;  %v318_v18 = vcombine.high %v310_v12, %v310_v12  ;;  %v367_v19 = vcombine.high %v3941_v15, %v3941_v15 }
  0x4c   : > { %v368_v35 = vcombine.high %v3979_v33, %v3979_v33  ;;  %v416_v42 = vcombine.high %v3995_v39, %v3995_v39  ;;  %v417_v49 = vcombine.high %v4011_v46, %v4011_v46  ;;  %v465_v56 = vcombine.high %v4030_v53, %v4030_v53 }
  0x4d   : > { %v3949_v20 = vrot.slane %v326_v16, %v3935_v13  ;;  %v348_v21 = vcombine.high %v326_v16, %v326_v16  ;;  %v347_v22 = vrot.slane %v319_v17, %v3931_v11  ;;  %v3953_v23 = vrot.slane %v318_v18, %v3931_v11 }
  0x4e   : > { %v389_v27 = vrot.slane %v367_v19, %v3931_v11  ;;  %v396_v38 = vrot.slane %v368_v35, %v3931_v11  ;;  %v438_v45 = vrot.slane %v416_v42, %v3931_v11  ;;  %v445_v52 = vrot.slane %v417_v49, %v3931_v11 }
  0x4f   : > { %756 = vperm.xlu0 %3669, %v3949_v20   ;;  %v3957_v24 = vrot.slane %v348_v21, %v3935_v13  ;;  %v3960_v25 = vrot.slane %v347_v22, %v3935_v13  ;;  %v350_v26 = vcombine.high %v3953_v23, %v3953_v23  ;;  %v351_v29 = vcombine.high %v347_v22, %v347_v22 }
  0x50   : > { %v3972_v31 = vrot.slane %v389_v27, %v3935_v13  ;;  %v399_v34 = vcombine.high %v389_v27, %v389_v27  ;;  %v4000_v40 = vrot.slane %v396_v38, %v3935_v13  ;;  %v400_v41 = vcombine.high %v396_v38, %v396_v38 }
  0x51   : > { %636 = vperm.xlu1 %3668, %v3957_v24   ;;  %v3968_v28 = vrot.slane %v350_v26, %v3935_v13  ;;  %v3976_v32 = vrot.slane %v351_v29, %v3935_v13  ;;  %v4016_v47 = vrot.slane %v438_v45, %v3935_v13  ;;  %v448_v48 = vcombine.high %v438_v45, %v438_v45 }
  0x52   : > { %v3991_v37 = vrot.slane %v399_v34, %v3935_v13  ;;  %v4007_v44 = vrot.slane %v400_v41, %v3935_v13  ;;  %v4035_v54 = vrot.slane %v445_v52, %v3935_v13  ;;  %v449_v55 = vcombine.high %v445_v52, %v445_v52 }
  0x53   : > { %776 = vperm.xlu0 %3669, %v3960_v25   ;;  %v4026_v51 = vrot.slane %v448_v48, %v3935_v13  ;;  %v487_v59 = vrot.slane %v465_v56, %v3931_v11  ;;  %v466_v63 = vcombine.high %v4046_v60, %v4046_v60  ;;  %v4075_v9 = vrot.slane %v3953_v23, %v3935_v13 }
  0x54   : > { %v4042_v58 = vrot.slane %v449_v55, %v3935_v13  ;;  %v333_v10 = vrot.slane %v3938_v14, %v3931_v11  ;;  %v3805_v12 = vmov 2   ;;  %v375_v14 = vrot.slane %v3941_v15, %v3931_v11 }
  0x55   : > { %648 = vperm.xlu1 %3668, %v3960_v25   ;;  %v4051_v61 = vrot.slane %v487_v59, %v3935_v13  ;;  %v497_v62 = vcombine.high %v487_v59, %v487_v59  ;;  %v494_v1 = vrot.slane %v466_v63, %v3931_v11  ;;  %v382_v22 = vrot.slane %v3979_v33, %v3931_v11 }
  0x56   : > { %v4083_v16 = vrot.slane %v333_v10, %v3935_v13  ;;  %v349_v17 = vcombine.high %v333_v10, %v333_v10  ;;  %v4096_v19 = vrot.slane %v375_v14, %v3935_v13  ;;  %v397_v21 = vcombine.high %v375_v14, %v375_v14 }
  0x57   : > { %768 = vperm.xlu0 %3669, %v3968_v28   ;;  %v4058_v0 = vrot.slane %v497_v62, %v3935_v13  ;;  %v4064_v4 = vrot.slane %v494_v1, %v3935_v13  ;;  %v498_v5 = vcombine.high %v494_v1, %v494_v1  ;;  %v4108_v15 = vrot.slane %v382_v22, %v3935_v13 }
  0x58   : > { %v4089_v18 = vrot.slane %v349_v17, %v3935_v13  ;;  %v398_v23 = vcombine.high %v382_v22, %v382_v22  ;;  %v424_v27 = vrot.slane %v3995_v39, %v3931_v11  ;;  %v431_v34 = vrot.slane %v4011_v46, %v3931_v11 }
  0x59   : > { %664 = vperm.xlu1 %3668, %v3972_v31   ;;  %v4069_v8 = vrot.slane %v498_v5, %v3935_v13  ;;  %v473_v39 = vrot.slane %v4030_v53, %v3931_v11  ;;  %v480_v45 = vrot.slane %v4046_v60, %v3931_v11  ;;  %v3806_v53 = vmov 3  }
  0x5a   : > { %v4113_v26 = vrot.slane %v398_v23, %v3935_v13  ;;  %v4120_v29 = vrot.slane %v424_v27, %v3935_v13  ;;  %v446_v30 = vcombine.high %v424_v27, %v424_v27  ;;  %v4132_v35 = vrot.slane %v431_v34, %v3935_v13 }
  0x5b   : > { %784 = vperm.xlu0 %3669, %v3976_v32   ;;  %v447_v36 = vcombine.high %v431_v34, %v431_v34  ;;  %v4144_v41 = vrot.slane %v473_v39, %v3935_v13  ;;  %v495_v42 = vcombine.high %v473_v39, %v473_v39  ;;  %v4156_v46 = vrot.slane %v480_v45, %v3935_v13 }
  0x5c   : > { %v4125_v33 = vrot.slane %v446_v30, %v3935_v13  ;;  %v496_v48 = vcombine.high %v480_v45, %v480_v45 }
  0x5d   : > { %640 = vperm.xlu1 %3668, %v3968_v28   ;;  %v4137_v38 = vrot.slane %v447_v36, %v3935_v13  ;;  %v4149_v43 = vrot.slane %v495_v42, %v3935_v13 }
  0x5e   : > { %v4161_v49 = vrot.slane %v496_v48, %v3935_v13 }
  0x5f   : > { %792 = vperm.xlu0 %3669, %v3972_v31  }
  0x61   : > { %656 = vperm.xlu1 %3668, %v3976_v32  }
  0x63   : > { %800 = vperm.xlu0 %3669, %v3991_v37  }
  0x65   : > { %672 = vperm.xlu1 %3668, %v3991_v37  }
  0x67   : > { %808 = vperm.xlu0 %3669, %v4000_v40  }
  0x69   : > { %680 = vperm.xlu1 %3668, %v4000_v40  }
  0x6b   : > { %816 = vperm.xlu0 %3669, %v4007_v44  }
  0x6d   : > { %688 = vperm.xlu1 %3668, %v4007_v44  }
  0x6f   : > { %824 = vperm.xlu0 %3669, %v4016_v47  }
  0x71   : > { %696 = vperm.xlu1 %3668, %v4016_v47  }
  0x73   : > { %832 = vperm.xlu0 %3669, %v4026_v51  }
  0x75   : > { %704 = vperm.xlu1 %3668, %v4026_v51  }
  0x77   : > { %840 = vperm.xlu0 %3669, %v4035_v54  }
  0x79   : > { %712 = vperm.xlu1 %3668, %v4035_v54  }
  0x7b   : > { %848 = vperm.xlu0 %3669, %v4042_v58  }
  0x7d   : > { %720 = vperm.xlu1 %3668, %v4042_v58  }
  0x7f   : > { %856 = vperm.xlu0 %3669, %v4051_v61  }
  0x81   : > { %728 = vperm.xlu1 %3668, %v4051_v61  }
  0x83   : > { %864 = vperm.xlu0 %3669, %v4058_v0  }
  0x85   : > { %736 = vperm.xlu1 %3668, %v4058_v0  }
  0x87   : > { %872 = vperm.xlu0 %3669, %v4064_v4  }
  0x89   : > { %744 = vperm.xlu1 %3668, %v4064_v4  }
  0x8b   : > { %880 = vperm.xlu0 %3669, %v4069_v8  }
  0x8d   : > { %752 = vperm.xlu1 %3668, %v4069_v8  }
  0x8f   : > { %3672 = vset.pattern.permute.xlu0 %v3805_v12 }
  0x90   : > { %888 = vperm.xlu0 %3672, %v4075_v9  }
  0x91   : > { %3670 = vset.pattern.permute.xlu1 %v3802_v3  ;;  %v4101_v3 = vrot.slane %v397_v21, %v3935_v13 }
  0x92   : > { %760 = vperm.xlu1 %3670, %v4075_v9  }
  0x94   : > { %900 = vperm.xlu0 %3672, %v4083_v16  }
  0x96   : > { %764 = vperm.xlu1 %3670, %v3957_v24  }
  0x98   : > { %908 = vperm.xlu0 %3672, %v4089_v18  }
  0x9a   : > { %772 = vperm.xlu1 %3670, %v4083_v16  }
  0x9c   : > { %916 = vperm.xlu0 %3672, %v4096_v19  }
  0x9e   : > { %780 = vperm.xlu1 %3670, %v4089_v18  }
  0xa0   : > { %924 = vperm.xlu0 %3672, %v4101_v3  }
  0xa2   : > { %788 = vperm.xlu1 %3670, %v4096_v19  }
  0xa4   : > { %932 = vperm.xlu0 %3672, %v4108_v15  }
  0xa6   : > { %796 = vperm.xlu1 %3670, %v4101_v3  }
  0xa8   : > { %940 = vperm.xlu0 %3672, %v4113_v26  }
  0xaa   : > { %804 = vperm.xlu1 %3670, %v4108_v15  }
  0xac   : > { %948 = vperm.xlu0 %3672, %v4120_v29  }
  0xae   : > { %812 = vperm.xlu1 %3670, %v4113_v26  }
  0xb0   : > { %956 = vperm.xlu0 %3672, %v4125_v33  }
  0xb2   : > { %820 = vperm.xlu1 %3670, %v4120_v29  }
  0xb4   : > { %964 = vperm.xlu0 %3672, %v4132_v35  }
  0xb6   : > { %828 = vperm.xlu1 %3670, %v4125_v33  }
  0xb8   : > { %972 = vperm.xlu0 %3672, %v4137_v38  }
  0xba   : > { %836 = vperm.xlu1 %3670, %v4132_v35  }
  0xbc   : > { %980 = vperm.xlu0 %3672, %v4144_v41  }
  0xbe   : > { %844 = vperm.xlu1 %3670, %v4137_v38  }
  0xc0   : > { %988 = vperm.xlu0 %3672, %v4149_v43  }
  0xc2   : > { %852 = vperm.xlu1 %3670, %v4144_v41  }
  0xc4   : > { %996 = vperm.xlu0 %3672, %v4156_v46  }
  0xc6   : > { %860 = vperm.xlu1 %3670, %v4149_v43  }
  0xc8   : > { %1004 = vperm.xlu0 %3672, %v4161_v49  }
  0xca   : > { %v4165_v50 = vpop.permute.xlu0 %756  ;;  %868 = vperm.xlu1 %3670, %v4156_v46  }
  0xcc   : > { %v4168_v52 = vpop.permute.xlu1 %636  ;;  %3673 = vset.pattern.permute.xlu0 %v3806_v53 }
  0xcd   : > { %1012 = vperm.xlu0 %3673, %v3949_v20  }
  0xce   : > { %v4172_v55 = vpop.permute.xlu0 %776  ;;  %876 = vperm.xlu1 %3670, %v4161_v49  }
  0xd0   : > { %v4175_v56 = vpop.permute.xlu1 %648 }
  0xd1   : > { %1024 = vperm.xlu0 %3673, %v3968_v28  }
  0xd2   : > { %v4178_v57 = vpop.permute.xlu0 %768  ;;  %3671 = vset.pattern.permute.xlu1 %v3805_v12 }
  0xd3   : > { %884 = vperm.xlu1 %3671, %v3949_v20  }
  0xd4   : > { %v4182_v59 = vpop.permute.xlu1 %664 }
  0xd5   : > { %1032 = vperm.xlu0 %3673, %v3960_v25  }
  0xd6   : > { %v4185_v60 = vpop.permute.xlu0 %784 }
  0xd7   : > { %892 = vperm.xlu1 %3671, %v3957_v24  }
  0xd8   : > { %v4188_v62 = vpop.permute.xlu1 %640 }
  0xd9   : > { %1040 = vperm.xlu0 %3673, %v3976_v32  }
  0xda   : > { %v4191_v63 = vpop.permute.xlu0 %792 }
  0xdb   : > { %896 = vperm.xlu1 %3671, %v3968_v28  }
  0xdc   : > { %v4194_v1 = vpop.permute.xlu1 %656 }
  0xdd   : > { %1048 = vperm.xlu0 %3673, %v3972_v31  }
  0xde   : > { %v4197_v5 = vpop.permute.xlu0 %800 }
  0xdf   : > { %904 = vperm.xlu1 %3671, %v3960_v25  }
  0xe0   : > { %v4200_v10 = vpop.permute.xlu1 %672 }
  0xe1   : > { %1056 = vperm.xlu0 %3673, %v3991_v37  }
  0xe2   : > { %v4203_v12 = vpop.permute.xlu0 %808 }
  0xe3   : > { %912 = vperm.xlu1 %3671, %v3976_v32  }
  0xe4   : > { %v4206_v17 = vpop.permute.xlu1 %680 }
  0xe5   : > { %1064 = vperm.xlu0 %3673, %v4000_v40  }
  0xe6   : > { %v4209_v28 = vpop.permute.xlu0 %816 }
  0xe7   : > { %920 = vperm.xlu1 %3671, %v3972_v31  }
  0xe8   : > { %v4212_v14 = vpop.permute.xlu1 %688 }
  0xe9   : > { %1072 = vperm.xlu0 %3673, %v4007_v44  }
  0xea   : > { %v4215_v25 = vpop.permute.xlu0 %824 }
  0xeb   : > { %928 = vperm.xlu1 %3671, %v3991_v37  }
  0xec   : > { %v4218_v21 = vpop.permute.xlu1 %696 }
  0xed   : > { %1080 = vperm.xlu0 %3673, %v4016_v47  }
  0xee   : > { %v4221_v32 = vpop.permute.xlu0 %832 }
  0xef   : > { %936 = vperm.xlu1 %3671, %v4000_v40  }
  0xf0   : > { %v4224_v22 = vpop.permute.xlu1 %704 }
  0xf1   : > { %1088 = vperm.xlu0 %3673, %v4026_v51  }
  0xf2   : > { %v4227_v31 = vpop.permute.xlu0 %840 }
  0xf3   : > { %944 = vperm.xlu1 %3671, %v4007_v44  }
  0xf4   : > { %v4230_v23 = vpop.permute.xlu1 %712 }
  0xf5   : > { %1096 = vperm.xlu0 %3673, %v4035_v54  }
  0xf6   : > { %v4233_v37 = vpop.permute.xlu0 %848 }
  0xf7   : > { %952 = vperm.xlu1 %3671, %v4016_v47  }
  0xf8   : > { %v4236_v27 = vpop.permute.xlu1 %720 }
  0xf9   : > { %1104 = vperm.xlu0 %3673, %v4042_v58  }
  0xfa   : > { %v4239_v40 = vpop.permute.xlu0 %856 }
  0xfb   : > { %960 = vperm.xlu1 %3671, %v4026_v51  }
  0xfc   : > { %v4242_v30 = vpop.permute.xlu1 %728 }
  0xfd   : > { %1112 = vperm.xlu0 %3673, %v4051_v61  }
  0xfe   : > { %v4245_v44 = vpop.permute.xlu0 %864 }
  0xff   : > { %968 = vperm.xlu1 %3671, %v4035_v54  }
 0x100   : > { %v4248_v34 = vpop.permute.xlu1 %736 }
 0x101   : > { %1120 = vperm.xlu0 %3673, %v4058_v0  }
 0x102   : > { %v4251_v47 = vpop.permute.xlu0 %872 }
 0x103   : > { %976 = vperm.xlu1 %3671, %v4042_v58  }
 0x104   : > { %v4254_v36 = vpop.permute.xlu1 %744 }
 0x105   : > { %1128 = vperm.xlu0 %3673, %v4064_v4  }
 0x106   : > { %v4257_v51 = vpop.permute.xlu0 %880 }
 0x107   : > { %984 = vperm.xlu1 %3671, %v4051_v61  }
 0x108   : > { %v4260_v39 = vpop.permute.xlu1 %752 }
 0x109   : > { %1136 = vperm.xlu0 %3673, %v4069_v8  }
 0x10b   : > { %v4263_v54 = vpop.permute.xlu0 %888  ;;  %992 = vperm.xlu1 %3671, %v4058_v0  }
 0x10c   : > { %6069 = vst [vmem:[#allocation11_spill] sm:$0xff] %v4263_v54 }
 0x10d   : > { %3675 = vset.pattern.permute.xlu0 %v5985_v6  ;;  %v4267_v42 = vpop.permute.xlu1 %760 }
 0x10e   : > { %6070 = vst [vmem:[#allocation12_spill] sm:$0xff] %v4267_v42  ;;  %628 = vperm.xlu0 %3675, %v3949_v20   ;;  %v293_v20 = vld [vmem:[%s5980_s2] sm:$0xff] }
 0x10f   : > { %v4270_v58 = vpop.permute.xlu0 %900  ;;  %1000 = vperm.xlu1 %3671, %v4064_v4   ;;  %v1150_v2 = vrot.slane %v293_v20, %v3931_v11  ;;  %v1143_v6 = vcombine.high %v293_v20, %v293_v20 }
 0x110   : > { %6071 = vst [vmem:[#allocation13_spill] sm:$0xff] %v4270_v58 }
 0x111   : > { %v4273_v45 = vpop.permute.xlu1 %764 }
 0x112   : > { %6072 = vst [vmem:[#allocation14_spill] sm:$0xff] %v4273_v45  ;;  %632 = vperm.xlu0 %3675, %v4075_v9  }
 0x113   : > { %v4276_v61 = vpop.permute.xlu0 %908  ;;  %1008 = vperm.xlu1 %3671, %v4069_v8  }
 0x114   : > { %6073 = vst [vmem:[#allocation15_spill] sm:$0xff] %v4276_v61 }
 0x115   : > { %v4279_v0 = vpop.permute.xlu1 %772 }
 0x116   : > { %6074 = vst [vmem:[#allocation16_spill] sm:$0xff] %v4279_v0  ;;  %644 = vperm.xlu0 %3675, %v4083_v16   ;;  %v4305_v0 = vld [vmem:[%s3912_s10 + $0x4] sm:$0xf] }
 0x117   : > { %v4282_v48 = vpop.permute.xlu0 %916  ;;  %3674 = vset.pattern.permute.xlu1 %v3806_v53  ;;  %v1670_v20 = vmul.f32 %v4172_v55, %v4305_v0 }
 0x118   : > { %6075 = vst [vmem:[#allocation17_spill] sm:$0xff] %v4282_v48  ;;  %1016 = vperm.xlu1 %3674, %v4075_v9   ;;  %v4300_v9 = vld [vmem:[%s3912_s10] sm:$0xf]  ;;  %v1158_v48 = vcombine.high %v1150_v2, %v1150_v2 }
 0x119   : > { %v4289_v4 = vpop.permute.xlu1 %780 }
 0x11a   : > { %6076 = vst [vmem:[#allocation18_spill] sm:$0xff] %v4289_v4  ;;  %652 = vperm.xlu0 %3675, %v4089_v18   ;;  %v1669_v4 = vmul.f32 %v4172_v55, %v4300_v9  ;;  %v1605_v55 = vmul.f32 %v4175_v56, %v4300_v9 }
 0x11b   : > { %v4292_v8 = vpop.permute.xlu0 %924 }
 0x11c   : > { %6077 = vst [vmem:[#allocation19_spill] sm:$0xff] %v4292_v8  ;;  %1020 = vperm.xlu1 %3674, %v3957_v24   ;;  %v4311_v8 = vrot.slane %v1143_v6, %v3931_v11  ;;  %v4315_v24 = vmul.f32 %v4165_v50, %v4300_v9  ;;  %v4329_v6 = vrot.slane %v1158_v48, %v3931_v11  ;;  %v1797_v45 = vrot.slane %v1669_v4, 1 }
 0x11d   : > { %v4296_v7 = vpop.permute.xlu1 %788  ;;  %v1606_v48 = vmul.f32 %v4175_v56, %v4305_v0  ;;  %v1665_v4 = vmul.f32 %v4178_v57, %v4300_v9  ;;  %v4361_v56 = vmul.f32 %v4168_v52, %v4305_v0 }
 0x11e   : > { %6078 = vst [vmem:[#allocation20_spill] sm:$0xff] %v4296_v7  ;;  %660 = vperm.xlu0 %3675, %v4096_v19   ;;  %6080 = vst [vmem:[#allocation22_spill] sm:$0xff] %v4315_v24  ;;  %v1609_v24 = vmul.f32 %v4194_v1, %v4300_v9 }
 0x11f   : > { %v4302_v53 = vpop.permute.xlu0 %932  ;;  %6087 = vst [vmem:[#allocation29_spill] sm:$0xff] %v4361_v56 }
 0x120   : > { %6079 = vst [vmem:[#allocation21_spill] sm:$0xff] %v4302_v53  ;;  %1028 = vperm.xlu1 %3674, %v4083_v16   ;;  %v4323_v53 = vmul.f32 %v4165_v50, %v4305_v0  ;;  %v294_v16 = vld [vmem:[%s5980_s2 + $0x8] sm:$0xff]  ;;  %v4339_v50 = vrot.slane %v4311_v8, %v3931_v11 }
 0x121   : > { %v4319_v7 = vpop.permute.xlu1 %796  ;;  %v4353_v54 = vrot.slane %v294_v16, %v3931_v11  ;;  %v1192_v56 = vcombine.high %v294_v16, %v294_v16  ;;  %v1601_v16 = vmul.f32 %v4188_v62, %v4300_v9 }
 0x122   : > { %6081 = vst [vmem:[#allocation23_spill] sm:$0xff] %v4319_v7  ;;  %6082 = vst [vmem:[#allocation24_spill] sm:$0xff] %v4323_v53  ;;  %668 = vperm.xlu0 %3675, %v4101_v3   ;;  %v1673_v53 = vmul.f32 %v4185_v60, %v4300_v9  ;;  %v1677_v7 = vmul.f32 %v4191_v63, %v4300_v9 }
 0x123   : > { %v4326_v61 = vpop.permute.xlu0 %940  ;;  %6084 = vst [vmem:[#allocation26_spill] sm:$0xff] %v4339_v50 }
 0x124   : > { %6083 = vst [vmem:[#allocation25_spill] sm:$0xff] %v4326_v61  ;;  %1036 = vperm.xlu1 %3674, %v4089_v18   ;;  %v1798_v61 = vrot.slane %v1670_v20, 1  ;;  %v1666_v18 = vmul.f32 %v4178_v57, %v4305_v0  ;;  %v4357_v20 = vmul.f32 %v4168_v52, %v4300_v9  ;;  %v1189_v57 = vcombine.high %v4339_v50, %v4339_v50 }
 0x125   : > { %v4344_v58 = vpop.permute.xlu1 %804  ;;  %v4377_v52 = vrot.slane %v1150_v2, %v3931_v11  ;;  %v4392_v2 = vrot.slane %v4353_v54, %v3931_v11 }
 0x126   : > { %6085 = vst [vmem:[#allocation27_spill] sm:$0xff] %v4344_v58  ;;  %676 = vperm.xlu0 %3675, %v4108_v15   ;;  %6086 = vst [vmem:[#allocation28_spill] sm:$0xff] %v4357_v20  ;;  %v4369_v58 = vadd.f32 %v1797_v45, %v1605_v55  ;;  %v1678_v45 = vmul.f32 %v4191_v63, %v4305_v0  ;;  %v1793_v20 = vrot.slane %v1665_v4, 1 }
 0x127   : > { %v4363_v42 = vpop.permute.xlu0 %948  ;;  %6090 = vst [vmem:[#allocation32_spill] sm:$0xff] %v4377_v52  ;;  %v1614_v63 = vmul.f32 %v4182_v59, %v4305_v0  ;;  %v4403_v4 = vrot.slane %v1189_v57, %v3935_v13  ;;  %v1237_v57 = vcombine.high %v4392_v2, %v4392_v2 }
 0x128   : > { %6088 = vst [vmem:[#allocation30_spill] sm:$0xff] %v4363_v42  ;;  %6089 = vst [vmem:[#allocation31_spill] sm:$0xff] %v4369_v58  ;;  %1044 = vperm.xlu1 %3674, %v4096_v19   ;;  %v4379_v42 = vadd.f32 %v1798_v61, %v1606_v48  ;;  %v1794_v58 = vrot.slane %v1666_v18, 1  ;;  %v1674_v19 = vmul.f32 %v4185_v60, %v4305_v0  ;;  %v1801_v60 = vrot.slane %v1673_v53, 1 }
 0x129   : > { %v4385_v55 = vpop.permute.xlu1 %812  ;;  %v1613_v61 = vmul.f32 %v4182_v59, %v4300_v9  ;;  %v1602_v18 = vmul.f32 %v4188_v62, %v4305_v0  ;;  %v1188_v59 = vcombine.high %v4377_v52, %v4377_v52  ;;  %v4417_v53 = vrot.slane %v1192_v56, %v3931_v11 }
 0x12a   : > { %6091 = vst [vmem:[#allocation33_spill] sm:$0xff] %v4379_v42  ;;  %6092 = vst [vmem:[#allocation34_spill] sm:$0xff] %v4385_v55  ;;  %684 = vperm.xlu0 %3675, %v4113_v26   ;;  %v1805_v55 = vrot.slane %v1677_v7, 1  ;;  %v1806_v42 = vrot.slane %v1678_v45, 1  ;;  %v1682_v62 = vmul.f32 %v4197_v5, %v4305_v0  ;;  %v4426_v45 = vadd.f32 %v1793_v20, %v1601_v16 }
 0x12b   : > { %v4400_v48 = vpop.permute.xlu0 %956  ;;  %v1610_v56 = vmul.f32 %v4194_v1, %v4305_v0  ;;  %v4436_v52 = vadd.f32 %v1794_v58, %v1602_v18  ;;  %v4442_v20 = vrot.slane %v1188_v59, %v3935_v13  ;;  %v1159_v16 = vcombine.high %v4311_v8, %v4311_v8 }
 0x12c   : > { %6093 = vst [vmem:[#allocation35_spill] sm:$0xff] %v4400_v48  ;;  %1052 = vperm.xlu1 %3674, %v4101_v3   ;;  %v1802_v48 = vrot.slane %v1674_v19, 1  ;;  %v1681_v3 = vmul.f32 %v4197_v5, %v4300_v9  ;;  %v1685_v5 = vmul.f32 %v4203_v12, %v4300_v9  ;;  %v4446_v7 = vadd.f32 %v1805_v55, %v1613_v61 }
 0x12d   : > { %v4412_v50 = vpop.permute.xlu1 %820  ;;  %6096 = vst [vmem:[#allocation38_spill] sm:$0xff] %v4442_v20  ;;  %v4448_v1 = vadd.f32 %v1806_v42, %v1614_v63  ;;  %v4453_v58 = vrot.slane %v1237_v57, %v3935_v13  ;;  %v4457_v18 = vrot.slane %v4417_v53, %v3931_v11  ;;  %v1810_v20 = vrot.slane %v1682_v62, 1 }
 0x12e   : > { %6094 = vst [vmem:[#allocation36_spill] sm:$0xff] %v4412_v50  ;;  %692 = vperm.xlu0 %3675, %v4120_v29   ;;  %v1190_v50 = vcombine.high %v4329_v6, %v4329_v6  ;;  %6097 = vst [vmem:[#allocation39_spill] sm:$0xff] %v4446_v7  ;;  %v1809_v59 = vrot.slane %v1681_v3, 1  ;;  %v1617_v8 = vmul.f32 %v4200_v10, %v4300_v9  ;;  %v1813_v62 = vrot.slane %v1685_v5, 1 }
 0x12f   : > { %v4432_v19 = vpop.permute.xlu0 %964  ;;  %6098 = vst [vmem:[#allocation40_spill] sm:$0xff] %v4448_v1  ;;  %v1618_v42 = vmul.f32 %v4200_v10, %v4305_v0  ;;  %v4467_v55 = vadd.f32 %v1801_v60, %v1609_v24  ;;  %v4469_v61 = vadd.f32 %v1802_v48, %v1610_v56  ;;  %v1686_v63 = vmul.f32 %v4203_v12, %v4305_v0 }
 0x130   : > { %6095 = vst [vmem:[#allocation37_spill] sm:$0xff] %v4432_v19  ;;  %1060 = vperm.xlu1 %3674, %v4108_v15   ;;  %v295_v15 = vld [vmem:[%s5980_s2 + $0x10] sm:$0xff]  ;;  %v4476_v3 = vrot.slane %v1190_v50, %v3935_v13  ;;  %v1238_v10 = vcombine.high %v4457_v18, %v4457_v18  ;;  %v1621_v12 = vmul.f32 %v4206_v17, %v4300_v9 }
 0x131   : > { %v4450_v19 = vpop.permute.xlu1 %828  ;;  %v4485_v24 = vrot.slane %v295_v15, %v3931_v11  ;;  %v1689_v48 = vmul.f32 %v4209_v28, %v4300_v9  ;;  %v1690_v50 = vmul.f32 %v4209_v28, %v4305_v0  ;;  %v4495_v56 = vadd.f32 %v1809_v59, %v1617_v8 }
 0x132   : > { %6099 = vst [vmem:[#allocation41_spill] sm:$0xff] %v4450_v19  ;;  %700 = vperm.xlu0 %3675, %v4125_v33   ;;  %v4480_v19 = vrot.slane %v1159_v16, %v3931_v11  ;;  %v4497_v5 = vadd.f32 %v1810_v20, %v1618_v42  ;;  %v1814_v1 = vrot.slane %v1686_v63, 1  ;;  %v1622_v7 = vmul.f32 %v4206_v17, %v4305_v0 }
 0x133   : > { %v4473_v57 = vpop.permute.xlu0 %972  ;;  %v1693_v28 = vmul.f32 %v4215_v25, %v4300_v9  ;;  %v4516_v8 = vrot.slane %v1238_v10, %v3935_v13  ;;  %v4522_v17 = vrot.slane %v4485_v24, %v3931_v11  ;;  %v4524_v42 = vadd.f32 %v1813_v62, %v1621_v12 }
 0x134   : > { %6100 = vst [vmem:[#allocation42_spill] sm:$0xff] %v4473_v57  ;;  %1068 = vperm.xlu1 %3674, %v4113_v26   ;;  %v1241_v26 = vcombine.high %v295_v15, %v295_v15  ;;  %v1207_v57 = vcombine.high %v4353_v54, %v4353_v54  ;;  %v1694_v15 = vmul.f32 %v4215_v25, %v4305_v0  ;;  %v1817_v25 = vrot.slane %v1689_v48, 1 }
 0x135   : > { %v4493_v60 = vpop.permute.xlu1 %836  ;;  %v1191_v54 = vcombine.high %v4480_v19, %v4480_v19  ;;  %6103 = vst [vmem:[#allocation45_spill] sm:$0xff] %v4524_v42  ;;  %v1818_v63 = vrot.slane %v1690_v50, 1  ;;  %v1625_v10 = vmul.f32 %v4212_v14, %v4300_v9  ;;  %v1626_v59 = vmul.f32 %v4212_v14, %v4305_v0 }
 0x136   : > { %6101 = vst [vmem:[#allocation43_spill] sm:$0xff] %v4493_v60  ;;  %708 = vperm.xlu0 %3675, %v4132_v35   ;;  %v1286_v62 = vcombine.high %v4522_v17, %v4522_v17  ;;  %v1821_v12 = vrot.slane %v1693_v28, 1  ;;  %v1822_v48 = vrot.slane %v1694_v15, 1  ;;  %v1629_v50 = vmul.f32 %v4218_v21, %v4300_v9 }
 0x137   : > { %v4510_v20 = vpop.permute.xlu0 %980  ;;  %v4547_v60 = vadd.f32 %v1814_v1, %v1622_v7  ;;  %v1697_v14 = vmul.f32 %v4221_v32, %v4300_v9  ;;  %v4555_v28 = vrot.slane %v1191_v54, %v3935_v13  ;;  %v1701_v54 = vmul.f32 %v4227_v31, %v4300_v9 }
 0x138   : > { %6102 = vst [vmem:[#allocation44_spill] sm:$0xff] %v4510_v20  ;;  %1076 = vperm.xlu1 %3674, %v4120_v29   ;;  %v4529_v29 = vrot.slane %v1241_v26, %v3931_v11  ;;  %v4537_v20 = vrot.slane %v1207_v57, %v3931_v11  ;;  %v1630_v26 = vmul.f32 %v4218_v21, %v4305_v0 }
 0x139   : > { %v4526_v16 = vpop.permute.xlu1 %844  ;;  %6106 = vst [vmem:[#allocation48_spill] sm:$0xff] %v4547_v60  ;;  %v1698_v57 = vmul.f32 %v4221_v32, %v4305_v0  ;;  %v1208_v32 = vcombine.high %v4417_v53, %v4417_v53  ;;  %v4581_v60 = vadd.f32 %v1821_v12, %v1629_v50  ;;  %v1702_v53 = vmul.f32 %v4227_v31, %v4305_v0 }
 0x13a   : > { %6104 = vst [vmem:[#allocation46_spill] sm:$0xff] %v4526_v16  ;;  %716 = vperm.xlu0 %3675, %v4137_v38   ;;  %v1239_v7 = vcombine.high %v4537_v20, %v4537_v20  ;;  %v4565_v1 = vrot.slane %v4529_v29, %v3931_v11  ;;  %v4583_v42 = vadd.f32 %v1822_v48, %v1630_v26  ;;  %v1829_v26 = vrot.slane %v1701_v54, 1 }
 0x13b   : > { %v4545_v16 = vpop.permute.xlu0 %988  ;;  %v1633_v21 = vmul.f32 %v4224_v22, %v4300_v9  ;;  %v1256_v54 = vcombine.high %v4485_v24, %v4485_v24  ;;  %v1642_v24 = vmul.f32 %v4236_v27, %v4305_v0 }
 0x13c   : > { %6105 = vst [vmem:[#allocation47_spill] sm:$0xff] %v4545_v16  ;;  %1084 = vperm.xlu1 %3674, %v4125_v33   ;;  %v4569_v16 = vadd.f32 %v1817_v25, %v1625_v10  ;;  %v4571_v33 = vadd.f32 %v1818_v63, %v1626_v59  ;;  %6109 = vst [vmem:[#allocation51_spill] sm:$0xff] %v4583_v42  ;;  %v4590_v25 = vrot.slane %v1286_v62, %v3935_v13 }
 0x13d   : > { %v4557_v15 = vpop.permute.xlu1 %852  ;;  %v1825_v63 = vrot.slane %v1697_v14, 1  ;;  %v1826_v10 = vrot.slane %v1698_v57, 1  ;;  %v4600_v48 = vrot.slane %v1239_v7, %v3935_v13  ;;  %v4605_v62 = vrot.slane %v1208_v32, %v3931_v11 }
 0x13e   : > { %6107 = vst [vmem:[#allocation49_spill] sm:$0xff] %v4557_v15  ;;  %6108 = vst [vmem:[#allocation50_spill] sm:$0xff] %v4571_v33  ;;  %724 = vperm.xlu0 %3675, %v4144_v41   ;;  %v296_v15 = vld [vmem:[%s5980_s2 + $0x18] sm:$0xff]  ;;  %v1634_v33 = vmul.f32 %v4224_v22, %v4305_v0  ;;  %v1637_v22 = vmul.f32 %v4230_v23, %v4300_v9  ;;  %v1287_v14 = vcombine.high %v4565_v1, %v4565_v1 }
 0x13f   : > { %v4587_v59 = vpop.permute.xlu0 %996  ;;  %v4608_v50 = vrot.slane %v296_v15, %v3931_v11  ;;  %v1830_v57 = vrot.slane %v1702_v53, 1  ;;  %v1638_v7 = vmul.f32 %v4230_v23, %v4305_v0  ;;  %v1706_v32 = vmul.f32 %v4233_v37, %v4305_v0 }
 0x140   : > { %6110 = vst [vmem:[#allocation52_spill] sm:$0xff] %v4587_v59  ;;  %1092 = vperm.xlu1 %3674, %v4132_v35   ;;  %v1705_v35 = vmul.f32 %v4233_v37, %v4300_v9  ;;  %v4627_v59 = vadd.f32 %v1826_v10, %v1634_v33  ;;  %v1709_v42 = vmul.f32 %v4239_v40, %v4300_v9 }
 0x141   : > { %v4597_v12 = vpop.permute.xlu1 %860  ;;  %v1240_v23 = vcombine.high %v4605_v62, %v4605_v62  ;;  %v1710_v37 = vmul.f32 %v4239_v40, %v4305_v0  ;;  %v1290_v33 = vcombine.high %v296_v15, %v296_v15  ;;  %v4650_v40 = vrot.slane %v1287_v14, %v3935_v13 }
 0x142   : > { %6111 = vst [vmem:[#allocation53_spill] sm:$0xff] %v4597_v12  ;;  %732 = vperm.xlu0 %3675, %v4149_v43   ;;  %v4625_v12 = vadd.f32 %v1825_v63, %v1633_v21  ;;  %6113 = vst [vmem:[#allocation55_spill] sm:$0xff] %v4627_v59  ;;  %v4642_v21 = vrot.slane %v4608_v50, %v3931_v11  ;;  %v4644_v63 = vadd.f32 %v1829_v26, %v1637_v22 }
 0x143   : > { %v4621_v31 = vpop.permute.xlu0 %1004  ;;  %v1833_v10 = vrot.slane %v1705_v35, 1  ;;  %v4657_v59 = vrot.slane %v1256_v54, %v3931_v11  ;;  %v1837_v15 = vrot.slane %v1709_v42, 1  ;;  %v1645_v26 = vmul.f32 %v4242_v30, %v4300_v9 }
 0x144   : > { %6112 = vst [vmem:[#allocation54_spill] sm:$0xff] %v4621_v31  ;;  %1100 = vperm.xlu1 %3674, %v4137_v38   ;;  %6115 = vst [vmem:[#allocation57_spill] sm:$0xff] %v4644_v63  ;;  %v1641_v38 = vmul.f32 %v4236_v27, %v4300_v9  ;;  %v1834_v31 = vrot.slane %v1706_v32, 1  ;;  %v4665_v35 = vrot.slane %v1240_v23, %v3935_v13 }
 0x145   : > { %v4636_v53 = vpop.permute.xlu1 %868  ;;  %v1335_v14 = vcombine.high %v4642_v21, %v4642_v21  ;;  %v1646_v27 = vmul.f32 %v4242_v30, %v4305_v0  ;;  %v4676_v32 = vrot.slane %v1290_v33, %v3931_v11  ;;  %v1714_v23 = vmul.f32 %v4245_v44, %v4305_v0 }
 0x146   : > { %6114 = vst [vmem:[#allocation56_spill] sm:$0xff] %v4636_v53  ;;  %740 = vperm.xlu0 %3675, %v4156_v46   ;;  %v4652_v53 = vadd.f32 %v1830_v57, %v1638_v7  ;;  %v1838_v57 = vrot.slane %v1710_v37, 1  ;;  %v4678_v54 = vadd.f32 %v1833_v10, %v1641_v38  ;;  %v1257_v30 = vcombine.high %v4529_v29, %v4529_v29 }
 0x147   : > { %v4687_v37 = vadd.f32 %v1834_v31, %v1642_v24  ;;  %v1717_v42 = vmul.f32 %v4251_v47, %v4300_v9  ;;  %v1718_v33 = vmul.f32 %v4251_v47, %v4305_v0  ;;  %v4695_v38 = vadd.f32 %v1837_v15, %v1645_v26 }
 0x148   : > { %6116 = vst [vmem:[#allocation58_spill] sm:$0xff] %v4652_v53  ;;  %v4661_v22 = vpop.permute.xlu0 %1012  ;;  %1108 = vperm.xlu1 %3674, %v4144_v41   ;;  %6119 = vst [vmem:[#allocation61_spill] sm:$0xff] %v4678_v54  ;;  %v1713_v41 = vmul.f32 %v4245_v44, %v4300_v9  ;;  %v1721_v44 = vmul.f32 %v4257_v51, %v4300_v9  ;;  %v4701_v29 = vrot.slane %v1335_v14, %v3935_v13  ;;  %v6127_v54 = vld [vmem:[#allocation11_spill] sm:$0xff] }
 0x149   : > { %6117 = vst [vmem:[#allocation59_spill] sm:$0xff] %v4661_v22  ;;  %v4671_v7 = vpop.permute.xlu1 %876  ;;  %6120 = vst [vmem:[#allocation62_spill] sm:$0xff] %v4687_v37  ;;  %v1288_v31 = vcombine.high %v4657_v59, %v4657_v59  ;;  %v4705_v24 = vadd.f32 %v1838_v57, %v1646_v27  ;;  %v1722_v47 = vmul.f32 %v4257_v51, %v4305_v0  ;;  %v1846_v37 = vrot.slane %v1718_v33, 1 }
 0x14a   : > { %6118 = vst [vmem:[#allocation60_spill] sm:$0xff] %v4671_v7  ;;  %748 = vperm.xlu0 %3675, %v4161_v49   ;;  %6121 = vst [vmem:[#allocation63_spill] sm:$0xff] %v4695_v38  ;;  %v4711_v15 = vrot.slane %v4676_v32, %v3931_v11  ;;  %v1305_v26 = vcombine.high %v4608_v50, %v4608_v50  ;;  %v1841_v10 = vrot.slane %v1713_v41, 1 }
 0x14b   : > { %6122 = vst [vmem:[#allocation64_spill] sm:$0xff] %v4701_v29  ;;  %6123 = vst [vmem:[#allocation65_spill] sm:$0xff] %v4705_v24  ;;  %v1649_v14 = vmul.f32 %v4248_v34, %v4300_v9  ;;  %v6124_v38 = vrot.slane %v4329_v6, %v3935_v13  ;;  %v4723_v51 = vrot.slane %v1257_v30, %v3931_v11  ;;  %v1845_v24 = vrot.slane %v1717_v42, 1  ;;  %v6133_v29 = vld [vmem:[#allocation12_spill] sm:$0xff] }
 0x14c   : > { %v1025_v7 = vpop.permute.xlu0 %1024  ;;  %1116 = vperm.xlu1 %3674, %v4149_v43   ;;  %v1842_v43 = vrot.slane %v1714_v23, 1  ;;  %v1650_v27 = vmul.f32 %v4248_v34, %v4305_v0  ;;  %v1336_v50 = vcombine.high %v4711_v15, %v4711_v15  ;;  %v1653_v41 = vmul.f32 %v4254_v36, %v4300_v9 }
 0x14d   : > { %v1654_v6 = vmul.f32 %v4254_v36, %v4305_v0  ;;  %v1849_v23 = vrot.slane %v1721_v44, 1  ;;  %v1289_v30 = vcombine.high %v4723_v51, %v4723_v51  ;;  %v1657_v34 = vmul.f32 %v4260_v39, %v4300_v9  ;;  %v6130_v44 = vld [vmem:[#allocation26_spill] sm:$0xff] }
 0x14e   : > { %1472 = vperm.xlu0 %3675, %v6124_v38   ;;  %v4720_v57 = vpop.permute.xlu1 %884  ;;  %v1658_v42 = vmul.f32 %v4260_v39, %v4305_v0  ;;  %v4741_v33 = vrot.slane %v1305_v26, %v3931_v11  ;;  %v4745_v36 = vmul.f32 %v6127_v54, %v4300_v9  ;;  %v4757_v53 = vrot.slane %v1288_v31, %v3935_v13 }
 0x14f   : > { %6125 = vst [vmem:[#allocation66_spill] sm:$0xff] %v4720_v57  ;;  %v1850_v57 = vrot.slane %v1722_v47, 1  ;;  %v6131_v47 = vrot.slane %v6130_v44, %v3935_v13  ;;  %v4761_v26 = vadd.f32 %v1841_v10, %v1649_v14  ;;  %v4763_v63 = vadd.f32 %v1842_v43, %v1650_v27 }
 0x150   : > { %v1033_v38 = vpop.permute.xlu0 %1032  ;;  %1124 = vperm.xlu1 %3674, %v4156_v46   ;;  %6126 = vst [vmem:[#allocation67_spill] sm:$0xff] %v4741_v33  ;;  %6128 = vst [vmem:[#allocation11_spill] sm:$0xff] %v4745_v36  ;;  %v4749_v46 = vmul.f32 %v6127_v54, %v4305_v0  ;;  %v4767_v54 = vmul.f32 %v6133_v29, %v4300_v9  ;;  %v4771_v44 = vmul.f32 %v6133_v29, %v4305_v0  ;;  %v6143_v10 = vmov 0  }
 0x151   : > { %v4781_v43 = vrot.slane %v1336_v50, %v3935_v13  ;;  %v4783_v14 = vadd.f32 %v1849_v23, %v1657_v34  ;;  %v4785_v27 = vadd.f32 %v1850_v57, %v1658_v42  ;;  %v4788_v29 = vrot.slane %v1289_v30, %v3935_v13  ;;  %v6140_v30 = vld [vmem:[#allocation13_spill] sm:$0xff] }
 0x152   : > { %6129 = vst [vmem:[#allocation68_spill] sm:$0xff] %v4749_v46  ;;  %1484 = vperm.xlu0 %3675, %v6131_v47   ;;  %v4754_v22 = vpop.permute.xlu1 %892  ;;  %6134 = vst [vmem:[#allocation12_spill] sm:$0xff] %v4767_v54  ;;  %v4773_v47 = vadd.f32 %v1845_v24, %v1653_v41  ;;  %v2305_v41 = vmul.f32 %v1025_v7, %v4300_v9  ;;  %v4801_v34 = vmul.f32 %v6140_v30, %v4300_v9 }
 0x153   : > { %6132 = vst [vmem:[#allocation26_spill] sm:$0xff] %v4754_v22  ;;  %6135 = vst [vmem:[#allocation69_spill] sm:$0xff] %v4771_v44  ;;  %v4775_v22 = vadd.f32 %v1846_v37, %v1654_v6  ;;  %v2306_v6 = vmul.f32 %v1025_v7, %v4305_v0  ;;  %v1337_v42 = vcombine.high %v4741_v33, %v4741_v33  ;;  %v6144_v44 = vld [vmem:[#allocation32_spill] sm:$0xff] }
 0x154   : > { %6136 = vst [vmem:[#allocation70_spill] sm:$0xff] %v4773_v47  ;;  %v1041_v31 = vpop.permute.xlu0 %1040  ;;  %1132 = vperm.xlu1 %3674, %v4161_v49   ;;  %6138 = vst [vmem:[#allocation72_spill] sm:$0xff] %v4783_v14  ;;  %v6142_v49 = vld [vmem:[#allocation14_spill] sm:$0xff]  ;;  %v1306_v23 = vcombine.high %v4676_v32, %v4676_v32  ;;  %v4814_v57 = vmul.f32 %v6140_v30, %v4305_v0  ;;  %v2309_v46 = vmul.f32 %v1033_v38, %v4300_v9 }
 0x155   : > { %6137 = vst [vmem:[#allocation71_spill] sm:$0xff] %v4775_v22  ;;  %6139 = vst [vmem:[#allocation73_spill] sm:$0xff] %v4785_v27  ;;  %v1663_v24 = vmul.f32 %v6142_v49, %v4300_v9  ;;  %v1664_v39 = vmul.f32 %v6142_v49, %v4305_v0  ;;  %v2310_v36 = vmul.f32 %v1033_v38, %v4305_v0  ;;  %v2433_v54 = vrot.slane %v2305_v41, 3 }
 0x156   : > { %1492 = vperm.xlu0 %3675, %v4403_v4   ;;  %v897_v50 = vpop.permute.xlu1 %896  ;;  %6141 = vst [vmem:[#allocation13_spill] sm:$0xff] %v4801_v34  ;;  %v6146_v32 = vrot.slane %v4392_v2, %v3935_v13  ;;  %v4830_v38 = vrot.slane %v1337_v42, %v3935_v13  ;;  %v2437_v2 = vrot.slane %v2309_v46, 3  ;;  %v6147_v34 = vld [vmem:[#allocation38_spill] sm:$0xff]  ;;  %v6151_v46 = vld [vmem:[#allocation31_spill] sm:$0xff] }
 0x157   : > { %v1985_v37 = vmul.f32 %v897_v50, %v4300_v9  ;;  %v1986_v7 = vmul.f32 %v897_v50, %v4305_v0  ;;  %v6145_v50 = vrot.slane %v6144_v44, %v3935_v13  ;;  %v1791_v44 = vrot.slane %v1663_v24, 1 }
 0x158   : > { %v1049_v4 = vpop.permute.xlu0 %1048  ;;  %3676 = vset.pattern.permute.xlu1 %v6143_v10  ;;  %v2434_v10 = vrot.slane %v2306_v6, 3  ;;  %v1792_v33 = vrot.slane %v1664_v39, 1  ;;  %v6152_v39 = vld [vmem:[#allocation33_spill] sm:$0xff]  ;;  %v2313_v24 = vmul.f32 %v1041_v31, %v4300_v9 }
 0x159   : > { %1468 = vperm.xlu1 %3676, %v6145_v50   ;;  %v2113_v27 = vrot.slane %v1985_v37, 2  ;;  %v2114_v14 = vrot.slane %v1986_v7, 2  ;;  %v4835_v7 = vrot.slane %v1306_v23, %v3931_v11  ;;  %v2438_v50 = vrot.slane %v2310_v36, 3 }
 0x15a   : > { %1500 = vperm.xlu0 %3675, %v6146_v32   ;;  %v905_v30 = vpop.permute.xlu1 %904  ;;  %v2314_v23 = vmul.f32 %v1041_v31, %v4305_v0 }
 0x15b   : > { %v1989_v49 = vmul.f32 %v905_v30, %v4300_v9  ;;  %v1990_v47 = vmul.f32 %v905_v30, %v4305_v0  ;;  %v2241_v41 = vadd.f32 %v2113_v27, %v4426_v45  ;;  %v2242_v37 = vadd.f32 %v2114_v14, %v4436_v52  ;;  %v6148_v30 = vld [vmem:[#allocation15_spill] sm:$0xff] }
 0x15c   : > { %v1057_v6 = vpop.permute.xlu0 %1056  ;;  %v4840_v42 = vmul.f32 %v6148_v30, %v4300_v9  ;;  %v4850_v36 = vmul.f32 %v6148_v30, %v4305_v0 }
 0x15d   : > { %v2117_v32 = vrot.slane %v1989_v49, 2  ;;  %v2118_v22 = vrot.slane %v1990_v47, 2  ;;  %1476 = vperm.xlu1 %3676, %v6147_v34   ;;  %v4843_v27 = vadd.f32 %v2433_v54, %v2241_v41  ;;  %v4845_v52 = vadd.f32 %v2434_v10, %v2242_v37  ;;  %v6153_v10 = vld [vmem:[#allocation28_spill] sm:$0xff] }
 0x15e   : > { %1508 = vperm.xlu0 %3675, %v4453_v58   ;;  %v913_v45 = vpop.permute.xlu1 %912  ;;  %v4859_v49 = vadd.f32 %v1791_v44, %v6153_v10  ;;  %v6157_v44 = vrot.slane %v4457_v18, %v3935_v13  ;;  %v2318_v10 = vmul.f32 %v1049_v4, %v4305_v0  ;;  %v6158_v18 = vld [vmem:[#allocation16_spill] sm:$0xff] }
 0x15f   : > { %6149 = vst [vmem:[#allocation14_spill] sm:$0xff] %v4843_v27  ;;  %6150 = vst [vmem:[#allocation32_spill] sm:$0xff] %v4845_v52  ;;  %v2245_v47 = vadd.f32 %v2117_v32, %v6151_v46  ;;  %v2246_v14 = vadd.f32 %v2118_v22, %v6152_v39  ;;  %v1993_v58 = vmul.f32 %v913_v45, %v4300_v9  ;;  %v6156_v32 = vld [vmem:[#allocation29_spill] sm:$0xff]  ;;  %v6274_v27 = vld [vmem:[#allocation56_spill] sm:$0xff] }
 0x160   : > { %v1994_v54 = vmul.f32 %v913_v45, %v4305_v0  ;;  %v1065_v34 = vpop.permute.xlu0 %1064  ;;  %v4869_v30 = vadd.f32 %v1792_v33, %v6156_v32  ;;  %v2442_v33 = vrot.slane %v2314_v23, 3  ;;  %v2321_v32 = vmul.f32 %v1057_v6, %v4300_v9  ;;  %v6267_v52 = vld [vmem:[#allocation53_spill] sm:$0xff] }
 0x161   : > { %1480 = vperm.xlu1 %3676, %v4476_v3   ;;  %v4864_v37 = vadd.f32 %v2437_v2, %v2245_v47  ;;  %v4866_v22 = vadd.f32 %v2438_v50, %v2246_v14  ;;  %v2121_v46 = vrot.slane %v1993_v58, 2  ;;  %v2317_v3 = vmul.f32 %v1049_v4, %v4300_v9 }
 0x162   : > { %v2122_v45 = vrot.slane %v1994_v54, 2  ;;  %1516 = vperm.xlu0 %3675, %v6157_v44   ;;  %v921_v39 = vpop.permute.xlu1 %920  ;;  %v2441_v47 = vrot.slane %v2313_v24, 3  ;;  %v4884_v44 = vmul.f32 %v6158_v18, %v4300_v9  ;;  %v6159_v4 = vrot.slane %v4480_v19, %v3935_v13  ;;  %v6163_v19 = vld [vmem:[#allocation40_spill] sm:$0xff] }
 0x163   : > { %6154 = vst [vmem:[#allocation38_spill] sm:$0xff] %v4864_v37  ;;  %6155 = vst [vmem:[#allocation15_spill] sm:$0xff] %v4866_v22  ;;  %v1997_v2 = vmul.f32 %v921_v39, %v4300_v9  ;;  %v1998_v50 = vmul.f32 %v921_v39, %v4305_v0  ;;  %v2249_v14 = vadd.f32 %v2121_v46, %v4467_v55  ;;  %v2446_v39 = vrot.slane %v2318_v10, 3 }
 0x164   : > { %v2250_v58 = vadd.f32 %v2122_v45, %v4469_v61  ;;  %v1073_v54 = vpop.permute.xlu0 %1072  ;;  %v4891_v24 = vmul.f32 %v6158_v18, %v4305_v0  ;;  %v1338_v61 = vcombine.high %v4835_v7, %v4835_v7  ;;  %v2445_v45 = vrot.slane %v2317_v3, 3 }
 0x165   : > { %v2125_v31 = vrot.slane %v1997_v2, 2  ;;  %v2126_v11 = vrot.slane %v1998_v50, 2  ;;  %1488 = vperm.xlu1 %3676, %v6159_v4   ;;  %v4896_v23 = vadd.f32 %v2441_v47, %v2249_v14  ;;  %v6162_v2 = vld [vmem:[#allocation39_spill] sm:$0xff]  ;;  %v2322_v18 = vmul.f32 %v1057_v6, %v4305_v0  ;;  %v6164_v47 = vld [vmem:[#allocation17_spill] sm:$0xff] }
 0x166   : > { %1524 = vperm.xlu0 %3675, %v4516_v8   ;;  %v929_v55 = vpop.permute.xlu1 %928  ;;  %v4898_v46 = vadd.f32 %v2442_v33, %v2250_v58  ;;  %v4908_v14 = vmul.f32 %v6164_v47, %v4300_v9  ;;  %v4912_v3 = vmul.f32 %v6164_v47, %v4305_v0  ;;  %v2326_v47 = vmul.f32 %v1065_v34, %v4305_v0 }
 0x167   : > { %6160 = vst [vmem:[#allocation31_spill] sm:$0xff] %v4896_v23  ;;  %v2253_v50 = vadd.f32 %v2125_v31, %v6162_v2  ;;  %v2254_v4 = vadd.f32 %v2126_v11, %v6163_v19  ;;  %v2001_v8 = vmul.f32 %v929_v55, %v4300_v9  ;;  %v2002_v41 = vmul.f32 %v929_v55, %v4305_v0  ;;  %v6261_v23 = vld [vmem:[#allocation49_spill] sm:$0xff] }
 0x168   : > { %6161 = vst [vmem:[#allocation33_spill] sm:$0xff] %v4898_v46  ;;  %v1081_v22 = vpop.permute.xlu0 %1080  ;;  %v6167_v55 = vrot.slane %v4522_v17, %v3935_v13  ;;  %v2325_v19 = vmul.f32 %v1065_v34, %v4300_v9  ;;  %v6168_v6 = vrot.slane %v4537_v20, %v3935_v13  ;;  %v4935_v34 = vrot.slane %v1338_v61, %v3935_v13  ;;  %v6172_v20 = vld [vmem:[#allocation45_spill] sm:$0xff] }
 0x169   : > { %1496 = vperm.xlu1 %3676, %v4555_v28   ;;  %v4915_v11 = vadd.f32 %v2445_v45, %v2253_v50  ;;  %v4917_v31 = vadd.f32 %v2446_v39, %v2254_v4  ;;  %v2129_v33 = vrot.slane %v2001_v8, 2  ;;  %v2130_v58 = vrot.slane %v2002_v41, 2 }
 0x16a   : > { %1532 = vperm.xlu0 %3675, %v6167_v55   ;;  %v937_v2 = vpop.permute.xlu1 %936  ;;  %v2449_v39 = vrot.slane %v2321_v32, 3  ;;  %v2450_v50 = vrot.slane %v2322_v18, 3  ;;  %v6169_v32 = vld [vmem:[#allocation18_spill] sm:$0xff]  ;;  %v2329_v10 = vmul.f32 %v1073_v54, %v4300_v9 }
 0x16b   : > { %6165 = vst [vmem:[#allocation28_spill] sm:$0xff] %v4915_v11  ;;  %6166 = vst [vmem:[#allocation29_spill] sm:$0xff] %v4917_v31  ;;  %v2005_v28 = vmul.f32 %v937_v2, %v4300_v9  ;;  %v2006_v45 = vmul.f32 %v937_v2, %v4305_v0  ;;  %v2257_v4 = vadd.f32 %v2129_v33, %v4495_v56 }
 0x16c   : > { %v2258_v8 = vadd.f32 %v2130_v58, %v4497_v5  ;;  %v1089_v41 = vpop.permute.xlu0 %1088  ;;  %v4940_v18 = vmul.f32 %v6169_v32, %v4300_v9  ;;  %v2453_v58 = vrot.slane %v2325_v19, 3  ;;  %v2330_v2 = vmul.f32 %v1073_v54, %v4305_v0  ;;  %v6174_v19 = vld [vmem:[#allocation19_spill] sm:$0xff] }
 0x16d   : > { %v2133_v17 = vrot.slane %v2005_v28, 2  ;;  %v2134_v55 = vrot.slane %v2006_v45, 2  ;;  %1504 = vperm.xlu1 %3676, %v6168_v6   ;;  %v4943_v5 = vadd.f32 %v2449_v39, %v2257_v4  ;;  %v2454_v28 = vrot.slane %v2326_v47, 3  ;;  %v6173_v45 = vld [vmem:[#allocation48_spill] sm:$0xff] }
 0x16e   : > { %1540 = vperm.xlu0 %3675, %v4590_v25   ;;  %v945_v56 = vpop.permute.xlu1 %944  ;;  %v4945_v33 = vadd.f32 %v2450_v50, %v2258_v8  ;;  %v4955_v39 = vmul.f32 %v6169_v32, %v4305_v0  ;;  %v4959_v47 = vmul.f32 %v6174_v19, %v4300_v9  ;;  %v4969_v8 = vmul.f32 %v6174_v19, %v4305_v0  ;;  %v6178_v19 = vld [vmem:[#allocation50_spill] sm:$0xff] }
 0x16f   : > { %6170 = vst [vmem:[#allocation16_spill] sm:$0xff] %v4943_v5  ;;  %v2261_v6 = vadd.f32 %v2133_v17, %v6172_v20  ;;  %v2262_v61 = vadd.f32 %v2134_v55, %v6173_v45  ;;  %v2009_v31 = vmul.f32 %v945_v56, %v4300_v9  ;;  %v2010_v11 = vmul.f32 %v945_v56, %v4305_v0 }
 0x170   : > { %6171 = vst [vmem:[#allocation39_spill] sm:$0xff] %v4945_v33  ;;  %v1097_v25 = vpop.permute.xlu0 %1096  ;;  %v6177_v32 = vrot.slane %v4565_v1, %v3935_v13  ;;  %v2333_v20 = vmul.f32 %v1081_v22, %v4300_v9  ;;  %v2458_v45 = vrot.slane %v2330_v2, 3  ;;  %v6204_v33 = vrot.slane %v4723_v51, %v3935_v13 }
 0x171   : > { %1512 = vperm.xlu1 %3676, %v4600_v48   ;;  %v4962_v50 = vadd.f32 %v2453_v58, %v2261_v6  ;;  %v4964_v4 = vadd.f32 %v2454_v28, %v2262_v61  ;;  %v2137_v17 = vrot.slane %v2009_v31, 2  ;;  %v2138_v55 = vrot.slane %v2010_v11, 2 }
 0x172   : > { %1548 = vperm.xlu0 %3675, %v6177_v32   ;;  %v953_v56 = vpop.permute.xlu1 %952  ;;  %v2334_v48 = vmul.f32 %v1081_v22, %v4305_v0  ;;  %v2457_v6 = vrot.slane %v2329_v10, 3  ;;  %v6179_v22 = vrot.slane %v4605_v62, %v3935_v13  ;;  %v6180_v10 = vld [vmem:[#allocation20_spill] sm:$0xff] }
 0x173   : > { %6175 = vst [vmem:[#allocation40_spill] sm:$0xff] %v4962_v50  ;;  %6176 = vst [vmem:[#allocation17_spill] sm:$0xff] %v4964_v4  ;;  %v2013_v58 = vmul.f32 %v953_v56, %v4300_v9  ;;  %v2014_v28 = vmul.f32 %v953_v56, %v4305_v0  ;;  %v2265_v61 = vadd.f32 %v2137_v17, %v4569_v16  ;;  %v2461_v56 = vrot.slane %v2333_v20, 3  ;;  %v6184_v20 = vld [vmem:[#allocation21_spill] sm:$0xff] }
 0x174   : > { %v2266_v31 = vadd.f32 %v2138_v55, %v6178_v19  ;;  %v1105_v11 = vpop.permute.xlu0 %1104  ;;  %v4988_v2 = vmul.f32 %v6180_v10, %v4300_v9  ;;  %v6183_v19 = vld [vmem:[#allocation51_spill] sm:$0xff]  ;;  %v2338_v50 = vmul.f32 %v1089_v41, %v4305_v0 }
 0x175   : > { %v2141_v32 = vrot.slane %v2013_v58, 2  ;;  %v2142_v4 = vrot.slane %v2014_v28, 2  ;;  %1520 = vperm.xlu1 %3676, %v6179_v22   ;;  %v4991_v17 = vadd.f32 %v2457_v6, %v2265_v61  ;;  %v2462_v58 = vrot.slane %v2334_v48, 3 }
 0x176   : > { %1556 = vperm.xlu0 %3675, %v4650_v40   ;;  %v961_v16 = vpop.permute.xlu1 %960  ;;  %v4993_v55 = vadd.f32 %v2458_v45, %v2266_v31  ;;  %v2337_v22 = vmul.f32 %v1089_v41, %v4300_v9  ;;  %v5003_v6 = vmul.f32 %v6180_v10, %v4305_v0  ;;  %v5007_v48 = vmul.f32 %v6184_v20, %v4300_v9  ;;  %v6195_v41 = vld [vmem:[#allocation58_spill] sm:$0xff] }
 0x177   : > { %6181 = vst [vmem:[#allocation18_spill] sm:$0xff] %v4991_v17  ;;  %v2269_v28 = vadd.f32 %v2141_v32, %v4581_v60  ;;  %v2270_v62 = vadd.f32 %v2142_v4, %v6183_v19  ;;  %v2017_v1 = vmul.f32 %v961_v16, %v4300_v9  ;;  %v2018_v54 = vmul.f32 %v961_v16, %v4305_v0 }
 0x178   : > { %6182 = vst [vmem:[#allocation45_spill] sm:$0xff] %v4993_v55  ;;  %v1113_v40 = vpop.permute.xlu0 %1112  ;;  %v5017_v45 = vmul.f32 %v6184_v20, %v4305_v0  ;;  %v6187_v32 = vrot.slane %v4642_v21, %v3935_v13  ;;  %v2341_v16 = vmul.f32 %v1097_v25, %v4300_v9  ;;  %v2466_v19 = vrot.slane %v2338_v50, 3  ;;  %v6188_v20 = vld [vmem:[#allocation55_spill] sm:$0xff] }
 0x179   : > { %1528 = vperm.xlu1 %3676, %v4665_v35   ;;  %v5010_v60 = vadd.f32 %v2461_v56, %v2269_v28  ;;  %v5012_v4 = vadd.f32 %v2462_v58, %v2270_v62  ;;  %v2145_v61 = vrot.slane %v2017_v1, 2  ;;  %v2146_v31 = vrot.slane %v2018_v54, 2 }
 0x17a   : > { %1564 = vperm.xlu0 %3675, %v6187_v32   ;;  %v969_v10 = vpop.permute.xlu1 %968  ;;  %v2342_v35 = vmul.f32 %v1097_v25, %v4305_v0  ;;  %v2465_v28 = vrot.slane %v2337_v22, 3  ;;  %v6189_v25 = vrot.slane %v4657_v59, %v3935_v13  ;;  %v6190_v22 = vld [vmem:[#allocation23_spill] sm:$0xff] }
 0x17b   : > { %6185 = vst [vmem:[#allocation48_spill] sm:$0xff] %v5010_v60  ;;  %6186 = vst [vmem:[#allocation19_spill] sm:$0xff] %v5012_v4  ;;  %v2021_v56 = vmul.f32 %v969_v10, %v4300_v9  ;;  %v2022_v58 = vmul.f32 %v969_v10, %v4305_v0  ;;  %v2273_v62 = vadd.f32 %v2145_v61, %v4625_v12  ;;  %v6191_v12 = vld [vmem:[#allocation64_spill] sm:$0xff] }
 0x17c   : > { %v2274_v1 = vadd.f32 %v2146_v31, %v6188_v20  ;;  %v1121_v54 = vpop.permute.xlu0 %1120  ;;  %v5036_v50 = vmul.f32 %v6190_v22, %v4300_v9  ;;  %v2469_v20 = vrot.slane %v2341_v16, 3  ;;  %v2346_v60 = vmul.f32 %v1105_v11, %v4305_v0  ;;  %v6196_v16 = vld [vmem:[#allocation25_spill] sm:$0xff] }
 0x17d   : > { %v2149_v32 = vrot.slane %v2021_v56, 2  ;;  %v2150_v4 = vrot.slane %v2022_v58, 2  ;;  %1536 = vperm.xlu1 %3676, %v6189_v25   ;;  %v5039_v31 = vadd.f32 %v2465_v28, %v2273_v62  ;;  %v2470_v56 = vrot.slane %v2342_v35, 3  ;;  %v6194_v58 = vld [vmem:[#allocation57_spill] sm:$0xff] }
 0x17e   : > { %1572 = vperm.xlu0 %3675, %v6191_v12   ;;  %v977_v61 = vpop.permute.xlu1 %976  ;;  %v5041_v10 = vadd.f32 %v2466_v19, %v2274_v1  ;;  %v2345_v25 = vmul.f32 %v1105_v11, %v4300_v9  ;;  %v5051_v28 = vmul.f32 %v6190_v22, %v4305_v0  ;;  %v5055_v35 = vmul.f32 %v6196_v16, %v4300_v9 }
 0x17f   : > { %6192 = vst [vmem:[#allocation50_spill] sm:$0xff] %v5039_v31  ;;  %v2277_v21 = vadd.f32 %v2149_v32, %v6194_v58  ;;  %v2278_v59 = vadd.f32 %v2150_v4, %v6195_v41  ;;  %v2025_v55 = vmul.f32 %v977_v61, %v4300_v9  ;;  %v2026_v17 = vmul.f32 %v977_v61, %v4305_v0  ;;  %v6200_v61 = vld [vmem:[#allocation59_spill] sm:$0xff] }
 0x180   : > { %6193 = vst [vmem:[#allocation20_spill] sm:$0xff] %v5041_v10  ;;  %v1129_v12 = vpop.permute.xlu0 %1128  ;;  %v2349_v11 = vmul.f32 %v1113_v40, %v4300_v9  ;;  %v2350_v19 = vmul.f32 %v1113_v40, %v4305_v0  ;;  %v6199_v32 = vrot.slane %v4711_v15, %v3935_v13  ;;  %v5069_v58 = vmul.f32 %v6200_v61, %v4300_v9 }
 0x181   : > { %1544 = vperm.xlu1 %3676, %v4757_v53   ;;  %v5058_v4 = vadd.f32 %v2469_v20, %v2277_v21  ;;  %v5060_v41 = vadd.f32 %v2470_v56, %v2278_v59  ;;  %v2153_v62 = vrot.slane %v2025_v55, 2  ;;  %v2154_v1 = vrot.slane %v2026_v17, 2  ;;  %v6201_v17 = vld [vmem:[#allocation61_spill] sm:$0xff]  ;;  %v6202_v59 = vld [vmem:[#allocation62_spill] sm:$0xff] }
 0x182   : > { %1580 = vperm.xlu0 %3675, %v6199_v32   ;;  %v985_v22 = vpop.permute.xlu1 %984  ;;  %v5073_v53 = vmul.f32 %v6200_v61, %v4305_v0  ;;  %v2473_v40 = vrot.slane %v2345_v25, 3  ;;  %v2474_v55 = vrot.slane %v2346_v60, 3  ;;  %v2477_v60 = vrot.slane %v2349_v11, 3  ;;  %v5098_v11 = vld [vmem:[%s3912_s10] sm:$0xf] }
 0x183   : > { %6197 = vst [vmem:[#allocation51_spill] sm:$0xff] %v5058_v4  ;;  %6198 = vst [vmem:[#allocation21_spill] sm:$0xff] %v5060_v41  ;;  %v2029_v21 = vmul.f32 %v985_v22, %v4300_v9  ;;  %v2030_v20 = vmul.f32 %v985_v22, %v4305_v0  ;;  %v2281_v56 = vadd.f32 %v2153_v62, %v6201_v17  ;;  %v6203_v41 = vld [vmem:[#allocation66_spill] sm:$0xff]  ;;  %v2478_v25 = vrot.slane %v2350_v19, 3  ;;  %v5102_v19 = vld [vmem:[%s3912_s10 + $0x4] sm:$0xf] }
 0x184   : > { %v2282_v15 = vadd.f32 %v2154_v1, %v6202_v59  ;;  %v1137_v32 = vpop.permute.xlu0 %1136  ;;  %v1979_v4 = vmul.f32 %v6203_v41, %v4300_v9  ;;  %v1980_v10 = vmul.f32 %v6203_v41, %v4305_v0  ;;  %v2353_v17 = vmul.f32 %v1121_v54, %v4300_v9  ;;  %v6208_v59 = vld [vmem:[#allocation65_spill] sm:$0xff] }
 0x185   : > { %v2157_v61 = vrot.slane %v2029_v21, 2  ;;  %v2158_v31 = vrot.slane %v2030_v20, 2  ;;  %1552 = vperm.xlu1 %3676, %v6204_v33   ;;  %v5087_v1 = vadd.f32 %v2473_v40, %v2281_v56  ;;  %v2354_v41 = vmul.f32 %v1121_v54, %v4305_v0  ;;  %v6207_v21 = vld [vmem:[#allocation63_spill] sm:$0xff] }
 0x186   : > { %1588 = vperm.xlu0 %3675, %v4781_v43   ;;  %v993_v62 = vpop.permute.xlu1 %992  ;;  %v5089_v22 = vadd.f32 %v2474_v55, %v2282_v15  ;;  %v2427_v51 = vrot.slane %v5069_v58, 3  ;;  %v2428_v33 = vrot.slane %v5073_v53, 3  ;;  %v2107_v55 = vrot.slane %v1979_v4, 2 }
 0x187   : > { %6205 = vst [vmem:[#allocation55_spill] sm:$0xff] %v5087_v1  ;;  %v2285_v20 = vadd.f32 %v2157_v61, %v6207_v21  ;;  %v2286_v5 = vadd.f32 %v2158_v31, %v6208_v59  ;;  %v2033_v43 = vmul.f32 %v5098_v11, %v993_v62  ;;  %v2034_v40 = vmul.f32 %v5102_v19, %v993_v62 }
 0x188   : > { %6206 = vst [vmem:[#allocation23_spill] sm:$0xff] %v5089_v22  ;;  %v2108_v9 = vrot.slane %v1980_v10, 2  ;;  %v2481_v21 = vrot.slane %v2353_v17, 3  ;;  %v2482_v59 = vrot.slane %v2354_v41, 3  ;;  %v2357_v4 = vmul.f32 %v5098_v11, %v1129_v12  ;;  %v6215_v22 = vld [vmem:[#allocation67_spill] sm:$0xff] }
 0x189   : > { %v629_v56 = vpop.permute.xlu0 %628  ;;  %1560 = vperm.xlu1 %3676, %v4788_v29   ;;  %v5106_v0 = vadd.f32 %v2477_v60, %v2285_v20  ;;  %v5108_v54 = vadd.f32 %v2478_v25, %v2286_v5  ;;  %v2161_v31 = vrot.slane %v2033_v43, 2  ;;  %v2162_v58 = vrot.slane %v2034_v40, 2  ;;  %v6211_v60 = vld [vmem:[#allocation22_spill] sm:$0xff]  ;;  %v6213_v20 = vld [vmem:[#allocation24_spill] sm:$0xff] }
 0x18a   : > { %v1595_v53 = vmul.f32 %v5098_v11, %v629_v56  ;;  %v1596_v15 = vmul.f32 %v5102_v19, %v629_v56  ;;  %v1001_v61 = vpop.permute.xlu1 %1000  ;;  %v2358_v29 = vmul.f32 %v5102_v19, %v1129_v12  ;;  %v6212_v5 = vrot.slane %v6211_v60, 1 }
 0x18b   : > { %6209 = vst [vmem:[#allocation64_spill] sm:$0xff] %v5106_v0  ;;  %6210 = vst [vmem:[#allocation57_spill] sm:$0xff] %v5108_v54  ;;  %v2037_v62 = vmul.f32 %v5098_v11, %v1001_v61  ;;  %v2038_v10 = vmul.f32 %v5102_v19, %v1001_v61  ;;  %v6214_v43 = vrot.slane %v6213_v20, 1  ;;  %v2289_v54 = vadd.f32 %v2161_v31, %v4761_v26  ;;  %v6218_v26 = vld [vmem:[#allocation71_spill] sm:$0xff] }
 0x18c   : > { %v1915_v25 = vadd.f32 %v6212_v5, %v1595_v53  ;;  %v2290_v56 = vadd.f32 %v2162_v58, %v4763_v63  ;;  %v6216_v61 = vrot.slane %v6215_v22, %v3935_v13  ;;  %v2361_v12 = vmul.f32 %v5098_v11, %v1137_v32 }
 0x18d   : > { %v1916_v40 = vadd.f32 %v6214_v43, %v1596_v15  ;;  %v2165_v17 = vrot.slane %v2037_v62, 2  ;;  %v2166_v41 = vrot.slane %v2038_v10, 2  ;;  %v5122_v0 = vpop.permute.xlu0 %632  ;;  %v2362_v60 = vmul.f32 %v5102_v19, %v1137_v32  ;;  %v6217_v15 = vld [vmem:[#allocation70_spill] sm:$0xff] }
 0x18e   : > { %1568 = vperm.xlu1 %3676, %v6216_v61   ;;  %v1009_v53 = vpop.permute.xlu1 %1008  ;;  %v2235_v5 = vadd.f32 %v2107_v55, %v1915_v25  ;;  %v2485_v62 = vrot.slane %v2357_v4, 3  ;;  %v2486_v10 = vrot.slane %v2358_v29, 3  ;;  %v5140_v55 = vadd.f32 %v2481_v21, %v2289_v54  ;;  %v6224_v4 = vld [vmem:[#allocation27_spill] sm:$0xff] }
 0x18f   : > { %v2236_v20 = vadd.f32 %v2108_v9, %v1916_v40  ;;  %v2293_v43 = vadd.f32 %v2165_v17, %v6217_v15  ;;  %v2294_v31 = vadd.f32 %v2166_v41, %v6218_v26  ;;  %v2041_v63 = vmul.f32 %v5098_v11, %v1009_v53  ;;  %v6225_v40 = vld [vmem:[#allocation72_spill] sm:$0xff]  ;;  %v6226_v41 = vld [vmem:[#allocation73_spill] sm:$0xff] }
 0x190   : > { %v2042_v58 = vmul.f32 %v5102_v19, %v1009_v53  ;;  %v5133_v1 = vadd.f32 %v2427_v51, %v2235_v5  ;;  %6221 = vst [vmem:[#allocation59_spill] sm:$0xff] %v5140_v55  ;;  %v5142_v9 = vadd.f32 %v2482_v59, %v2290_v56  ;;  %v5146_v25 = vmul.f32 %v5102_v19, %v6196_v16  ;;  %v6229_v59 = vld [vmem:[#allocation30_spill] sm:$0xff] }
 0x191   : > { %v5135_v22 = vadd.f32 %v2428_v33, %v2236_v20  ;;  %v2169_v61 = vrot.slane %v2041_v63, 2  ;;  %v5137_v32 = vpop.permute.xlu0 %644  ;;  %v5150_v51 = vmul.f32 %v5098_v11, %v6224_v4  ;;  %v2489_v33 = vrot.slane %v2361_v12, 3 }
 0x192   : > { %6219 = vst [vmem:[#allocation58_spill] sm:$0xff] %v5133_v1  ;;  %v2170_v46 = vrot.slane %v2042_v58, 2  ;;  %1576 = vperm.xlu1 %3676, %v4830_v38   ;;  %6222 = vst [vmem:[#allocation61_spill] sm:$0xff] %v5142_v9  ;;  %v2490_v29 = vrot.slane %v2362_v60, 3  ;;  %v5156_v38 = vadd.f32 %v2485_v62, %v2293_v43  ;;  %v5158_v54 = vadd.f32 %v2486_v10, %v2294_v31  ;;  %v6236_v58 = vld [vmem:[#allocation35_spill] sm:$0xff] }
 0x193   : > { %6220 = vst [vmem:[#allocation25_spill] sm:$0xff] %v5135_v22  ;;  %6223 = vst [vmem:[#allocation62_spill] sm:$0xff] %v5146_v25  ;;  %v2297_v17 = vadd.f32 %v2169_v61, %v6225_v40  ;;  %v5154_v5 = vpop.permute.xlu1 %1016  ;;  %v5163_v16 = vmul.f32 %v5102_v19, %v6224_v4  ;;  %v5167_v56 = vmul.f32 %v5098_v11, %v6229_v59  ;;  %v6239_v61 = vld [vmem:[#allocation36_spill] sm:$0xff] }
 0x194   : > { %v2298_v53 = vadd.f32 %v2170_v46, %v6226_v41  ;;  %6227 = vst [vmem:[#allocation66_spill] sm:$0xff] %v5156_v38  ;;  %6228 = vst [vmem:[#allocation63_spill] sm:$0xff] %v5158_v54  ;;  %v5171_v12 = vmul.f32 %v5102_v19, %v6229_v59  ;;  %v6232_v46 = vld [vmem:[#allocation34_spill] sm:$0xff]  ;;  %v6233_v43 = vrot.slane %v4835_v7, %v3935_v13 }
 0x195   : > { %6230 = vst [vmem:[#allocation65_spill] sm:$0xff] %v5167_v56  ;;  %v5175_v60 = vmul.f32 %v5098_v11, %v6232_v46  ;;  %v5179_v20 = vmul.f32 %v5102_v19, %v6232_v46  ;;  %v5181_v15 = vpop.permute.xlu0 %652  ;;  %v5186_v26 = vadd.f32 %v2489_v33, %v2297_v17  ;;  %v5193_v62 = vmul.f32 %v5098_v11, %v6236_v58  ;;  %v6246_v33 = vld [vmem:[#allocation42_spill] sm:$0xff] }
 0x196   : > { %6231 = vst [vmem:[#allocation22_spill] sm:$0xff] %v5171_v12  ;;  %1584 = vperm.xlu1 %3676, %v6233_v43   ;;  %v5188_v31 = vadd.f32 %v2490_v29, %v2298_v53  ;;  %v5197_v10 = vmul.f32 %v5102_v19, %v6236_v58  ;;  %v5201_v4 = vmul.f32 %v5098_v11, %v6239_v61  ;;  %v6240_v53 = vld [vmem:[#allocation37_spill] sm:$0xff]  ;;  %v6255_v38 = vld [vmem:[#allocation46_spill] sm:$0xff]  ;;  %v6284_v56 = vrot.slane %v4884_v44, 1 }
 0x197   : > { %6234 = vst [vmem:[#allocation24_spill] sm:$0xff] %v5186_v26  ;;  %6237 = vst [vmem:[#allocation70_spill] sm:$0xff] %v5193_v62  ;;  %v5208_v40 = vmul.f32 %v5102_v19, %v6239_v61  ;;  %v5210_v17 = vpop.permute.xlu1 %1020  ;;  %v5215_v59 = vmul.f32 %v5098_v11, %v6240_v53  ;;  %v5219_v46 = vmul.f32 %v5102_v19, %v6240_v53  ;;  %v6243_v43 = vld [vmem:[#allocation41_spill] sm:$0xff]  ;;  %v6252_v26 = vld [vmem:[#allocation44_spill] sm:$0xff] }
 0x198   : > { %6235 = vst [vmem:[#allocation67_spill] sm:$0xff] %v5188_v31  ;;  %6238 = vst [vmem:[#allocation71_spill] sm:$0xff] %v5197_v10  ;;  %v5223_v58 = vmul.f32 %v5098_v11, %v6243_v43  ;;  %v5237_v13 = vmul.f32 %v5102_v19, %v6243_v43  ;;  %v5242_v7 = vmul.f32 %v5098_v11, %v6246_v33  ;;  %v6258_v61 = vld [vmem:[#allocation47_spill] sm:$0xff] }
 0x199   : > { %6241 = vst [vmem:[#allocation27_spill] sm:$0xff] %v5215_v59  ;;  %6242 = vst [vmem:[#allocation72_spill] sm:$0xff] %v5219_v46  ;;  %v5229_v29 = vpop.permute.xlu0 %660  ;;  %v5246_v41 = vmul.f32 %v5102_v19, %v6246_v33  ;;  %v5263_v33 = vmul.f32 %v5098_v11, %v6252_v26  ;;  %v5267_v54 = vmul.f32 %v5102_v19, %v6252_v26 }
 0x19a   : > { %6244 = vst [vmem:[#allocation73_spill] sm:$0xff] %v5223_v58  ;;  %1592 = vperm.xlu1 %3676, %v4935_v34   ;;  %6245 = vst [vmem:[#allocation30_spill] sm:$0xff] %v5237_v13  ;;  %v6249_v34 = vld [vmem:[#allocation43_spill] sm:$0xff]  ;;  %v5271_v9 = vmul.f32 %v5098_v11, %v6255_v38  ;;  %v5275_v43 = vmul.f32 %v5102_v19, %v6255_v38  ;;  %v5282_v55 = vmul.f32 %v5098_v11, %v6258_v61 }
 0x19b   : > { %6247 = vst [vmem:[#allocation34_spill] sm:$0xff] %v5242_v7  ;;  %6248 = vst [vmem:[#allocation35_spill] sm:$0xff] %v5246_v41  ;;  %v5250_v63 = vmul.f32 %v5098_v11, %v6249_v34  ;;  %v5252_v53 = vpop.permute.xlu1 %1028  ;;  %v5259_v31 = vmul.f32 %v5102_v19, %v6249_v34  ;;  %v5286_v26 = vmul.f32 %v5102_v19, %v6258_v61  ;;  %v6264_v61 = vld [vmem:[#allocation52_spill] sm:$0xff]  ;;  %v6273_v41 = vld [vmem:[#allocation26_spill] sm:$0xff] }
 0x19c   : > { %6253 = vst [vmem:[#allocation41_spill] sm:$0xff] %v5263_v33  ;;  %6254 = vst [vmem:[#allocation42_spill] sm:$0xff] %v5267_v54  ;;  %v5290_v37 = vmul.f32 %v5098_v11, %v6261_v23  ;;  %v5297_v34 = vmul.f32 %v5102_v19, %v6261_v23  ;;  %v5304_v46 = vmul.f32 %v5098_v11, %v6264_v61  ;;  %v6270_v33 = vld [vmem:[#allocation54_spill] sm:$0xff] }
 0x19d   : > { %6250 = vst [vmem:[#allocation36_spill] sm:$0xff] %v5250_v63  ;;  %6251 = vst [vmem:[#allocation37_spill] sm:$0xff] %v5259_v31  ;;  %v5277_v21 = vpop.permute.xlu0 %668  ;;  %v5308_v59 = vmul.f32 %v5102_v19, %v6264_v61  ;;  %v5312_v38 = vmul.f32 %v5098_v11, %v6267_v52  ;;  %v5325_v31 = vmul.f32 %v5102_v19, %v6267_v52 }
 0x19e   : > { %6256 = vst [vmem:[#allocation43_spill] sm:$0xff] %v5271_v9  ;;  %6257 = vst [vmem:[#allocation44_spill] sm:$0xff] %v5275_v43  ;;  %v5330_v23 = vmul.f32 %v5098_v11, %v6270_v33  ;;  %v5334_v1 = vmul.f32 %v5102_v19, %v6270_v33  ;;  %v1983_v10 = vmul.f32 %v5098_v11, %v6273_v41  ;;  %v6277_v33 = vld [vmem:[#allocation60_spill] sm:$0xff] }
 0x19f   : > { %6259 = vst [vmem:[#allocation46_spill] sm:$0xff] %v5282_v55  ;;  %6260 = vst [vmem:[#allocation47_spill] sm:$0xff] %v5286_v26  ;;  %v5299_v22 = vpop.permute.xlu1 %1036  ;;  %v5345_v55 = vmul.f32 %v5098_v11, %v6274_v27  ;;  %v5349_v54 = vmul.f32 %v5102_v19, %v6274_v27  ;;  %v1597_v52 = vmul.f32 %v5098_v11, %v5122_v0  ;;  %v6282_v26 = vld [vmem:[#allocation69_spill] sm:$0xff] }
 0x1a0   : > { %6262 = vst [vmem:[#allocation49_spill] sm:$0xff] %v5290_v37  ;;  %6263 = vst [vmem:[#allocation74_spill] sm:$0xff] %v5297_v34  ;;  %v5353_v34 = vmul.f32 %v5098_v11, %v6277_v33  ;;  %v1984_v37 = vmul.f32 %v5102_v19, %v6273_v41  ;;  %v1603_v27 = vmul.f32 %v5098_v11, %v5137_v32  ;;  %v2111_v9 = vrot.slane %v1983_v10, 2 }
 0x1a1   : > { %6265 = vst [vmem:[#allocation52_spill] sm:$0xff] %v5304_v46  ;;  %6266 = vst [vmem:[#allocation75_spill] sm:$0xff] %v5308_v59  ;;  %v5318_v7 = vpop.permute.xlu0 %676  ;;  %v1598_v59 = vmul.f32 %v5102_v19, %v5122_v0  ;;  %v1604_v46 = vmul.f32 %v5102_v19, %v5137_v32  ;;  %v5372_v43 = vmul.f32 %v5102_v19, %v6277_v33 }
 0x1a2   : > { %6268 = vst [vmem:[#allocation53_spill] sm:$0xff] %v5312_v38  ;;  %6269 = vst [vmem:[#allocation76_spill] sm:$0xff] %v5325_v31  ;;  %v2301_v0 = vmul.f32 %v5098_v11, %v5154_v5  ;;  %v2302_v31 = vmul.f32 %v5102_v19, %v5154_v5  ;;  %v1607_v32 = vmul.f32 %v5098_v11, %v5181_v15  ;;  %v2112_v33 = vrot.slane %v1984_v37, 2 }
 0x1a3   : > { %6271 = vst [vmem:[#allocation54_spill] sm:$0xff] %v5330_v23  ;;  %6272 = vst [vmem:[#allocation77_spill] sm:$0xff] %v5334_v1  ;;  %v5338_v62 = vpop.permute.xlu1 %1044  ;;  %v6280_v1 = vld [vmem:[#allocation12_spill] sm:$0xff]  ;;  %v1923_v58 = vadd.f32 %v6284_v56, %v1603_v27  ;;  %v6285_v5 = vrot.slane %v4891_v24, 1  ;;  %v1608_v41 = vmul.f32 %v5102_v19, %v5181_v15  ;;  %v2239_v37 = vadd.f32 %v2111_v9, %v4859_v49 }
 0x1a4   : > { %6275 = vst [vmem:[#allocation26_spill] sm:$0xff] %v5345_v55  ;;  %6276 = vst [vmem:[#allocation56_spill] sm:$0xff] %v5349_v54  ;;  %v6281_v10 = vrot.slane %v6280_v1, 1  ;;  %v6283_v55 = vrot.slane %v6282_v26, 1  ;;  %v2303_v1 = vmul.f32 %v5098_v11, %v5210_v17  ;;  %v2304_v26 = vmul.f32 %v5102_v19, %v5210_v17  ;;  %v6287_v17 = vld [vmem:[#allocation11_spill] sm:$0xff] }
 0x1a5   : > { %6278 = vst [vmem:[#allocation60_spill] sm:$0xff] %v5353_v34  ;;  %v5359_v61 = vpop.permute.xlu0 %684  ;;  %6279 = vst [vmem:[#allocation78_spill] sm:$0xff] %v5372_v43  ;;  %v1924_v25 = vadd.f32 %v6285_v5, %v1604_v46  ;;  %v2429_v44 = vrot.slane %v2301_v0, 3  ;;  %v2430_v56 = vrot.slane %v2302_v31, 3  ;;  %v6286_v24 = vrot.slane %v4940_v18, 1 }
 0x1a6   : > { %v1917_v23 = vadd.f32 %v6281_v10, %v1597_v52  ;;  %v1918_v13 = vadd.f32 %v6283_v55, %v1598_v59  ;;  %v1611_v15 = vmul.f32 %v5098_v11, %v5229_v29  ;;  %v2240_v46 = vadd.f32 %v2112_v33, %v4869_v30 }
 0x1a7   : > { %v5374_v63 = vpop.permute.xlu1 %1052  ;;  %v1927_v59 = vadd.f32 %v6286_v24, %v1607_v32  ;;  %v1612_v49 = vmul.f32 %v5102_v19, %v5229_v29  ;;  %v2307_v9 = vmul.f32 %v5098_v11, %v5252_v53  ;;  %v6288_v27 = vrot.slane %v6287_v17, 2  ;;  %v6290_v32 = vld [vmem:[#allocation68_spill] sm:$0xff]  ;;  %v6292_v24 = vld [vmem:[#allocation13_spill] sm:$0xff] }
 0x1a8   : > { %v6289_v31 = vrot.slane %v4955_v39, 1  ;;  %v6291_v10 = vrot.slane %v6290_v32, 2  ;;  %v6293_v38 = vrot.slane %v6292_v24, 2  ;;  %v6294_v33 = vrot.slane %v4814_v57, 2 }
 0x1a9   : > { %v5387_v12 = vpop.permute.xlu0 %692  ;;  %v2237_v0 = vadd.f32 %v6288_v27, %v1917_v23  ;;  %v2431_v43 = vrot.slane %v2303_v1, 3  ;;  %v2432_v34 = vrot.slane %v2304_v26, 3  ;;  %v2308_v54 = vmul.f32 %v5102_v19, %v5252_v53 }
 0x1aa   : > { %v1928_v18 = vadd.f32 %v6289_v31, %v1608_v41  ;;  %v2238_v5 = vadd.f32 %v6291_v10, %v1918_v13  ;;  %v2243_v30 = vadd.f32 %v6293_v38, %v1923_v58  ;;  %v2244_v29 = vadd.f32 %v6294_v33, %v1924_v25 }
 0x1ab   : > { %v5403_v55 = vpop.permute.xlu1 %1060  ;;  %v1615_v23 = vmul.f32 %v5098_v11, %v5277_v21  ;;  %v6295_v39 = vrot.slane %v4988_v2, 1  ;;  %v5434_v13 = vadd.f32 %v2429_v44, %v2237_v0  ;;  %v6296_v57 = vrot.slane %v4840_v42, 2 }
 0x1ac   : > { %v5436_v27 = vadd.f32 %v2430_v56, %v2238_v5  ;;  %v6297_v58 = vrot.slane %v5003_v6, 1  ;;  %v2435_v1 = vrot.slane %v2307_v9, 3  ;;  %v1616_v53 = vmul.f32 %v5102_v19, %v5277_v21 }
 0x1ad   : > { %v5414_v52 = vpop.permute.xlu0 %700  ;;  %v1931_v41 = vadd.f32 %v6295_v39, %v1611_v15  ;;  %v2247_v25 = vadd.f32 %v6296_v57, %v1927_v59  ;;  %v2311_v26 = vmul.f32 %v5098_v11, %v5299_v22  ;;  %v2312_v2 = vmul.f32 %v5102_v19, %v5299_v22 }
 0x1ae   : > { %v1932_v38 = vadd.f32 %v6297_v58, %v1612_v49  ;;  %v1619_v44 = vmul.f32 %v5098_v11, %v5318_v7  ;;  %v1620_v42 = vmul.f32 %v5102_v19, %v5318_v7  ;;  %v6298_v6 = vrot.slane %v4850_v36, 2 }
 0x1af   : > { %v5430_v17 = vpop.permute.xlu1 %1068  ;;  %v2436_v59 = vrot.slane %v2308_v54, 3  ;;  %v6299_v15 = vrot.slane %v5036_v50, 1  ;;  %v5456_v9 = vadd.f32 %v2431_v43, %v2239_v37  ;;  %v5458_v0 = vadd.f32 %v2432_v34, %v2240_v46 }
 0x1b0   : > { %v2248_v56 = vadd.f32 %v6298_v6, %v1928_v18  ;;  %v2315_v22 = vmul.f32 %v5098_v11, %v5338_v62  ;;  %v2316_v32 = vmul.f32 %v5102_v19, %v5338_v62  ;;  %v1623_v7 = vmul.f32 %v5098_v11, %v5359_v61 }
 0x1b1   : > { %v709_v31 = vpop.permute.xlu0 %708  ;;  %v1935_v21 = vadd.f32 %v6299_v15, %v1615_v23  ;;  %v6300_v36 = vrot.slane %v4908_v14, 2  ;;  %v6301_v50 = vrot.slane %v5051_v28, 1  ;;  %v2439_v10 = vrot.slane %v2311_v26, 3 }
 0x1b2   : > { %v5470_v37 = vadd.f32 %v2435_v1, %v2243_v30  ;;  %v6302_v34 = vrot.slane %v4912_v3, 2  ;;  %v2440_v5 = vrot.slane %v2312_v2, 3  ;;  %v6303_v24 = vrot.slane %v5150_v51, 1 }
 0x1b3   : > { %v1077_v49 = vpop.permute.xlu1 %1076  ;;  %v2251_v54 = vadd.f32 %v6300_v36, %v1931_v41  ;;  %v1936_v18 = vadd.f32 %v6301_v50, %v1616_v53  ;;  %v6304_v33 = vrot.slane %v5163_v16, 1  ;;  %v1624_v14 = vmul.f32 %v5102_v19, %v5359_v61 }
 0x1b4   : > { %v2252_v46 = vadd.f32 %v6302_v34, %v1932_v38  ;;  %v1939_v62 = vadd.f32 %v6303_v24, %v1619_v44  ;;  %v2319_v28 = vmul.f32 %v5098_v11, %v5374_v63  ;;  %v2320_v30 = vmul.f32 %v5102_v19, %v5374_v63 }
 0x1b5   : > { %v717_v43 = vpop.permute.xlu0 %716  ;;  %v1940_v23 = vadd.f32 %v6304_v33, %v1620_v42  ;;  %v5484_v41 = vadd.f32 %v2436_v59, %v2244_v29  ;;  %v6305_v3 = vrot.slane %v4959_v47, 2  ;;  %v2443_v51 = vrot.slane %v2315_v22, 3 }
 0x1b6   : > { %v2444_v58 = vrot.slane %v2316_v32, 3  ;;  %v6306_v16 = vrot.slane %v5175_v60, 1  ;;  %v1627_v61 = vmul.f32 %v5098_v11, %v5387_v12  ;;  %v1628_v1 = vmul.f32 %v5102_v19, %v5387_v12 }
 0x1b7   : > { %v1085_v39 = vpop.permute.xlu1 %1084  ;;  %v2255_v57 = vadd.f32 %v6305_v3, %v1935_v21  ;;  %v2323_v63 = vmul.f32 %v5098_v11, %v5403_v55  ;;  %v5496_v29 = vadd.f32 %v2439_v10, %v2247_v25  ;;  %v6307_v47 = vrot.slane %v4969_v8, 2 }
 0x1b8   : > { %v1943_v38 = vadd.f32 %v6306_v16, %v1623_v7  ;;  %v6308_v2 = vrot.slane %v5179_v20, 1  ;;  %v5502_v60 = vadd.f32 %v2440_v5, %v2248_v56  ;;  %v6309_v42 = vrot.slane %v5007_v48, 2  ;;  %v6320_v16 = vld [vmem:[#allocation30_spill] sm:$0xff] }
 0x1b9   : > { %v725_v53 = vpop.permute.xlu0 %724  ;;  %v2256_v26 = vadd.f32 %v6307_v47, %v1936_v18  ;;  %v6310_v59 = vrot.slane %v5017_v45, 2  ;;  %v2447_v15 = vrot.slane %v2319_v28, 3  ;;  %v2448_v21 = vrot.slane %v2320_v30, 3 }
 0x1ba   : > { %v1944_v44 = vadd.f32 %v6308_v2, %v1624_v14  ;;  %v2259_v6 = vadd.f32 %v6309_v42, %v1939_v62  ;;  %v2324_v25 = vmul.f32 %v5102_v19, %v5403_v55  ;;  %v1631_v8 = vmul.f32 %v5098_v11, %v5414_v52  ;;  %v6316_v62 = vld [vmem:[#allocation73_spill] sm:$0xff]  ;;  %v6324_v42 = vld [vmem:[#allocation36_spill] sm:$0xff] }
 0x1bb   : > { %v2260_v12 = vadd.f32 %v6310_v59, %v1940_v23  ;;  %v1093_v22 = vpop.permute.xlu1 %1092  ;;  %v6311_v20 = vrot.slane %v5201_v4, 1  ;;  %v5514_v56 = vadd.f32 %v2443_v51, %v2251_v54  ;;  %v5516_v7 = vadd.f32 %v2444_v58, %v2252_v46  ;;  %v6318_v51 = vld [vmem:[#allocation65_spill] sm:$0xff] }
 0x1bc   : > { %v6312_v48 = vrot.slane %v5055_v35, 2  ;;  %v6313_v36 = vrot.slane %v5208_v40, 1  ;;  %v2451_v18 = vrot.slane %v2323_v63, 3  ;;  %v1632_v55 = vmul.f32 %v5102_v19, %v5414_v52  ;;  %v6314_v35 = vld [vmem:[#allocation62_spill] sm:$0xff] }
 0x1bd   : > { %v1947_v32 = vadd.f32 %v6311_v20, %v1627_v61  ;;  %v2327_v10 = vmul.f32 %v5098_v11, %v5430_v17  ;;  %v733_v34 = vpop.permute.xlu0 %732  ;;  %v2328_v4 = vmul.f32 %v5102_v19, %v5430_v17  ;;  %v1635_v54 = vmul.f32 %v5098_v11, %v709_v31 }
 0x1be   : > { %v2263_v45 = vadd.f32 %v6312_v48, %v1943_v38  ;;  %v1948_v50 = vadd.f32 %v6313_v36, %v1628_v1  ;;  %v1636_v46 = vmul.f32 %v5102_v19, %v709_v31  ;;  %v6315_v5 = vrot.slane %v6314_v35, 2 }
 0x1bf   : > { %v2452_v40 = vrot.slane %v2324_v25, 3  ;;  %v6317_v33 = vrot.slane %v6316_v62, 1  ;;  %v1101_v14 = vpop.permute.xlu1 %1100  ;;  %v5534_v52 = vadd.f32 %v2447_v15, %v2255_v57  ;;  %v5536_v28 = vadd.f32 %v2448_v21, %v2256_v26  ;;  %v6322_v57 = vld [vmem:[#allocation22_spill] sm:$0xff] }
 0x1c0   : > { %v2264_v24 = vadd.f32 %v6315_v5, %v1944_v44  ;;  %v2331_v30 = vmul.f32 %v5098_v11, %v1077_v49  ;;  %v2332_v17 = vmul.f32 %v5102_v19, %v1077_v49  ;;  %v1639_v3 = vmul.f32 %v5098_v11, %v717_v43  ;;  %v6326_v49 = vld [vmem:[#allocation37_spill] sm:$0xff] }
 0x1c1   : > { %v1951_v23 = vadd.f32 %v6317_v33, %v1631_v8  ;;  %v6319_v31 = vrot.slane %v6318_v51, 2  ;;  %v6321_v38 = vrot.slane %v6320_v16, 1  ;;  %v2455_v1 = vrot.slane %v2327_v10, 3  ;;  %v741_v63 = vpop.permute.xlu0 %740 }
 0x1c2   : > { %v5545_v47 = vadd.f32 %v2451_v18, %v2259_v6  ;;  %v6323_v2 = vrot.slane %v6322_v57, 2  ;;  %v2456_v44 = vrot.slane %v2328_v4, 3  ;;  %v6325_v59 = vrot.slane %v6324_v42, 1  ;;  %v6328_v6 = vld [vmem:[#allocation70_spill] sm:$0xff]  ;;  %v6330_v4 = vld [vmem:[#allocation43_spill] sm:$0xff] }
 0x1c3   : > { %v2267_v58 = vadd.f32 %v6319_v31, %v1947_v32  ;;  %v1952_v61 = vadd.f32 %v6321_v38, %v1632_v55  ;;  %v6327_v21 = vrot.slane %v6326_v49, 1  ;;  %v1640_v8 = vmul.f32 %v5102_v19, %v717_v43  ;;  %v1109_v48 = vpop.permute.xlu1 %1108  ;;  %v6338_v38 = vld [vmem:[#allocation72_spill] sm:$0xff] }
 0x1c4   : > { %v2268_v26 = vadd.f32 %v6323_v2, %v1948_v50  ;;  %v1955_v15 = vadd.f32 %v6325_v59, %v1635_v54  ;;  %v2335_v20 = vmul.f32 %v5098_v11, %v1085_v39  ;;  %v2336_v32 = vmul.f32 %v5102_v19, %v1085_v39 }
 0x1c5   : > { %v1956_v25 = vadd.f32 %v6327_v21, %v1636_v46  ;;  %v5556_v36 = vadd.f32 %v2452_v40, %v2260_v12  ;;  %v6329_v18 = vrot.slane %v6328_v6, 2  ;;  %v2459_v50 = vrot.slane %v2331_v30, 3  ;;  %v5565_v62 = vpop.permute.xlu0 %748  ;;  %v6332_v12 = vld [vmem:[#allocation71_spill] sm:$0xff] }
 0x1c6   : > { %v2460_v10 = vrot.slane %v2332_v17, 3  ;;  %v6331_v35 = vrot.slane %v6330_v4, 1  ;;  %v1643_v5 = vmul.f32 %v5098_v11, %v725_v53  ;;  %v1644_v46 = vmul.f32 %v5102_v19, %v725_v53 }
 0x1c7   : > { %v2271_v55 = vadd.f32 %v6329_v18, %v1951_v23  ;;  %v2339_v43 = vmul.f32 %v5098_v11, %v1093_v22  ;;  %v5567_v39 = vadd.f32 %v2455_v1, %v2263_v45  ;;  %v6333_v40 = vrot.slane %v6332_v12, 2  ;;  %v6334_v23 = vld [vmem:[#allocation44_spill] sm:$0xff]  ;;  %v5581_v1 = vpop.permute.xlu1 %1116  ;;  %v6344_v18 = vld [vmem:[#allocation74_spill] sm:$0xff] }
 0x1c8   : > { %v1959_v54 = vadd.f32 %v6331_v35, %v1639_v3  ;;  %v6335_v30 = vrot.slane %v6334_v23, 1  ;;  %v5573_v51 = vadd.f32 %v2456_v44, %v2264_v24  ;;  %v6336_v3 = vld [vmem:[#allocation27_spill] sm:$0xff]  ;;  %v6339_v53 = vrot.slane %v6338_v38, 2  ;;  %v6342_v44 = vld [vmem:[#allocation34_spill] sm:$0xff] }
 0x1c9   : > { %v2272_v33 = vadd.f32 %v6333_v40, %v1952_v61  ;;  %v6337_v31 = vrot.slane %v6336_v3, 2  ;;  %v2463_v2 = vrot.slane %v2335_v20, 3  ;;  %v2464_v42 = vrot.slane %v2336_v32, 3  ;;  %v6340_v61 = vld [vmem:[#allocation49_spill] sm:$0xff]  ;;  %v1473_v35 = vpop.permute.xlu0 %1472 }
 0x1ca   : > { %v1960_v17 = vadd.f32 %v6335_v30, %v1640_v8  ;;  %v2276_v57 = vadd.f32 %v6339_v53, %v1956_v25  ;;  %v2340_v59 = vmul.f32 %v5102_v19, %v1093_v22  ;;  %v1647_v45 = vmul.f32 %v5098_v11, %v733_v34 }
 0x1cb   : > { %v2275_v16 = vadd.f32 %v6337_v31, %v1955_v15  ;;  %v6341_v49 = vrot.slane %v6340_v61, 1  ;;  %v5585_v8 = vadd.f32 %v2459_v50, %v2267_v58  ;;  %v5587_v24 = vadd.f32 %v2460_v10, %v2268_v26  ;;  %v6346_v26 = vld [vmem:[#allocation35_spill] sm:$0xff]  ;;  %v6350_v31 = vld [vmem:[#allocation41_spill] sm:$0xff] }
 0x1cc   : > { %v6343_v15 = vrot.slane %v6342_v44, 2  ;;  %v6345_v25 = vrot.slane %v6344_v18, 1  ;;  %v2467_v32 = vrot.slane %v2339_v43, 3  ;;  %v1648_v22 = vmul.f32 %v5102_v19, %v733_v34 }
 0x1cd   : > { %v1963_v21 = vadd.f32 %v6341_v49, %v1643_v5  ;;  %v2343_v4 = vmul.f32 %v5098_v11, %v1101_v14  ;;  %v2344_v12 = vmul.f32 %v5102_v19, %v1101_v14  ;;  %v2621_v5 = vadd.f32 %v5434_v13, %v1473_v35 }
 0x1ce   : > { %v2279_v6 = vadd.f32 %v6343_v15, %v1959_v54  ;;  %v1964_v20 = vadd.f32 %v6345_v25, %v1644_v46  ;;  %v2622_v58 = vadd.f32 %v5436_v27, %v1473_v35  ;;  %v6347_v50 = vrot.slane %v6346_v26, 2  ;;  %v6348_v54 = vld [vmem:[#allocation53_spill] sm:$0xff]  ;;  %v5602_v46 = vpop.permute.xlu1 %1124  ;;  %v6360_v26 = vld [vmem:[#allocation56_spill] sm:$0xff] }
 0x1cf   : > { %v2468_v40 = vrot.slane %v2340_v59, 3  ;;  %v6349_v23 = vrot.slane %v6348_v54, 1  ;;  %v5604_v43 = vadd.f32 %v2463_v2, %v2271_v55  ;;  %v5606_v34 = vadd.f32 %v2464_v42, %v2272_v33  ;;  %v6354_v55 = vld [vmem:[#allocation42_spill] sm:$0xff] }
 0x1d0   : > { %v2280_v10 = vadd.f32 %v6347_v50, %v1960_v17  ;;  %v1651_v3 = vmul.f32 %v5098_v11, %v741_v63  ;;  %v1652_v14 = vmul.f32 %v5102_v19, %v741_v63  ;;  %v2686_v13 = vmax.f32 %v2622_v58, 0.0  ;;  %v6352_v17 = vld [vmem:[#allocation76_spill] sm:$0xff]  ;;  %v2748_v63 = vld [vmem:[#allocation2 + $0x2] sm:$0x3] }
 0x1d1   : > { %v1967_v30 = vadd.f32 %v6349_v23, %v1647_v45  ;;  %v6351_v27 = vrot.slane %v6350_v31, 2  ;;  %v6353_v53 = vrot.slane %v6352_v17, 1  ;;  %v2471_v61 = vrot.slane %v2343_v4, 3  ;;  %v1485_v45 = vpop.permute.xlu0 %1484 }
 0x1d2   : > { %v5616_v49 = vadd.f32 %v2467_v32, %v2275_v16  ;;  %v6355_v2 = vrot.slane %v6354_v55, 2  ;;  %v2472_v42 = vrot.slane %v2344_v12, 3  ;;  %v5623_v44 = vmul.f32 %v5098_v11, %v1109_v48  ;;  %v6356_v16 = vld [vmem:[#allocation46_spill] sm:$0xff] }
 0x1d3   : > { %v5612_v38 = vadd.f32 %v6351_v27, %v1963_v21  ;;  %v1968_v59 = vadd.f32 %v6353_v53, %v1648_v22  ;;  %v2685_v15 = vmax.f32 %v2621_v5, 0.0  ;;  %v2846_v18 = vrot.slane %v2686_v13, 7  ;;  %v5627_v22 = vpop.permute.xlu1 %1132 }
 0x1d4   : > { %v5620_v33 = vadd.f32 %v6355_v2, %v1964_v20  ;;  %v2627_v21 = vadd.f32 %v5470_v37, %v1485_v45  ;;  %v2628_v25 = vadd.f32 %v5484_v41, %v1485_v45  ;;  %v5629_v4 = vadd.f32 %v2468_v40, %v2276_v57  ;;  %v6358_v20 = vld [vmem:[#allocation26_spill] sm:$0xff]  ;;  %v6362_v57 = vld [vmem:[#allocation47_spill] sm:$0xff] }
 0x1d5   : > { %v6357_v32 = vrot.slane %v6356_v16, 2  ;;  %v6359_v12 = vrot.slane %v6358_v20, 1  ;;  %v6361_v50 = vrot.slane %v6360_v26, 1  ;;  %v2348_v5 = vmul.f32 %v5102_v19, %v1109_v48  ;;  %v1493_v13 = vpop.permute.xlu0 %1492  ;;  %v6369_v16 = vld [vmem:[#allocation25_spill] sm:$0xff] }
 0x1d6   : > { %v2847_v37 = vsel %vm2844_vm0, %v2846_v18, %v2685_v15  ;;  %v2692_v41 = vmax.f32 %v2628_v25, 0.0  ;;  %v5641_v31 = vadd.f32 %v2471_v61, %v2279_v6  ;;  %v6363_v40 = vrot.slane %v6362_v57, 2  ;;  %v2751_v6 = vld [vmem:[#allocation2 + $0x8] sm:$0x3]  ;;  %v6368_v25 = vld [vmem:[#allocation58_spill] sm:$0xff] }
 0x1d7   : > { %v5633_v35 = vadd.f32 %v6357_v32, %v1967_v30  ;;  %v1971_v58 = vadd.f32 %v6359_v12, %v1651_v3  ;;  %v1972_v54 = vadd.f32 %v6361_v50, %v1652_v14  ;;  %v2941_v23 = vadd.f32 %v2847_v37, %v2748_v63  ;;  %v1469_v2 = vpop.permute.xlu1 %1468  ;;  %v2753_v12 = vld [vmem:[#allocation2 + $0xc] sm:$0x3] }
 0x1d8   : > { %v5645_v27 = vadd.f32 %v6363_v40, %v1968_v59  ;;  %v2475_v30 = vrot.slane %v5623_v44, 3  ;;  %v2631_v3 = vadd.f32 %v5496_v29, %v1493_v13  ;;  %v2632_v17 = vadd.f32 %v5502_v60, %v1493_v13  ;;  %v6364_v44 = vld [vmem:[#allocation52_spill] sm:$0xff]  ;;  %v6366_v60 = vld [vmem:[#allocation75_spill] sm:$0xff] }
 0x1d9   : > { %v5650_v14 = vadd.f32 %v2472_v42, %v2280_v10  ;;  %v1655_v48 = vmul.f32 %v5098_v11, %v5565_v62  ;;  %v1656_v53 = vmul.f32 %v5102_v19, %v5565_v62  ;;  %2973 = vst [vmem:[#allocation2 + $0x2] sm:$0x3] %v2941_v23  ;;  %v2691_v61 = vmax.f32 %v2627_v21, 0.0  ;;  %v1501_v21 = vpop.permute.xlu0 %1500 }
 0x1da   : > { %v2852_v45 = vrot.slane %v2692_v41, 7  ;;  %v2476_v59 = vrot.slane %v2348_v5, 3  ;;  %v2696_v55 = vmax.f32 %v2632_v17, 0.0  ;;  %v6365_v63 = vrot.slane %v6364_v44, 2  ;;  %v6370_v5 = vld [vmem:[#allocation60_spill] sm:$0xff] }
 0x1db   : > { %v6367_v10 = vrot.slane %v6366_v60, 2  ;;  %v2695_v18 = vmax.f32 %v2631_v3, 0.0  ;;  %v2619_v62 = vadd.f32 %v6368_v25, %v1469_v2  ;;  %v2620_v32 = vadd.f32 %v6369_v16, %v1469_v2  ;;  %v2755_v44 = vld [vmem:[#allocation2 + $0x10] sm:$0x3] }
 0x1dc   : > { %v5658_v29 = vadd.f32 %v6365_v63, %v1971_v58  ;;  %v2853_v15 = vsel %vm2844_vm0, %v2852_v45, %v2691_v61  ;;  %v2856_v26 = vrot.slane %v2696_v55, 7  ;;  %v2635_v50 = vadd.f32 %v5514_v56, %v1501_v21  ;;  %v2747_v61 = vld [vmem:[#allocation2] sm:$0x3] }
 0x1dd   : > { %v5662_v42 = vadd.f32 %v6367_v10, %v1972_v54  ;;  %v2944_v20 = vadd.f32 %v2853_v15, %v2751_v6  ;;  %v2636_v58 = vadd.f32 %v5516_v7, %v1501_v21  ;;  %v6371_v37 = vrot.slane %v6370_v5, 1  ;;  %v6372_v54 = vld [vmem:[#allocation78_spill] sm:$0xff]  ;;  %v1509_v2 = vpop.permute.xlu0 %1508 }
 0x1de   : > { %v6373_v41 = vrot.slane %v6372_v54, 1  ;;  %v5679_v57 = vmul.f32 %v5098_v11, %v5581_v1  ;;  %v2684_v40 = vmax.f32 %v2620_v32, 0.0  ;;  %v5683_v3 = vmul.f32 %v5102_v19, %v5581_v1 }
 0x1df   : > { %v5671_v23 = vadd.f32 %v6371_v37, %v1655_v48  ;;  %2976 = vst [vmem:[#allocation2 + $0x8] sm:$0x3] %v2944_v20  ;;  %v2857_v56 = vsel %vm2844_vm0, %v2856_v26, %v2695_v18  ;;  %v2683_v7 = vmax.f32 %v2619_v62, 0.0  ;;  %v2700_v17 = vmax.f32 %v2636_v58, 0.0  ;;  %v1477_v48 = vpop.permute.xlu1 %1476 }
 0x1e0   : > { %v5675_v13 = vadd.f32 %v6373_v41, %v1656_v53  ;;  %v2946_v6 = vadd.f32 %v2857_v56, %v2753_v12  ;;  %v2843_v45 = vrot.slane %v2684_v40, 7  ;;  %v2623_v53 = vadd.f32 %v5456_v9, %v1477_v48 }
 0x1e1   : > { %v2624_v55 = vadd.f32 %v5458_v0, %v1477_v48  ;;  %v2699_v63 = vmax.f32 %v2635_v50, 0.0  ;;  %v2860_v60 = vrot.slane %v2700_v17, 7  ;;  %v2639_v1 = vadd.f32 %v5534_v52, %v1509_v2  ;;  %v2749_v52 = vld [vmem:[#allocation2 + $0x4] sm:$0x3]  ;;  %v6375_v50 = vld [vmem:[#allocation32_spill] sm:$0xff]  ;;  %v1517_v5 = vpop.permute.xlu0 %1516 }
 0x1e2   : > { %v2640_v10 = vadd.f32 %v5536_v28, %v1509_v2  ;;  %2978 = vst [vmem:[#allocation2 + $0xc] sm:$0x3] %v2946_v6  ;;  %v2845_v15 = vsel %vm2844_vm0, %v2843_v45, %v2683_v7  ;;  %v5692_v25 = vadd.f32 %v2475_v30, %v5612_v38  ;;  %v5695_v62 = vadd.f32 %v2476_v59, %v5620_v33  ;;  %v6374_v28 = vld [vmem:[#allocation14_spill] sm:$0xff]  ;;  %v2757_v38 = vld [vmem:[#allocation2 + $0x14] sm:$0x3] }
 0x1e3   : > { %v2688_v18 = vmax.f32 %v2624_v55, 0.0  ;;  %v2940_v9 = vadd.f32 %v2845_v15, %v2747_v61  ;;  %v2861_v0 = vsel %vm2844_vm0, %v2860_v60, %v2699_v63  ;;  %v2687_v16 = vmax.f32 %v2623_v53, 0.0  ;;  %v1481_v21 = vpop.permute.xlu1 %1480  ;;  %v2750_v53 = vld [vmem:[#allocation2 + $0x6] sm:$0x3]  ;;  %v2759_v60 = vld [vmem:[#allocation2 + $0x18] sm:$0x3] }
 0x1e4   : > { %v2704_v32 = vmax.f32 %v2640_v10, 0.0  ;;  %v2948_v20 = vadd.f32 %v2861_v0, %v2755_v44  ;;  %v2625_v26 = vadd.f32 %v6374_v28, %v1481_v21  ;;  %v2626_v58 = vadd.f32 %v6375_v50, %v1481_v21 }
 0x1e5   : > { %v2848_v12 = vrot.slane %v2688_v18, 7  ;;  %2972 = vst [vmem:[#allocation2] sm:$0x3] %v2940_v9  ;;  %v2703_v30 = vmax.f32 %v2639_v1, 0.0  ;;  %v2643_v33 = vadd.f32 %v5545_v47, %v1517_v5  ;;  %v2644_v59 = vadd.f32 %v5556_v36, %v1517_v5  ;;  %v6376_v47 = vld [vmem:[#allocation38_spill] sm:$0xff]  ;;  %v6377_v36 = vld [vmem:[#allocation15_spill] sm:$0xff]  ;;  %v1525_v63 = vpop.permute.xlu0 %1524 }
 0x1e6   : > { %v2864_v37 = vrot.slane %v2704_v32, 7  ;;  %v2479_v54 = vrot.slane %v5679_v57, 3  ;;  %v2480_v41 = vrot.slane %v5683_v3, 3  ;;  %2980 = vst [vmem:[#allocation2 + $0x10] sm:$0x3] %v2948_v20  ;;  %v2690_v56 = vmax.f32 %v2626_v58, 0.0 }
 0x1e7   : > { %v2849_v40 = vsel %vm2844_vm0, %v2848_v12, %v2687_v16  ;;  %v2689_v48 = vmax.f32 %v2625_v26, 0.0  ;;  %v2708_v6 = vmax.f32 %v2644_v59, 0.0  ;;  %v1489_v61 = vpop.permute.xlu1 %1488  ;;  %v2707_v1 = vmax.f32 %v2643_v33, 0.0  ;;  %v6378_v16 = vld [vmem:[#allocation54_spill] sm:$0xff]  ;;  %v6380_v20 = vld [vmem:[#allocation77_spill] sm:$0xff] }
 0x1e8   : > { %v2942_v7 = vadd.f32 %v2849_v40, %v2749_v52  ;;  %v2865_v17 = vsel %vm2844_vm0, %v2864_v37, %v2703_v30  ;;  %v2850_v55 = vrot.slane %v2690_v56, 7  ;;  %v2629_v2 = vadd.f32 %v6376_v47, %v1489_v61  ;;  %v2752_v5 = vld [vmem:[#allocation2 + $0xa] sm:$0x3]  ;;  %v6383_v33 = vld [vmem:[#allocation33_spill] sm:$0xff]  ;;  %v2761_v40 = vld [vmem:[#allocation2 + $0x1c] sm:$0x3] }
 0x1e9   : > { %v2950_v45 = vadd.f32 %v2865_v17, %v2757_v38  ;;  %v2630_v44 = vadd.f32 %v6377_v36, %v1489_v61  ;;  %v2868_v10 = vrot.slane %v2708_v6, 7  ;;  %v2647_v15 = vadd.f32 %v5567_v39, %v1525_v63  ;;  %v6382_v30 = vld [vmem:[#allocation31_spill] sm:$0xff] }
 0x1ea   : > { %2974 = vst [vmem:[#allocation2 + $0x4] sm:$0x3] %v2942_v7  ;;  %v2648_v18 = vadd.f32 %v5573_v51, %v1525_v63  ;;  %v2851_v9 = vsel %vm2844_vm0, %v2850_v55, %v2689_v48  ;;  %v6379_v32 = vrot.slane %v6378_v16, 2  ;;  %v6381_v52 = vrot.slane %v6380_v20, 2  ;;  %v6384_v63 = vld [vmem:[#allocation28_spill] sm:$0xff] }
 0x1eb   : > { %2982 = vst [vmem:[#allocation2 + $0x14] sm:$0x3] %v2950_v45  ;;  %v2694_v0 = vmax.f32 %v2630_v44, 0.0  ;;  %v2943_v28 = vadd.f32 %v2851_v9, %v2750_v53  ;;  %v2869_v26 = vsel %vm2844_vm0, %v2868_v10, %v2707_v1  ;;  %v2693_v39 = vmax.f32 %v2629_v2, 0.0  ;;  %v1497_v51 = vpop.permute.xlu1 %1496 }
 0x1ec   : > { %v5714_v21 = vadd.f32 %v6379_v32, %v5671_v23  ;;  %v5719_v12 = vadd.f32 %v6381_v52, %v5675_v13  ;;  %v2712_v50 = vmax.f32 %v2648_v18, 0.0  ;;  %v2952_v58 = vadd.f32 %v2869_v26, %v2759_v60  ;;  %v1533_v23 = vpop.permute.xlu0 %1532  ;;  %v6385_v60 = vld [vmem:[#allocation29_spill] sm:$0xff] }
 0x1ed   : > { %v2854_v38 = vrot.slane %v2694_v0, 7  ;;  %v2633_v37 = vadd.f32 %v6382_v30, %v1497_v51  ;;  %v2634_v59 = vadd.f32 %v6383_v33, %v1497_v51  ;;  %2975 = vst [vmem:[#allocation2 + $0x6] sm:$0x3] %v2943_v28  ;;  %v2711_v56 = vmax.f32 %v2647_v15, 0.0 }
 0x1ee   : > { %v2872_v7 = vrot.slane %v2712_v50, 7  ;;  %v2651_v13 = vadd.f32 %v5585_v8, %v1533_v23  ;;  %v2652_v17 = vadd.f32 %v5587_v24, %v1533_v23  ;;  %v5728_v48 = vmul.f32 %v5098_v11, %v5602_v46  ;;  %2984 = vst [vmem:[#allocation2 + $0x18] sm:$0x3] %v2952_v58  ;;  %v2754_v24 = vld [vmem:[#allocation2 + $0xe] sm:$0x3] }
 0x1ef   : > { %v5732_v6 = vmul.f32 %v5102_v19, %v5602_v46  ;;  %v2855_v61 = vsel %vm2844_vm0, %v2854_v38, %v2693_v39  ;;  %v2698_v45 = vmax.f32 %v2634_v59, 0.0  ;;  %v2697_v47 = vmax.f32 %v2633_v37, 0.0  ;;  %v1505_v8 = vpop.permute.xlu1 %1504  ;;  %v2763_v19 = vld [vmem:[#allocation2 + $0x20] sm:$0x3]  ;;  %v2756_v50 = vld [vmem:[#allocation2 + $0x12] sm:$0x3] }
 0x1f0   : > { %v2945_v53 = vadd.f32 %v2855_v61, %v2752_v5  ;;  %v2873_v55 = vsel %vm2844_vm0, %v2872_v7, %v2711_v56  ;;  %v2716_v2 = vmax.f32 %v2652_v17, 0.0  ;;  %v2637_v11 = vadd.f32 %v6384_v63, %v1505_v8  ;;  %v1541_v10 = vpop.permute.xlu0 %1540  ;;  %v6386_v58 = vld [vmem:[#allocation16_spill] sm:$0xff]  ;;  %v6387_v38 = vld [vmem:[#allocation39_spill] sm:$0xff] }
 0x1f1   : > { %v2954_v36 = vadd.f32 %v2873_v55, %v2761_v40  ;;  %v2858_v44 = vrot.slane %v2698_v45, 7  ;;  %v2638_v1 = vadd.f32 %v6385_v60, %v1505_v8  ;;  %v2715_v46 = vmax.f32 %v2651_v13, 0.0 }
 0x1f2   : > { %2977 = vst [vmem:[#allocation2 + $0xa] sm:$0x3] %v2945_v53  ;;  %v2876_v15 = vrot.slane %v2716_v2, 7  ;;  %v2655_v18 = vadd.f32 %v5604_v43, %v1541_v10  ;;  %v2656_v9 = vadd.f32 %v5606_v34, %v1541_v10  ;;  %v5744_v32 = vadd.f32 %v2479_v54, %v5633_v35  ;;  %v2765_v54 = vld [vmem:[#allocation2 + $0x24] sm:$0x3] }
 0x1f3   : > { %2986 = vst [vmem:[#allocation2 + $0x1c] sm:$0x3] %v2954_v36  ;;  %v2859_v0 = vsel %vm2844_vm0, %v2858_v44, %v2697_v47  ;;  %v2702_v16 = vmax.f32 %v2638_v1, 0.0  ;;  %v5749_v20 = vadd.f32 %v2480_v41, %v5645_v27  ;;  %v2701_v43 = vmax.f32 %v2637_v11, 0.0  ;;  %v1513_v34 = vpop.permute.xlu1 %1512  ;;  %v2767_v47 = vld [vmem:[#allocation2 + $0x28] sm:$0x3] }
 0x1f4   : > { %v2947_v52 = vadd.f32 %v2859_v0, %v2754_v24  ;;  %v2877_v28 = vsel %vm2844_vm0, %v2876_v15, %v2715_v46  ;;  %v2720_v26 = vmax.f32 %v2656_v9, 0.0  ;;  %v2641_v5 = vadd.f32 %v6386_v58, %v1513_v34  ;;  %v1549_v35 = vpop.permute.xlu0 %1548  ;;  %v3687_v44 = vld [vmem:[%s3912_s10] sm:$0xf]  ;;  %v3688_v11 = vld [vmem:[%s3912_s10 + $0x4] sm:$0xf] }
 0x1f5   : > { %v2956_v39 = vadd.f32 %v2877_v28, %v2763_v19  ;;  %v2862_v51 = vrot.slane %v2702_v16, 7  ;;  %v2642_v57 = vadd.f32 %v6387_v38, %v1513_v34  ;;  %v2719_v30 = vmax.f32 %v2655_v18, 0.0  ;;  %v6390_v16 = vld [vmem:[#allocation18_spill] sm:$0xff]  ;;  %v6391_v28 = vld [vmem:[#allocation45_spill] sm:$0xff] }
 0x1f6   : > { %2979 = vst [vmem:[#allocation2 + $0xe] sm:$0x3] %v2947_v52  ;;  %v2880_v3 = vrot.slane %v2720_v26, 7  ;;  %v2659_v27 = vadd.f32 %v5616_v49, %v1549_v35  ;;  %v2660_v41 = vadd.f32 %v5629_v4, %v1549_v35  ;;  %v2483_v37 = vrot.slane %v5728_v48, 3  ;;  %v2758_v49 = vld [vmem:[#allocation2 + $0x16] sm:$0x3] }
 0x1f7   : > { %v2484_v33 = vrot.slane %v5732_v6, 3  ;;  %2988 = vst [vmem:[#allocation2 + $0x20] sm:$0x3] %v2956_v39  ;;  %v2863_v59 = vsel %vm2844_vm0, %v2862_v51, %v2701_v43  ;;  %v2706_v23 = vmax.f32 %v2642_v57, 0.0  ;;  %v2705_v7 = vmax.f32 %v2641_v5, 0.0  ;;  %v1521_v17 = vpop.permute.xlu1 %1520  ;;  %v6388_v4 = vld [vmem:[#allocation40_spill] sm:$0xff] }
 0x1f8   : > { %v2949_v40 = vadd.f32 %v2863_v59, %v2756_v50  ;;  %v2881_v56 = vsel %vm2844_vm0, %v2880_v3, %v2719_v30  ;;  %v2724_v13 = vmax.f32 %v2660_v41, 0.0  ;;  %v2645_v53 = vadd.f32 %v6388_v4, %v1521_v17  ;;  %v6389_v48 = vld [vmem:[#allocation17_spill] sm:$0xff]  ;;  %v1557_v6 = vpop.permute.xlu0 %1556  ;;  %v2762_v59 = vld [vmem:[#allocation2 + $0x1e] sm:$0x3] }
 0x1f9   : > { %v2958_v61 = vadd.f32 %v2881_v56, %v2765_v54  ;;  %v2866_v45 = vrot.slane %v2706_v23, 7  ;;  %v2646_v55 = vadd.f32 %v6389_v48, %v1521_v17  ;;  %v2723_v2 = vmax.f32 %v2659_v27, 0.0 }
 0x1fa   : > { %2981 = vst [vmem:[#allocation2 + $0x12] sm:$0x3] %v2949_v40  ;;  %v2884_v8 = vrot.slane %v2724_v13, 7  ;;  %v2663_v36 = vadd.f32 %v5641_v31, %v1557_v6  ;;  %v2664_v24 = vadd.f32 %v5650_v14, %v1557_v6  ;;  %v5766_v63 = vmul.f32 %v3687_v44, %v5627_v22  ;;  %v2760_v14 = vld [vmem:[#allocation2 + $0x1a] sm:$0x3] }
 0x1fb   : > { %v5770_v60 = vmul.f32 %v3688_v11, %v5627_v22  ;;  %2990 = vst [vmem:[#allocation2 + $0x24] sm:$0x3] %v2958_v61  ;;  %v2867_v1 = vsel %vm2844_vm0, %v2866_v45, %v2705_v7  ;;  %v2710_v10 = vmax.f32 %v2646_v55, 0.0  ;;  %v2709_v15 = vmax.f32 %v2645_v53, 0.0  ;;  %v1529_v31 = vpop.permute.xlu1 %1528  ;;  %v2769_v22 = vld [vmem:[#allocation2 + $0x2c] sm:$0x3] }
 0x1fc   : > { %v2951_v19 = vadd.f32 %v2867_v1, %v2758_v49  ;;  %v2885_v46 = vsel %vm2844_vm0, %v2884_v8, %v2723_v2  ;;  %v2728_v18 = vmax.f32 %v2664_v24, 0.0  ;;  %v2649_v52 = vadd.f32 %v6390_v16, %v1529_v31  ;;  %v1565_v26 = vpop.permute.xlu0 %1564  ;;  %v2771_v13 = vld [vmem:[#allocation2 + $0x30] sm:$0x3]  ;;  %v2764_v2 = vld [vmem:[#allocation2 + $0x22] sm:$0x3] }
 0x1fd   : > { %v2960_v9 = vadd.f32 %v2885_v46, %v2767_v47  ;;  %v2870_v0 = vrot.slane %v2710_v10, 7  ;;  %v2650_v43 = vadd.f32 %v6391_v28, %v1529_v31  ;;  %v2727_v34 = vmax.f32 %v2663_v36, 0.0  ;;  %v2766_v28 = vld [vmem:[#allocation2 + $0x26] sm:$0x3] }
 0x1fe   : > { %2983 = vst [vmem:[#allocation2 + $0x16] sm:$0x3] %v2951_v19  ;;  %v2888_v39 = vrot.slane %v2728_v18, 7  ;;  %v2667_v50 = vadd.f32 %v5692_v25, %v1565_v26  ;;  %v2668_v51 = vadd.f32 %v5695_v62, %v1565_v26  ;;  %v2611_v38 = vadd.f32 %v2483_v37, %v5658_v29  ;;  %v6392_v25 = vld [vmem:[#allocation48_spill] sm:$0xff]  ;;  %v6393_v62 = vld [vmem:[#allocation19_spill] sm:$0xff] }
 0x1ff   : > { %2992 = vst [vmem:[#allocation2 + $0x28] sm:$0x3] %v2960_v9  ;;  %v2871_v58 = vsel %vm2844_vm0, %v2870_v0, %v2709_v15  ;;  %v2714_v5 = vmax.f32 %v2650_v43, 0.0  ;;  %v2612_v57 = vadd.f32 %v2484_v33, %v5662_v42  ;;  %v2713_v30 = vmax.f32 %v2649_v52, 0.0  ;;  %v1537_v27 = vpop.permute.xlu1 %1536  ;;  %v6396_v26 = vld [vmem:[#allocation51_spill] sm:$0xff] }
 0x200   : > { %v2953_v35 = vadd.f32 %v2871_v58, %v2760_v14  ;;  %v2889_v54 = vsel %vm2844_vm0, %v2888_v39, %v2727_v34  ;;  %v2732_v3 = vmax.f32 %v2668_v51, 0.0  ;;  %v2653_v40 = vadd.f32 %v6392_v25, %v1537_v27  ;;  %v1573_v7 = vpop.permute.xlu0 %1572  ;;  %v6397_v34 = vld [vmem:[#allocation21_spill] sm:$0xff]  ;;  %v6398_v25 = vld [vmem:[#allocation55_spill] sm:$0xff] }
 0x201   : > { %v2962_v41 = vadd.f32 %v2889_v54, %v2769_v22  ;;  %v2874_v23 = vrot.slane %v2714_v5, 7  ;;  %v2654_v56 = vadd.f32 %v6393_v62, %v1537_v27  ;;  %v2731_v17 = vmax.f32 %v2667_v50, 0.0  ;;  %v2775_v51 = vld [vmem:[#allocation2 + $0x38] sm:$0x3]  ;;  %v6399_v62 = vld [vmem:[#allocation23_spill] sm:$0xff] }
 0x202   : > { %2985 = vst [vmem:[#allocation2 + $0x1a] sm:$0x3] %v2953_v35  ;;  %v2892_v29 = vrot.slane %v2732_v3, 7  ;;  %v2671_v42 = vadd.f32 %v5744_v32, %v1573_v7  ;;  %v2672_v37 = vadd.f32 %v5749_v20, %v1573_v7  ;;  %v2487_v33 = vrot.slane %v5766_v63, 3  ;;  %v6394_v32 = vld [vmem:[#allocation50_spill] sm:$0xff]  ;;  %v6395_v20 = vld [vmem:[#allocation20_spill] sm:$0xff] }
 0x203   : > { %v2488_v61 = vrot.slane %v5770_v60, 3  ;;  %2994 = vst [vmem:[#allocation2 + $0x2c] sm:$0x3] %v2962_v41  ;;  %v2875_v49 = vsel %vm2844_vm0, %v2874_v23, %v2713_v30  ;;  %v2718_v45 = vmax.f32 %v2654_v56, 0.0  ;;  %v2717_v48 = vmax.f32 %v2653_v40, 0.0  ;;  %v1545_v6 = vpop.permute.xlu1 %1544 }
 0x204   : > { %v2955_v4 = vadd.f32 %v2875_v49, %v2762_v59  ;;  %v2893_v53 = vsel %vm2844_vm0, %v2892_v29, %v2731_v17  ;;  %v2736_v55 = vmax.f32 %v2672_v37, 0.0  ;;  %v2657_v36 = vadd.f32 %v6394_v32, %v1545_v6  ;;  %v1581_v44 = vpop.permute.xlu0 %1580  ;;  %v2773_v63 = vld [vmem:[#allocation2 + $0x34] sm:$0x3]  ;;  %v2768_v59 = vld [vmem:[#allocation2 + $0x2a] sm:$0x3] }
 0x205   : > { %v2964_v47 = vadd.f32 %v2893_v53, %v2771_v13  ;;  %v2878_v8 = vrot.slane %v2718_v45, 7  ;;  %v2658_v24 = vadd.f32 %v6395_v20, %v1545_v6  ;;  %v2735_v11 = vmax.f32 %v2671_v42, 0.0  ;;  %v2777_v7 = vld [vmem:[#allocation2 + $0x3c] sm:$0x3]  ;;  %v6401_v6 = vld [vmem:[#allocation57_spill] sm:$0xff] }
 0x206   : > { %2987 = vst [vmem:[#allocation2 + $0x1e] sm:$0x3] %v2955_v4  ;;  %v2896_v60 = vrot.slane %v2736_v55, 7  ;;  %v2675_v1 = vadd.f32 %v2611_v38, %v1581_v44  ;;  %v2676_v10 = vadd.f32 %v2612_v57, %v1581_v44  ;;  %v2615_v15 = vadd.f32 %v2487_v33, %v5714_v21  ;;  %v2770_v4 = vld [vmem:[#allocation2 + $0x2e] sm:$0x3] }
 0x207   : > { %2996 = vst [vmem:[#allocation2 + $0x30] sm:$0x3] %v2964_v47  ;;  %v2879_v19 = vsel %vm2844_vm0, %v2878_v8, %v2717_v48  ;;  %v2722_v46 = vmax.f32 %v2658_v24, 0.0  ;;  %v2616_v18 = vadd.f32 %v2488_v61, %v5719_v12  ;;  %v2721_v14 = vmax.f32 %v2657_v36, 0.0  ;;  %v1553_v16 = vpop.permute.xlu1 %1552  ;;  %v6400_v48 = vld [vmem:[#allocation64_spill] sm:$0xff] }
 0x208   : > { %v2957_v31 = vadd.f32 %v2879_v19, %v2764_v2  ;;  %v2897_v9 = vsel %vm2844_vm0, %v2896_v60, %v2735_v11  ;;  %v2740_v0 = vmax.f32 %v2676_v10, 0.0  ;;  %v2661_v22 = vadd.f32 %v6396_v26, %v1553_v16  ;;  %v1589_v50 = vpop.permute.xlu0 %1588  ;;  %v2772_v20 = vld [vmem:[#allocation2 + $0x32] sm:$0x3]  ;;  %v6403_v60 = vld [vmem:[#allocation61_spill] sm:$0xff] }
 0x209   : > { %v2966_v52 = vadd.f32 %v2897_v9, %v2773_v63  ;;  %v2882_v43 = vrot.slane %v2722_v46, 7  ;;  %v2662_v39 = vadd.f32 %v6397_v34, %v1553_v16  ;;  %v2739_v58 = vmax.f32 %v2675_v1, 0.0  ;;  %v6402_v63 = vld [vmem:[#allocation59_spill] sm:$0xff]  ;;  %v2776_v34 = vld [vmem:[#allocation2 + $0x3a] sm:$0x3] }
 0x20a   : > { %2989 = vst [vmem:[#allocation2 + $0x22] sm:$0x3] %v2957_v31  ;;  %v2900_v21 = vrot.slane %v2740_v0, 7  ;;  %v2679_v5 = vadd.f32 %v2615_v15, %v1589_v50  ;;  %v2680_v12 = vadd.f32 %v2616_v18, %v1589_v50  ;;  %v2725_v30 = vmax.f32 %v2661_v22, 0.0  ;;  %v2774_v18 = vld [vmem:[#allocation2 + $0x36] sm:$0x3] }
 0x20b   : > { %2998 = vst [vmem:[#allocation2 + $0x34] sm:$0x3] %v2966_v52  ;;  %v2883_v38 = vsel %vm2844_vm0, %v2882_v43, %v2721_v14  ;;  %v2726_v57 = vmax.f32 %v2662_v39, 0.0  ;;  %v1561_v27 = vpop.permute.xlu1 %1560  ;;  %v6404_v14 = vld [vmem:[#allocation66_spill] sm:$0xff]  ;;  %v6405_v16 = vld [vmem:[#allocation63_spill] sm:$0xff] }
 0x20c   : > { %v2959_v35 = vadd.f32 %v2883_v38, %v2766_v28  ;;  %v2901_v54 = vsel %vm2844_vm0, %v2900_v21, %v2739_v58  ;;  %v2744_v3 = vmax.f32 %v2680_v12, 0.0  ;;  %v2665_v40 = vadd.f32 %v6398_v25, %v1561_v27  ;;  %v6407_v21 = vld [vmem:[#allocation67_spill] sm:$0xff] }
 0x20d   : > { %v2968_v41 = vadd.f32 %v2901_v54, %v2775_v51  ;;  %v2886_v23 = vrot.slane %v2726_v57, 7  ;;  %v2666_v56 = vadd.f32 %v6399_v62, %v1561_v27  ;;  %v2743_v13 = vmax.f32 %v2679_v5, 0.0  ;;  %v6406_v51 = vld [vmem:[#allocation24_spill] sm:$0xff] }
 0x20e   : > { %2991 = vst [vmem:[#allocation2 + $0x26] sm:$0x3] %v2959_v35  ;;  %v2904_v17 = vrot.slane %v2744_v3, 7  ;;  %v2729_v61 = vmax.f32 %v2665_v40, 0.0  ;;  %v2778_v35 = vld [vmem:[#allocation2 + $0x3e] sm:$0x3] }
 0x20f   : > { %3000 = vst [vmem:[#allocation2 + $0x38] sm:$0x3] %v2968_v41  ;;  %v2887_v29 = vsel %vm2844_vm0, %v2886_v23, %v2725_v30  ;;  %v2730_v42 = vmax.f32 %v2666_v56, 0.0  ;;  %v1569_v49 = vpop.permute.xlu1 %1568 }
 0x210   : > { %v2961_v37 = vadd.f32 %v2887_v29, %v2768_v59  ;;  %v2905_v33 = vsel %vm2844_vm0, %v2904_v17, %v2743_v13  ;;  %v2669_v55 = vadd.f32 %v6400_v48, %v1569_v49  ;;  %v2670_v47 = vadd.f32 %v6401_v6, %v1569_v49 }
 0x211   : > { %v2970_v45 = vadd.f32 %v2905_v33, %v2777_v7  ;;  %v2890_v53 = vrot.slane %v2730_v42, 7 }
 0x212   : > { %2993 = vst [vmem:[#allocation2 + $0x2a] sm:$0x3] %v2961_v37  ;;  %v2734_v8 = vmax.f32 %v2670_v47, 0.0  ;;  %v2733_v24 = vmax.f32 %v2669_v55, 0.0 }
 0x213   : > { %3002 = vst [vmem:[#allocation2 + $0x3c] sm:$0x3] %v2970_v45  ;;  %v2891_v2 = vsel %vm2844_vm0, %v2890_v53, %v2729_v61  ;;  %v1577_v36 = vpop.permute.xlu1 %1576 }
 0x214   : > { %v2963_v32 = vadd.f32 %v2891_v2, %v2770_v4  ;;  %v2894_v44 = vrot.slane %v2734_v8, 7  ;;  %v2673_v11 = vadd.f32 %v6402_v63, %v1577_v36  ;;  %v2674_v1 = vadd.f32 %v6403_v60, %v1577_v36 }
 0x216   : > { %2995 = vst [vmem:[#allocation2 + $0x2e] sm:$0x3] %v2963_v32  ;;  %v2895_v10 = vsel %vm2844_vm0, %v2894_v44, %v2733_v24  ;;  %v2738_v19 = vmax.f32 %v2674_v1, 0.0  ;;  %v2737_v31 = vmax.f32 %v2673_v11, 0.0 }
 0x217   : > { %v2965_v46 = vadd.f32 %v2895_v10, %v2772_v20  ;;  %v1585_v15 = vpop.permute.xlu1 %1584 }
 0x218   : > { %v2898_v9 = vrot.slane %v2738_v19, 7  ;;  %v2677_v0 = vadd.f32 %v6404_v14, %v1585_v15  ;;  %v2678_v52 = vadd.f32 %v6405_v16, %v1585_v15 }
 0x219   : > { %2997 = vst [vmem:[#allocation2 + $0x32] sm:$0x3] %v2965_v46 }
 0x21a   : > { %v2899_v28 = vsel %vm2844_vm0, %v2898_v9, %v2737_v31  ;;  %v2742_v43 = vmax.f32 %v2678_v52, 0.0  ;;  %v2741_v39 = vmax.f32 %v2677_v0, 0.0 }
 0x21b   : > { %v2967_v26 = vadd.f32 %v2899_v28, %v2774_v18  ;;  %v1593_v22 = vpop.permute.xlu1 %1592 }
 0x21c   : > { %v2902_v50 = vrot.slane %v2742_v43, 7  ;;  %v2681_v58 = vadd.f32 %v6406_v51, %v1593_v22  ;;  %v2682_v5 = vadd.f32 %v6407_v21, %v1593_v22 }
 0x21d   : > { %2999 = vst [vmem:[#allocation2 + $0x36] sm:$0x3] %v2967_v26 }
 0x21e   : > { %v2903_v12 = vsel %vm2844_vm0, %v2902_v50, %v2741_v39  ;;  %v2746_v38 = vmax.f32 %v2682_v5, 0.0  ;;  %v2745_v54 = vmax.f32 %v2681_v58, 0.0 }
 0x21f   : > { %v2969_v57 = vadd.f32 %v2903_v12, %v2776_v34 }
 0x220   : > { %v2906_v30 = vrot.slane %v2746_v38, 7 }
 0x221   : > { %3001 = vst [vmem:[#allocation2 + $0x3a] sm:$0x3] %v2969_v57  ;;  %3007 = sbr.rel (%p3589_p7) target bundleno = 1069 (0x42d), region = 52 }
 0x222   : > { %v2907_v3 = vsel %vm2844_vm0, %v2906_v30, %v2745_v54 }
 0x223   : > { %v2971_v27 = vadd.f32 %v2907_v3, %v2778_v35 }
 0x225   : > { %3003 = vst [vmem:[#allocation2 + $0x3e] sm:$0x3] %v2971_v27 }
 0x226   : > { %v3010_v41 = vld [vmem:[#allocation2 + $0x4] sm:$0x3]  ;;  %vm3040_vm1 = vcmask 1041408   ;;  %v3008_v59 = vld [vmem:[#allocation2] sm:$0x3]  ;;  %vm3352_vm2 = vcmask 1042434  }
 0x227   : > { %v3047_v23 = vsel %vm3040_vm1, %v3010_v41, 0.0  ;;  %v3041_v25 = vsel %vm3040_vm1, %v3008_v59, 0.0  ;;  %v3011_v40 = vld [vmem:[#allocation2 + $0x6] sm:$0x3]  ;;  %v3009_v62 = vld [vmem:[#allocation2 + $0x2] sm:$0x3] }
 0x228   : > { %3048 = vadd.xlane.f32.xlu1 %v3047_v23  ;;  %3042 = vadd.xlane.f32.xlu0 %v3041_v25  ;;  %v3050_v56 = vsel %vm3040_vm1, %v3011_v40, 0.0  ;;  %v3044_v7 = vsel %vm3040_vm1, %v3009_v62, 0.0  ;;  %v3017_v13 = vld [vmem:[#allocation2 + $0x12] sm:$0x3]  ;;  %v3016_v17 = vld [vmem:[#allocation2 + $0x10] sm:$0x3] }
 0x229   : > { %v3068_v29 = vsel %vm3040_vm1, %v3017_v13, 0.0  ;;  %v3065_v42 = vsel %vm3040_vm1, %v3016_v17, 0.0  ;;  %v3018_v37 = vld [vmem:[#allocation2 + $0x14] sm:$0x3]  ;;  %v3012_v33 = vld [vmem:[#allocation2 + $0x8] sm:$0x3] }
 0x22a   : > { %v3071_v61 = vsel %vm3040_vm1, %v3018_v37, 0.0  ;;  %v3053_v49 = vsel %vm3040_vm1, %v3012_v33, 0.0  ;;  %v3019_v45 = vld [vmem:[#allocation2 + $0x16] sm:$0x3]  ;;  %v3013_v4 = vld [vmem:[#allocation2 + $0xa] sm:$0x3] }
 0x22b   : > { %v3074_v53 = vsel %vm3040_vm1, %v3019_v45, 0.0  ;;  %v3056_v48 = vsel %vm3040_vm1, %v3013_v4, 0.0  ;;  %v3025_v55 = vld [vmem:[#allocation2 + $0x22] sm:$0x3]  ;;  %v3024_v6 = vld [vmem:[#allocation2 + $0x20] sm:$0x3]  ;;  %v6408_v4 = vlaneseq }
 0x22c   : > { %3051 = vadd.xlane.f32.xlu1 %v3050_v56  ;;  %3045 = vadd.xlane.f32.xlu0 %v3044_v7  ;;  %v3092_v47 = vsel %vm3040_vm1, %v3025_v55, 0.0  ;;  %v3089_v2 = vsel %vm3040_vm1, %v3024_v6, 0.0  ;;  %v3020_v8 = vld [vmem:[#allocation2 + $0x18] sm:$0x3]  ;;  %v3014_v32 = vld [vmem:[#allocation2 + $0xc] sm:$0x3] }
 0x22d   : > { %v3077_v36 = vsel %vm3040_vm1, %v3020_v8, 0.0  ;;  %v3059_v20 = vsel %vm3040_vm1, %v3014_v32, 0.0  ;;  %v3015_v24 = vld [vmem:[#allocation2 + $0xe] sm:$0x3]  ;;  %v3026_v44 = vld [vmem:[#allocation2 + $0x24] sm:$0x3] }
 0x22e   : > { %v3062_v63 = vsel %vm3040_vm1, %v3015_v24, 0.0  ;;  %v3095_v11 = vsel %vm3040_vm1, %v3026_v44, 0.0  ;;  %v3027_v60 = vld [vmem:[#allocation2 + $0x26] sm:$0x3]  ;;  %v3021_v1 = vld [vmem:[#allocation2 + $0x1a] sm:$0x3] }
 0x22f   : > { %v3098_v10 = vsel %vm3040_vm1, %v3027_v60, 0.0  ;;  %v3080_v19 = vsel %vm3040_vm1, %v3021_v1, 0.0  ;;  %v3033_v46 = vld [vmem:[#allocation2 + $0x32] sm:$0x3]  ;;  %v3032_v15 = vld [vmem:[#allocation2 + $0x30] sm:$0x3] }
 0x230   : > { %3069 = vadd.xlane.f32.xlu1 %v3068_v29  ;;  %3066 = vadd.xlane.f32.xlu0 %v3065_v42  ;;  %v3116_v18 = vsel %vm3040_vm1, %v3033_v46, 0.0  ;;  %v3113_v31 = vsel %vm3040_vm1, %v3032_v15, 0.0  ;;  %v3028_v9 = vld [vmem:[#allocation2 + $0x28] sm:$0x3]  ;;  %v3022_v14 = vld [vmem:[#allocation2 + $0x1c] sm:$0x3] }
 0x231   : > { %v3101_v0 = vsel %vm3040_vm1, %v3028_v9, 0.0  ;;  %v3083_v16 = vsel %vm3040_vm1, %v3022_v14, 0.0  ;;  %v3023_v52 = vld [vmem:[#allocation2 + $0x1e] sm:$0x3]  ;;  %v3034_v28 = vld [vmem:[#allocation2 + $0x34] sm:$0x3] }
 0x232   : > { %v3086_v43 = vsel %vm3040_vm1, %v3023_v52, 0.0  ;;  %v3119_v26 = vsel %vm3040_vm1, %v3034_v28, 0.0  ;;  %v3035_v22 = vld [vmem:[#allocation2 + $0x36] sm:$0x3]  ;;  %v3029_v34 = vld [vmem:[#allocation2 + $0x2a] sm:$0x3] }
 0x233   : > { %v3122_v39 = vsel %vm3040_vm1, %v3035_v22, 0.0  ;;  %v3104_v50 = vsel %vm3040_vm1, %v3029_v34, 0.0  ;;  %v3036_v51 = vld [vmem:[#allocation2 + $0x38] sm:$0x3]  ;;  %v3030_v58 = vld [vmem:[#allocation2 + $0x2c] sm:$0x3] }
 0x234   : > { %3072 = vadd.xlane.f32.xlu1 %v3071_v61  ;;  %3054 = vadd.xlane.f32.xlu0 %v3053_v49  ;;  %v3125_v21 = vsel %vm3040_vm1, %v3036_v51, 0.0  ;;  %v3107_v5 = vsel %vm3040_vm1, %v3030_v58, 0.0  ;;  %v3037_v12 = vld [vmem:[#allocation2 + $0x3a] sm:$0x3]  ;;  %v3031_v38 = vld [vmem:[#allocation2 + $0x2e] sm:$0x3] }
 0x235   : > { %v3128_v57 = vsel %vm3040_vm1, %v3037_v12, 0.0  ;;  %v3110_v35 = vsel %vm3040_vm1, %v3031_v38, 0.0  ;;  %v3038_v54 = vld [vmem:[#allocation2 + $0x3c] sm:$0x3]  ;;  %v3039_v30 = vld [vmem:[#allocation2 + $0x3e] sm:$0x3] }
 0x236   : > { %v3131_v3 = vsel %vm3040_vm1, %v3038_v54, 0.0  ;;  %v3134_v27 = vsel %vm3040_vm1, %v3039_v30, 0.0  ;;  %v3176_v41 = vld [vmem:[%s5981_s3 + $0x38] sm:$0xff]  ;;  %v3175_v59 = vld [vmem:[%s5981_s3 + $0x30] sm:$0xff]  ;;  %v3174_v23 = vld [vmem:[%s5981_s3 + $0x28] sm:$0xff]  ;;  %v3807_v40 = vmov 0.0  }
 0x237   : > { %3449 = vmatprep.subr.mxu0 %v3176_v41  ;;  %v3173_v25 = vld [vmem:[%s5981_s3 + $0x20] sm:$0xff]  ;;  %3489 = vmatprep.mubr.f32.mxu0 %v3807_v40  ;;  %v3172_v62 = vld [vmem:[%s5981_s3 + $0x18] sm:$0xff]  ;;  %v3171_v56 = vld [vmem:[%s5981_s3 + $0x10] sm:$0xff]  ;;  %vm3354_vm3 = vcmask 1043459   ;;  %vm3356_vm4 = vcmask 1044484   ;;  %vm3358_vm5 = vcmask 1045509  }
 0x238   : > { %3075 = vadd.xlane.f32.xlu1 %v3074_v53  ;;  %3057 = vadd.xlane.f32.xlu0 %v3056_v48  ;;  %v3170_v7 = vld [vmem:[%s5981_s3 + $0x8] sm:$0xff]  ;;  %v3169_v13 = vld [vmem:[%s5981_s3] sm:$0xff]  ;;  %v3222_v53 = vand.u32 127, %v6408_v4  ;;  %vm3360_vm6 = vcmask 1046534   ;;  %vm3362_vm7 = vcmask 1047559   ;;  %vm3421_vm8 = vcmask 261120  }
 0x239   : > { %3450 = vmatpush1.msra.mxu0 %v3175_v59 }
 0x23a   : > { %3451 = vmatprep.subr.mxu0 %v3174_v23 }
 0x23b   : > { %3452 = vmatpush1.msra.mxu0 %v3173_v25 }
 0x23c   : > { %3093 = vadd.xlane.f32.xlu1 %v3092_v47  ;;  %3090 = vadd.xlane.f32.xlu0 %v3089_v2  ;;  %v6409_v47 = vld [vmem:[#allocation9_spill] sm:$0xff] }
 0x23d   : > { %3453 = vmatprep.subr.mxu0 %v3172_v62  ;;  %v5876_v2 = vsub.s32 %v3222_v53, %v6409_v47 }
 0x23e   : > { %3454 = vmatpush1.msra.mxu0 %v3171_v56 }
 0x23f   : > { %3455 = vmatprep.subr.mxu0 %v3170_v7 }
 0x240   : > { %3078 = vadd.xlane.f32.xlu1 %v3077_v36  ;;  %3060 = vadd.xlane.f32.xlu0 %v3059_v20 }
 0x241   : > { %3456 = vmatpush1.msra.mxu0 %v3169_v13 }
 0x244   : > { %3063 = vadd.xlane.f32.xlu1 %v3062_v63  ;;  %3096 = vadd.xlane.f32.xlu0 %v3095_v11 }
 0x248   : > { %3099 = vadd.xlane.f32.xlu1 %v3098_v10  ;;  %3081 = vadd.xlane.f32.xlu0 %v3080_v19 }
 0x24c   : > { %3117 = vadd.xlane.f32.xlu1 %v3116_v18  ;;  %3114 = vadd.xlane.f32.xlu0 %v3113_v31 }
 0x250   : > { %3102 = vadd.xlane.f32.xlu1 %v3101_v0  ;;  %3084 = vadd.xlane.f32.xlu0 %v3083_v16 }
 0x254   : > { %3087 = vadd.xlane.f32.xlu1 %v3086_v43  ;;  %3120 = vadd.xlane.f32.xlu0 %v3119_v26 }
 0x258   : > { %3123 = vadd.xlane.f32.xlu1 %v3122_v39  ;;  %3105 = vadd.xlane.f32.xlu0 %v3104_v50 }
 0x25c   : > { %3126 = vadd.xlane.f32.xlu1 %v3125_v21  ;;  %3108 = vadd.xlane.f32.xlu0 %v3107_v5 }
 0x260   : > { %3129 = vadd.xlane.f32.xlu1 %v3128_v57  ;;  %3111 = vadd.xlane.f32.xlu0 %v3110_v35 }
 0x264   : > { %3132 = vadd.xlane.f32.xlu0 %v3131_v3  ;;  %3135 = vadd.xlane.f32.xlu1 %v3134_v27 }
 0x2b1   : > { %v3049_v17 = vpop.xlane.xlu1 %3048  ;;  %v3043_v29 = vpop.xlane.xlu0 %3042 }
 0x2b2   : > { %v3137_v8 = vmul.f32 0.00390625, %v3043_v29  ;;  %v3139_v36 = vmul.f32 0.00390625, %v3049_v17 }
 0x2b4   : > { %v3226_v44 = vrot.slane %v3137_v8, %v5876_v2  ;;  %v3234_v10 = vrot.slane %v3139_v36, %v5876_v2 }
 0x2b5   : > { %v3052_v42 = vpop.xlane.xlu1 %3051  ;;  %v3046_v37 = vpop.xlane.xlu0 %3045 }
 0x2b6   : > { %v3138_v48 = vmul.f32 0.00390625, %v3046_v37  ;;  %v3140_v63 = vmul.f32 0.00390625, %v3052_v42 }
 0x2b8   : > { %v3230_v32 = vrot.slane %v3138_v48, %v5876_v2  ;;  %v3238_v15 = vrot.slane %v3140_v63, %v5876_v2 }
 0x2b9   : > { %v3070_v33 = vpop.xlane.xlu1 %3069  ;;  %v3067_v61 = vpop.xlane.xlu0 %3066 }
 0x2ba   : > { %v3351_v60 = vsel %vm2844_vm0, %v3230_v32, %v3226_v44  ;;  %v3146_v21 = vmul.f32 0.00390625, %v3070_v33  ;;  %v3145_v5 = vmul.f32 0.00390625, %v3067_v61 }
 0x2bb   : > { %v3353_v31 = vsel %vm3352_vm2, %v3234_v10, %v3351_v60 }
 0x2bc   : > { %v3355_v28 = vsel %vm3354_vm3, %v3238_v15, %v3353_v31  ;;  %v3262_v30 = vrot.slane %v3146_v21, %v5876_v2  ;;  %v3258_v3 = vrot.slane %v3145_v5, %v5876_v2 }
 0x2bd   : > { %v3073_v49 = vpop.xlane.xlu1 %3072  ;;  %v3055_v45 = vpop.xlane.xlu0 %3054 }
 0x2be   : > { %v3141_v11 = vmul.f32 0.00390625, %v3055_v45  ;;  %v3147_v12 = vmul.f32 0.00390625, %v3073_v49  ;;  %v3364_v56 = vsel %vm2844_vm0, %v3262_v30, %v3258_v3 }
 0x2c0   : > { %v3242_v9 = vrot.slane %v3141_v11, %v5876_v2  ;;  %v3266_v41 = vrot.slane %v3147_v12, %v5876_v2 }
 0x2c1   : > { %v3076_v55 = vpop.xlane.xlu1 %3075  ;;  %v3058_v6 = vpop.xlane.xlu0 %3057 }
 0x2c2   : > { %v3142_v1 = vmul.f32 0.00390625, %v3058_v6  ;;  %v3357_v26 = vsel %vm3356_vm4, %v3242_v9, %v3355_v28  ;;  %v3148_v35 = vmul.f32 0.00390625, %v3076_v55  ;;  %v3365_v13 = vsel %vm3352_vm2, %v3266_v41, %v3364_v56 }
 0x2c4   : > { %v3246_v14 = vrot.slane %v3142_v1, %v5876_v2  ;;  %v3270_v25 = vrot.slane %v3148_v35, %v5876_v2 }
 0x2c5   : > { %v3094_v20 = vpop.xlane.xlu1 %3093  ;;  %v3091_v24 = vpop.xlane.xlu0 %3090 }
 0x2c6   : > { %v3359_v34 = vsel %vm3358_vm5, %v3246_v14, %v3357_v26  ;;  %v3366_v37 = vsel %vm3354_vm3, %v3270_v25, %v3365_v13  ;;  %v3154_v49 = vmul.f32 0.00390625, %v3094_v20  ;;  %v3153_v45 = vmul.f32 0.00390625, %v3091_v24 }
 0x2c8   : > { %v3294_v63 = vrot.slane %v3154_v49, %v5876_v2  ;;  %v3290_v11 = vrot.slane %v3153_v45, %v5876_v2 }
 0x2c9   : > { %v3079_v19 = vpop.xlane.xlu1 %3078  ;;  %v3061_v46 = vpop.xlane.xlu0 %3060 }
 0x2ca   : > { %v3143_v18 = vmul.f32 0.00390625, %v3061_v46  ;;  %v3149_v54 = vmul.f32 0.00390625, %v3079_v19  ;;  %v3371_v14 = vsel %vm2844_vm0, %v3294_v63, %v3290_v11 }
 0x2cc   : > { %v3250_v0 = vrot.slane %v3143_v18, %v5876_v2  ;;  %v3274_v62 = vrot.slane %v3149_v54, %v5876_v2 }
 0x2cd   : > { %v3064_v16 = vpop.xlane.xlu1 %3063  ;;  %v3097_v52 = vpop.xlane.xlu0 %3096 }
 0x2ce   : > { %v3144_v43 = vmul.f32 0.00390625, %v3064_v16  ;;  %v3361_v51 = vsel %vm3360_vm6, %v3250_v0, %v3359_v34  ;;  %v3367_v61 = vsel %vm3356_vm4, %v3274_v62, %v3366_v37  ;;  %v3155_v48 = vmul.f32 0.00390625, %v3097_v52 }
 0x2cf   : > { %v3185_v37 = vsub.s32 1, %v6409_v47 }
 0x2d0   : > { %v3254_v22 = vrot.slane %v3144_v43, %v5876_v2  ;;  %v3298_v24 = vrot.slane %v3155_v48, %v5876_v2 }
 0x2d1   : > { %v3100_v39 = vpop.xlane.xlu1 %3099  ;;  %v3082_v50 = vpop.xlane.xlu0 %3081 }
 0x2d2   : > { %v3363_v58 = vsel %vm3362_vm7, %v3254_v22, %v3361_v51  ;;  %v3150_v27 = vmul.f32 0.00390625, %v3082_v50  ;;  %v3156_v32 = vmul.f32 0.00390625, %v3100_v39  ;;  %v3372_v52 = vsel %vm3352_vm2, %v3298_v24, %v3371_v14 }
 0x2d3   : > { %3389 = vxpose.xlu0.b32.start [1/4] (short) (narrow) %v3363_v58, 8 }
 0x2d4   : > { %v3278_v7 = vrot.slane %v3150_v27, %v5876_v2  ;;  %v3302_v46 = vrot.slane %v3156_v32, %v5876_v2 }
 0x2d5   : > { %v3118_v38 = vpop.xlane.xlu1 %3117  ;;  %v3115_v57 = vpop.xlane.xlu0 %3114 }
 0x2d6   : > { %v3368_v53 = vsel %vm3358_vm5, %v3278_v7, %v3367_v61  ;;  %v3162_v60 = vmul.f32 0.00390625, %v3118_v38  ;;  %v3161_v1 = vmul.f32 0.00390625, %v3115_v57  ;;  %v3373_v39 = vsel %vm3354_vm3, %v3302_v46, %v3372_v52  ;;  %v6410_v61 = vld [vmem:[#allocation10_spill] sm:$0xff] }
 0x2d8   : > { %v3326_v28 = vrot.slane %v3162_v60, %v5876_v2  ;;  %v3322_v43 = vrot.slane %v3161_v1, %v5876_v2 }
 0x2d9   : > { %v3103_v59 = vpop.xlane.xlu1 %3102  ;;  %v3085_v23 = vpop.xlane.xlu0 %3084 }
 0x2da   : > { %v3151_v40 = vmul.f32 0.00390625, %v3085_v23  ;;  %v3157_v44 = vmul.f32 0.00390625, %v3103_v59  ;;  %v3378_v35 = vsel %vm2844_vm0, %v3326_v28, %v3322_v43 }
 0x2dc   : > { %v3282_v17 = vrot.slane %v3151_v40, %v5876_v2  ;;  %v3306_v31 = vrot.slane %v3157_v44, %v5876_v2 }
 0x2dd   : > { %v3088_v29 = vpop.xlane.xlu1 %3087  ;;  %v3121_v42 = vpop.xlane.xlu0 %3120 }
 0x2de   : > { %v3152_v33 = vmul.f32 0.00390625, %v3088_v29  ;;  %v3369_v8 = vsel %vm3360_vm6, %v3282_v17, %v3368_v53  ;;  %v3163_v15 = vmul.f32 0.00390625, %v3121_v42  ;;  %v3374_v21 = vsel %vm3356_vm4, %v3306_v31, %v3373_v39 }
 0x2e0   : > { %v3286_v4 = vrot.slane %v3152_v33, %v5876_v2  ;;  %v3330_v50 = vrot.slane %v3163_v15, %v5876_v2  ;;  %v3177_v33 = vld [vmem:[%s5982_s4] sm:$0x3] }
 0x2e1   : > { %v3124_v55 = vpop.xlane.xlu1 %3123  ;;  %v3106_v6 = vpop.xlane.xlu0 %3105  ;;  %v3182_v49 = vrot.slane %v3177_v33, %v6410_v61  ;;  %v3186_v45 = vrot.slane %v3177_v33, %v3185_v37 }
 0x2e2   : > { %v3370_v36 = vsel %vm3362_vm7, %v3286_v4, %v3369_v8  ;;  %v3158_v20 = vmul.f32 0.00390625, %v3106_v6  ;;  %v3164_v9 = vmul.f32 0.00390625, %v3124_v55  ;;  %v3379_v41 = vsel %vm3352_vm2, %v3330_v50, %v3378_v35 }
 0x2e3   : > { %3390 = vxpose.xlu0.b32.cont [2/4] (short) (narrow) %v3370_v36, 8 }
 0x2e4   : > { %v3310_v0 = vrot.slane %v3158_v20, %v5876_v2  ;;  %v3334_v5 = vrot.slane %v3164_v9, %v5876_v2 }
 0x2e5   : > { %v3127_v10 = vpop.xlane.xlu1 %3126  ;;  %v3109_v19 = vpop.xlane.xlu0 %3108 }
 0x2e6   : > { %v3159_v18 = vmul.f32 0.00390625, %v3109_v19  ;;  %v3165_v16 = vmul.f32 0.00390625, %v3127_v10  ;;  %v3375_v57 = vsel %vm3358_vm5, %v3310_v0, %v3374_v21  ;;  %v3380_v40 = vsel %vm3354_vm3, %v3334_v5, %v3379_v41 }
 0x2e8   : > { %v3314_v26 = vrot.slane %v3159_v18, %v5876_v2  ;;  %v3338_v12 = vrot.slane %v3165_v16, %v5876_v2 }
 0x2e9   : > { %v3130_v22 = vpop.xlane.xlu1 %3129  ;;  %v3112_v34 = vpop.xlane.xlu0 %3111 }
 0x2ea   : > { %v3166_v51 = vmul.f32 0.00390625, %v3130_v22  ;;  %v3160_v58 = vmul.f32 0.00390625, %v3112_v34  ;;  %v3376_v27 = vsel %vm3360_vm6, %v3314_v26, %v3375_v57  ;;  %v3381_v62 = vsel %vm3356_vm4, %v3338_v12, %v3380_v40 }
 0x2ec   : > { %v3318_v38 = vrot.slane %v3160_v58, %v5876_v2  ;;  %v3342_v54 = vrot.slane %v3166_v51, %v5876_v2 }
 0x2ed   : > { %v3133_v30 = vpop.xlane.xlu0 %3132  ;;  %v3136_v3 = vpop.xlane.xlu1 %3135 }
 0x2ee   : > { %v3167_v59 = vmul.f32 0.00390625, %v3133_v30  ;;  %v3168_v23 = vmul.f32 0.00390625, %v3136_v3  ;;  %v3377_v25 = vsel %vm3362_vm7, %v3318_v38, %v3376_v27  ;;  %v3382_v13 = vsel %vm3358_vm5, %v3342_v54, %v3381_v62 }
 0x2ef   : > { %3391 = vxpose.xlu0.b32.cont [3/4] (short) (narrow) %v3377_v25, 8 }
 0x2f0   : > { %v3346_v56 = vrot.slane %v3167_v59, %v5876_v2  ;;  %v3350_v7 = vrot.slane %v3168_v23, %v5876_v2 }
 0x2f2   : > { %v3383_v17 = vsel %vm3360_vm6, %v3346_v56, %v3382_v13 }
 0x2f3   : > { %v3384_v29 = vsel %vm3362_vm7, %v3350_v7, %v3383_v17 }
 0x2f4   : > { %3392 = vxpose.xlu0.b32.end [4/4] (short) (narrow) %v3384_v29, 8 }
 0x364   : > { %v3405_v42 = vpop.trf.xlu0 }
 0x365   : > { %3590 = vmatmul.mubr.msk.f32.vlgmr.msra.gmra.mxu0 %vm3421_vm8, %v3405_v42 }
 0x425   : > { %v3491_v2 = vpop.f32.mrf.mxu0 }
 0x426   : > { %v3492_v53 = vadd.f32 %v3491_v2, %v3182_v49 }
 0x427   : > { %v3493_v4 = vpop.f32.mrf.mxu0 }
 0x428   : > { %v3494_v48 = vadd.f32 %v3493_v4, %v3186_v45 }
 0x42a   : > { %v3498_v55 = vcombine.low %v3492_v53, %v3494_v48 }
 0x42c   : > { %3591 = vst.sshfl [vmem:[#allocation6] sm:$0x33 pattern:$0x76325410] %v3498_v55 }
 0x42d PF: > { %p5945_p9 = scmp.eq.s32.totalorder %s3581_s24, 1  ;;  %s3808_s10 = smov [#allocation6]  }
 0x42e   : > { %s3518_s29 = sshll.u32 %s3808_s10, 4  ;;  %s3519_s29 = int_to_ptr.vmem [resolvable:$true] %s3518_s29 }
 0x42f   : > { %s3717_s11 = scalar_lea.vmem %s3519_s29, 64  ;;  %p3724_p13 = scmp.lt.s32.totalorder %s3519_s29, %s3519_s29 }
 0x430   : > { %p3718_p10 = scmp.ne.s32.totalorder %s3519_s29, %s3717_s11  ;;  %p3725_p0 = scmp.lt.s32.totalorder %s3717_s11, %s3717_s11 }
 0x432   : > { %p3719_p11 = pnand %p3718_p10, %p5945_p9  ;;  %p3726_p1 = por %p3725_p0, %p3724_p13 }
 0x434   : > { %p3720_p12 = pneg %p3719_p11 }
 0x436   : > { %p3727_p2 = pnand %p3726_p1, %p3720_p12 }
 0x438   : > { %3730 = shalt.err (!%p3727_p2)
}
 0x439   : > { %3599 = dma.vmem_to_hbm [thread:$0]  (%p5945_p9), %s3519_s29, 64, %s5983_s5, [#allocation5]  }
 0x43a   : > { %3770 = dma.done.wait (%p5945_p9), [#allocation5], 64  }
 0x43b   : > { %3772 = vsyncadd (%p5945_p9), [#allocation5], 4294967232 }
 0x43c PF: > { %s19_s23 = sadd.s32 1, %s3795_s23   ;;  %s6412_s18 = smov %s3779_s19 }
 0x43d   : > { %p16_p3 = scmp.ge.s32.totalorder %s19_s23, 4   ;;  %s6413_s19 = smov %s3783_s20 }
 0x43e   : > { %s6414_s20 = smov %s3890_s30  ;;  %s6415_s21 = smov %s3791_s22 }
 0x43f   : > { %s6416_s22 = smov %s6418_s25  ;;  %18 = sbr.rel (!%p16_p3) target bundleno = 5 (0x5), region = 86 }
 0x444   :  { %3531 = vsyncpa [#allocation4], 1 }
 0x445   :  { %3533 = vsyncpa [#allocation4 + $0x1], 1 }
 0x446   :  { %3534 = vsyncpa [#allocation5], 1 }
 0x447   :  { %3536 = vsyncpa [#allocation5 + $0x1], 1 }

</bundles_post_ra>
